<compile_context>
chip_gen: v5e
topology: v5e:2x2
jax: 0.10.0
libtpu: 0.0.40
codegen_flags: <defaults>
</compile_context>

<pallas_src>
import functools
import math

import jax
import jax.numpy as jnp
from jax.experimental import pallas as pl
from jax.experimental.pallas import tpu as pltpu


def _conv_bn_silu_kernel(x_ref, w_ref, scale_ref, bias_ref, o_ref, xpad_ref,
                         *, KH, KW, TH):
    """One grid step = TH output rows of one image (NHWC).

    x_ref:     (1, H, W, C1)        bf16 full image (resident across h-tiles)
    w_ref:     (KH, KW, C1, C2o)    bf16 conv weights (single-buffered)
    scale_ref: (1, C2o)             f32 BN scale  (gamma / sqrt(var+eps))
    bias_ref:  (1, C2o)             f32 BN bias   (beta - mean*scale)
    o_ref:     (1, TH, W, C2o)      output tile
    xpad_ref:  (H+2ph, W+2pw, C1)   bf16 scratch: zero-haloed copy of the image
    """
    H, W, C1 = x_ref.shape[1], x_ref.shape[2], x_ref.shape[3]
    C2o = o_ref.shape[3]
    pad_h, pad_w = KH // 2, KW // 2
    Hp, Wp = H + 2 * pad_h, W + 2 * pad_w
    i = pl.program_id(1)

    # Build the zero-haloed image once per image (first h-tile); the scratch persists
    # across the sequential ("arbitrary") h axis, so later tiles reuse it.
    @pl.when(i == 0)
    def _():
        if pad_h > 0:
            xpad_ref[pl.ds(0, pad_h), :, :] = jnp.zeros((pad_h, Wp, C1), xpad_ref.dtype)
            xpad_ref[pl.ds(pad_h + H, pad_h), :, :] = jnp.zeros((pad_h, Wp, C1), xpad_ref.dtype)
        if pad_w > 0:
            xpad_ref[:, pl.ds(0, pad_w), :] = jnp.zeros((Hp, pad_w, C1), xpad_ref.dtype)
            xpad_ref[:, pl.ds(pad_w + W, pad_w), :] = jnp.zeros((Hp, pad_w, C1), xpad_ref.dtype)
        xpad_ref[pl.ds(pad_h, H), pl.ds(pad_w, W), :] = x_ref[0]

    row0 = pl.multiple_of(i * TH, TH)

    # KH*KW shifted-window matmuls (contraction C1), accumulated in f32.
    acc = jnp.zeros((TH, W, C2o), jnp.float32)
    for kh in range(KH):
        for kw in range(KW):
            win = xpad_ref[pl.ds(row0 + kh, TH), pl.ds(kw, W), :]      # (TH, W, C1) bf16
            acc = acc + jax.lax.dot_general(
                win, w_ref[kh, kw],
                dimension_numbers=(((2,), (0,)), ((), ())),
                preferred_element_type=jnp.float32)                    # (TH, W, C2o) f32

    # BN (f32 per-channel scale + bias) + SiLU epilogue.
    # sigmoid(y) = 1 / (1 + exp(-y)), with an approx EUP reciprocal (off the VALU).
    y = acc * scale_ref[...] + bias_ref[...]
    sig = pl.reciprocal(1.0 + jnp.exp(-y), approx=True)
    o_ref[0] = (y * sig).astype(o_ref.dtype)


def _choose_row_tile(H, W):
    """Output-row tile: whole image for small maps, else the smallest multiple-of-8
    divisor of H that gives a matmul M dim (TH*W) >= 512."""
    if H % 8 != 0 or H * W <= 4096:
        return H
    for th in range(8, H + 1, 8):
        if H % th == 0 and th * W >= 512:
            return th
    return H


def _vmem_bytes(shape, dtype):
    """Rough per-buffer VMEM footprint (last dim -> 128 lanes, 2nd-last -> sublanes)."""
    itemsize = jnp.dtype(dtype).itemsize
    s = list(shape)
    if s:
        s[-1] = -(-s[-1] // 128) * 128
    if len(s) >= 2:
        sub = 8 if itemsize >= 4 else 8 * (4 // itemsize)
        s[-2] = -(-s[-2] // sub) * sub
    return math.prod(s) * itemsize


def conv_bn_silu(x_nchw, w_oihw, bn_gamma, bn_beta, bn_mean, bn_var, *, eps=1e-5):
    """Conv2d(bias=False, padding='same', s=1) + BN(inference) + SiLU via Pallas."""
    N, C1, H, W = x_nchw.shape
    C2, C1w, KH, KW = w_oihw.shape
    assert C1 == C1w, "groups != 1 not supported"
    assert KH % 2 == 1 and KW % 2 == 1, "even kernel sizes not supported"
    pad_h, pad_w = KH // 2, KW // 2

    # Lane-dense output channels only when C2 >= 128; for narrow layers 128-padding
    # would inflate HBM writeback 16-32x, so keep C2 as-is (masked vst is cheaper).
    C2o = (-(-C2 // 128) * 128) if C2 >= 128 else C2

    TH = _choose_row_tile(H, W)
    n_h = H // TH
    out_dtype = x_nchw.dtype

    # --- one-time glue (plain JAX) -------------------------------------------------
    # Activations: NCHW -> NHWC, bf16 (halves HBM/VMEM bytes; f32 accumulation in-kernel).
    x = jnp.transpose(x_nchw, (0, 2, 3, 1)).astype(jnp.bfloat16)        # (N, H, W, C1)

    # BN stays an f32 scale/bias epilogue (NOT folded into bf16 weights).
    scale = bn_gamma / jnp.sqrt(bn_var + eps)                            # (C2,) f32
    bias = bn_beta - bn_mean * scale                                     # (C2,) f32
    w = jnp.transpose(w_oihw, (2, 3, 1, 0))                              # (KH, KW, C1, C2)
    if C2o != C2:
        w = jnp.pad(w, ((0, 0), (0, 0), (0, 0), (0, C2o - C2)))
        scale = jnp.pad(scale, (0, C2o - C2))
        bias = jnp.pad(bias, (0, C2o - C2))
    w = w.astype(jnp.bfloat16)
    scale = scale.reshape(1, C2o).astype(jnp.float32)
    bias = bias.reshape(1, C2o).astype(jnp.float32)

    # VMEM budget: derive the limit from actual buffers instead of a blind constant.
    est = (2 * _vmem_bytes((1, H, W, C1), jnp.bfloat16)                  # input (2 bufs)
           + _vmem_bytes((KH, KW, C1, C2o), jnp.bfloat16)                # weights (1 buf)
           + 2 * _vmem_bytes((1, C2o), jnp.float32)                      # scale + bias
           + 2 * _vmem_bytes((1, TH, W, C2o), out_dtype)                 # output (2 bufs)
           + _vmem_bytes((H + 2 * pad_h, W + 2 * pad_w, C1), jnp.bfloat16)  # halo scratch
           + 4 * _vmem_bytes((TH, W, C2o), jnp.float32)                  # acc/epilogue temps
           + 2 * _vmem_bytes((TH, W, C1), jnp.bfloat16))                 # window temps
    vmem_limit = int(min(64 * 1024 * 1024, max(32 * 1024 * 1024, 2 * est)))

    kernel = functools.partial(_conv_bn_silu_kernel, KH=KH, KW=KW, TH=TH)

    out_nhwc = pl.pallas_call(
        kernel,
        out_shape=jax.ShapeDtypeStruct((N, H, W, C2o), out_dtype),
        grid_spec=pltpu.PrefetchScalarGridSpec(
            num_scalar_prefetch=0,
            grid=(N, n_h),
            in_specs=[
                pl.BlockSpec((1, H, W, C1), lambda n, i: (n, 0, 0, 0)),
                pl.BlockSpec((KH, KW, C1, C2o), lambda n, i: (0, 0, 0, 0),
                             pipeline_mode=pl.Buffered(1)),
                pl.BlockSpec((1, C2o), lambda n, i: (0, 0),
                             pipeline_mode=pl.Buffered(1)),
                pl.BlockSpec((1, C2o), lambda n, i: (0, 0),
                             pipeline_mode=pl.Buffered(1)),
            ],
            out_specs=pl.BlockSpec((1, TH, W, C2o), lambda n, i: (n, i, 0, 0)),
            scratch_shapes=[
                pltpu.VMEM((H + 2 * pad_h, W + 2 * pad_w, C1), jnp.bfloat16),
            ],
        ),
        compiler_params=pltpu.CompilerParams(
            dimension_semantics=("parallel", "arbitrary"),
            vmem_limit_bytes=vmem_limit,
        ),
    )(x, w, scale, bias)

    out = out_nhwc if C2o == C2 else out_nhwc[..., :C2]
    return jnp.transpose(out, (0, 3, 1, 2))   # back to the PyTorch NCHW convention


def _reference(x_nchw, w_oihw, bn_gamma, bn_beta, bn_mean, bn_var, eps=1e-5):
    """Pure-JAX f32 reference (lax conv) for correctness checking."""
    y = jax.lax.conv_general_dilated(
        x_nchw.astype(jnp.float32), w_oihw.astype(jnp.float32),
        window_strides=(1, 1), padding="SAME",
        dimension_numbers=("NCHW", "OIHW", "NCHW"),
    )
    scale = (bn_gamma / jnp.sqrt(bn_var + eps)).reshape(1, -1, 1, 1)
    bias = (bn_beta - bn_mean * bn_gamma / jnp.sqrt(bn_var + eps)).reshape(1, -1, 1, 1)
    y = y * scale + bias
    return y * jax.nn.sigmoid(y)


if __name__ == "__main__":
    # Module config: Conv(c1=4, c2=8, k=3)  (stride=1, autopad=1, groups=1, dil=1, SiLU)
    N, C1, H, W = 2, 4, 16, 16
    C2, K = 8, 3

    key = jax.random.PRNGKey(0)
    kx, kw, kg, kb, km, kv = jax.random.split(key, 6)

    x = jax.random.normal(kx, (N, C1, H, W), dtype=jnp.float32)
    w = jax.random.normal(kw, (C2, C1, K, K), dtype=jnp.float32) * 0.1
    gamma = 1.0 + 0.1 * jax.random.normal(kg, (C2,), dtype=jnp.float32)
    beta = 0.1 * jax.random.normal(kb, (C2,), dtype=jnp.float32)
    run_mean = 0.05 * jax.random.normal(km, (C2,), dtype=jnp.float32)
    run_var = jnp.abs(1.0 + 0.1 * jax.random.normal(kv, (C2,), dtype=jnp.float32))

    out = conv_bn_silu(x, w, gamma, beta, run_mean, run_var)
    out = jax.block_until_ready(out)

    ref = _reference(x, w, gamma, beta, run_mean, run_var)
    assert out.shape == (N, C2, H, W)
    # bf16 activations/weights with f32 accumulation and an f32 BN epilogue
    # (tighter than the previous folded-bf16-scale version).
    assert jnp.allclose(out, ref, atol=3e-2, rtol=3e-2), "mismatch vs reference"

    print("KERNEL_OK")
</pallas_src>

<mosaic_0001>
module attributes {stable_mosaic.version = 11 : i64} {
  func.func @_conv_bn_silu_kernel(%arg0: i32, %arg1: i32, %arg2: memref<1x16x16x4xbf16, #tpu.memory_space<vmem>>, %arg3: memref<3x3x4x8xbf16, #tpu.memory_space<vmem>>, %arg4: memref<1x8xf32, #tpu.memory_space<vmem>>, %arg5: memref<1x8xf32, #tpu.memory_space<vmem>>, %arg6: memref<1x16x16x8xf32, #tpu.memory_space<vmem>>, %arg7: memref<18x18x4xbf16, #tpu.memory_space<vmem>>) attributes {dimension_semantics = [#tpu.dimension_semantics<parallel>, #tpu.dimension_semantics<arbitrary>], iteration_bounds = array<i64: 2, 1>, scalar_prefetch = 0 : i64, scratch_operands = 1 : i64, tpu.core_type = #tpu.core_type<tc>, window_params = [{transform_indices = @transform_0, window_bounds = array<i64: 1, 16, 16, 4>}, {pipeline_mode = #tpu.pipeline_mode<synchronous>, transform_indices = @transform_1, window_bounds = array<i64: 3, 3, 4, 8>}, {pipeline_mode = #tpu.pipeline_mode<synchronous>, transform_indices = @transform_2, window_bounds = array<i64: 1, 8>}, {pipeline_mode = #tpu.pipeline_mode<synchronous>, transform_indices = @transform_3, window_bounds = array<i64: 1, 8>}, {transform_indices = @transform_4, window_bounds = array<i64: 1, 16, 16, 8>}]} {
    %c0_i32 = arith.constant 0 : i32
    %0 = arith.cmpi eq, %arg1, %c0_i32 : i32
    %1 = arith.extui %0 : i1 to i32
    %c0_i32_0 = arith.constant 0 : i32
    %2 = arith.cmpi ne, %1, %c0_i32_0 : i32
    scf.if %2 {
      %cst_78 = arith.constant 0.000000e+00 : bf16
      %87 = vector.broadcast %cst_78 : bf16 to vector<1x18x4xbf16>
      %c0_79 = arith.constant 0 : index
      %c0_80 = arith.constant 0 : index
      %c0_81 = arith.constant 0 : index
      %88 = vector.load %arg7[%c0_79, %c0_80, %c0_81] : memref<18x18x4xbf16, #tpu.memory_space<vmem>>, vector<1x18x4xbf16>
      tpu.vector_store %arg7[%c0_79, %c0_80, %c0_81], %87 {strides = array<i32>} : memref<18x18x4xbf16, #tpu.memory_space<vmem>>, vector<1x18x4xbf16>,
      %cst_82 = arith.constant 0.000000e+00 : bf16
      %89 = vector.broadcast %cst_82 : bf16 to vector<1x18x4xbf16>
      %c17 = arith.constant 17 : index
      %c0_83 = arith.constant 0 : index
      %c0_84 = arith.constant 0 : index
      %90 = vector.load %arg7[%c17, %c0_83, %c0_84] : memref<18x18x4xbf16, #tpu.memory_space<vmem>>, vector<1x18x4xbf16>
      tpu.vector_store %arg7[%c17, %c0_83, %c0_84], %89 {strides = array<i32>} : memref<18x18x4xbf16, #tpu.memory_space<vmem>>, vector<1x18x4xbf16>,
      %cst_85 = arith.constant 0.000000e+00 : bf16
      %91 = vector.broadcast %cst_85 : bf16 to vector<18x1x4xbf16>
      %c0_86 = arith.constant 0 : index
      %c0_87 = arith.constant 0 : index
      %c0_88 = arith.constant 0 : index
      %92 = vector.load %arg7[%c0_86, %c0_87, %c0_88] : memref<18x18x4xbf16, #tpu.memory_space<vmem>>, vector<18x1x4xbf16>
      tpu.vector_store %arg7[%c0_86, %c0_87, %c0_88], %91 {strides = array<i32>} : memref<18x18x4xbf16, #tpu.memory_space<vmem>>, vector<18x1x4xbf16>,
      %cst_89 = arith.constant 0.000000e+00 : bf16
      %93 = vector.broadcast %cst_89 : bf16 to vector<18x1x4xbf16>
      %c0_90 = arith.constant 0 : index
      %c17_91 = arith.constant 17 : index
      %c0_92 = arith.constant 0 : index
      %94 = vector.load %arg7[%c0_90, %c17_91, %c0_92] : memref<18x18x4xbf16, #tpu.memory_space<vmem>>, vector<18x1x4xbf16>
      tpu.vector_store %arg7[%c0_90, %c17_91, %c0_92], %93 {strides = array<i32>} : memref<18x18x4xbf16, #tpu.memory_space<vmem>>, vector<18x1x4xbf16>,
      %c0_93 = arith.constant 0 : index
      %c0_94 = arith.constant 0 : index
      %c0_95 = arith.constant 0 : index
      %c0_96 = arith.constant 0 : index
      %95 = vector.load %arg2[%c0_93, %c0_94, %c0_95, %c0_96] : memref<1x16x16x4xbf16, #tpu.memory_space<vmem>>, vector<1x16x16x4xbf16>
      %96 = vector.shape_cast %95 : vector<1x16x16x4xbf16> to vector<16x16x4xbf16>
      %c1_97 = arith.constant 1 : index
      %c1_98 = arith.constant 1 : index
      %c0_99 = arith.constant 0 : index
      %97 = vector.load %arg7[%c1_97, %c1_98, %c0_99] : memref<18x18x4xbf16, #tpu.memory_space<vmem>>, vector<16x16x4xbf16>
      tpu.vector_store %arg7[%c1_97, %c1_98, %c0_99], %96 {strides = array<i32>} : memref<18x18x4xbf16, #tpu.memory_space<vmem>>, vector<16x16x4xbf16>,
    } else {
    }
    %c16_i32 = arith.constant 16 : i32
    %3 = arith.muli %arg1, %c16_i32 : i32
    %4 = tpu.assume_multiple %3, 16 : i32
    %cst = arith.constant 0.000000e+00 : f32
    %5 = vector.broadcast %cst : f32 to vector<16x16x8xf32>
    %c0_i32_1 = arith.constant 0 : i32
    %6 = arith.addi %4, %c0_i32_1 : i32
    %7 = arith.index_cast %6 : i32 to index
    %c0 = arith.constant 0 : index
    %c0_2 = arith.constant 0 : index
    %8 = vector.load %arg7[%7, %c0, %c0_2] : memref<18x18x4xbf16, #tpu.memory_space<vmem>>, vector<16x16x4xbf16>
    %c0_3 = arith.constant 0 : index
    %c0_4 = arith.constant 0 : index
    %c0_5 = arith.constant 0 : index
    %c0_6 = arith.constant 0 : index
    %9 = vector.load %arg3[%c0_3, %c0_4, %c0_5, %c0_6] : memref<3x3x4x8xbf16, #tpu.memory_space<vmem>>, vector<1x1x4x8xbf16>
    %10 = vector.shape_cast %9 : vector<1x1x4x8xbf16> to vector<4x8xbf16>
    %cst_7 = arith.constant dense<0.000000e+00> : vector<16x16x8xf32>
    %11 = tpu.matmul %8, %10, %cst_7 {dimension_numbers = #tpu.dot_dimension_numbers<[2], [0], [0, 1], [1], [0, 0, 0, 1, 1, 1], [], []>} : vector<16x16x4xbf16>, vector<4x8xbf16>, vector<16x16x8xf32> -> vector<16x16x8xf32>
    %12 = arith.addf %5, %11 : vector<16x16x8xf32>
    %c0_i32_8 = arith.constant 0 : i32
    %13 = arith.addi %4, %c0_i32_8 : i32
    %14 = arith.index_cast %13 : i32 to index
    %c1 = arith.constant 1 : index
    %c0_9 = arith.constant 0 : index
    %15 = vector.load %arg7[%14, %c1, %c0_9] : memref<18x18x4xbf16, #tpu.memory_space<vmem>>, vector<16x16x4xbf16>
    %c0_10 = arith.constant 0 : index
    %c1_11 = arith.constant 1 : index
    %c0_12 = arith.constant 0 : index
    %c0_13 = arith.constant 0 : index
    %16 = vector.load %arg3[%c0_10, %c1_11, %c0_12, %c0_13] : memref<3x3x4x8xbf16, #tpu.memory_space<vmem>>, vector<1x1x4x8xbf16>
    %17 = vector.shape_cast %16 : vector<1x1x4x8xbf16> to vector<4x8xbf16>
    %cst_14 = arith.constant dense<0.000000e+00> : vector<16x16x8xf32>
    %18 = tpu.matmul %15, %17, %cst_14 {dimension_numbers = #tpu.dot_dimension_numbers<[2], [0], [0, 1], [1], [0, 0, 0, 1, 1, 1], [], []>} : vector<16x16x4xbf16>, vector<4x8xbf16>, vector<16x16x8xf32> -> vector<16x16x8xf32>
    %19 = arith.addf %12, %18 : vector<16x16x8xf32>
    %c0_i32_15 = arith.constant 0 : i32
    %20 = arith.addi %4, %c0_i32_15 : i32
    %21 = arith.index_cast %20 : i32 to index
    %c2 = arith.constant 2 : index
    %c0_16 = arith.constant 0 : index
    %22 = vector.load %arg7[%21, %c2, %c0_16] : memref<18x18x4xbf16, #tpu.memory_space<vmem>>, vector<16x16x4xbf16>
    %c0_17 = arith.constant 0 : index
    %c2_18 = arith.constant 2 : index
    %c0_19 = arith.constant 0 : index
    %c0_20 = arith.constant 0 : index
    %23 = vector.load %arg3[%c0_17, %c2_18, %c0_19, %c0_20] : memref<3x3x4x8xbf16, #tpu.memory_space<vmem>>, vector<1x1x4x8xbf16>
    %24 = vector.shape_cast %23 : vector<1x1x4x8xbf16> to vector<4x8xbf16>
    %cst_21 = arith.constant dense<0.000000e+00> : vector<16x16x8xf32>
    %25 = tpu.matmul %22, %24, %cst_21 {dimension_numbers = #tpu.dot_dimension_numbers<[2], [0], [0, 1], [1], [0, 0, 0, 1, 1, 1], [], []>} : vector<16x16x4xbf16>, vector<4x8xbf16>, vector<16x16x8xf32> -> vector<16x16x8xf32>
    %26 = arith.addf %19, %25 : vector<16x16x8xf32>
    %c1_i32 = arith.constant 1 : i32
    %27 = arith.addi %4, %c1_i32 : i32
    %28 = arith.index_cast %27 : i32 to index
    %c0_22 = arith.constant 0 : index
    %c0_23 = arith.constant 0 : index
    %29 = vector.load %arg7[%28, %c0_22, %c0_23] : memref<18x18x4xbf16, #tpu.memory_space<vmem>>, vector<16x16x4xbf16>
    %c1_24 = arith.constant 1 : index
    %c0_25 = arith.constant 0 : index
    %c0_26 = arith.constant 0 : index
    %c0_27 = arith.constant 0 : index
    %30 = vector.load %arg3[%c1_24, %c0_25, %c0_26, %c0_27] : memref<3x3x4x8xbf16, #tpu.memory_space<vmem>>, vector<1x1x4x8xbf16>
    %31 = vector.shape_cast %30 : vector<1x1x4x8xbf16> to vector<4x8xbf16>
    %cst_28 = arith.constant dense<0.000000e+00> : vector<16x16x8xf32>
    %32 = tpu.matmul %29, %31, %cst_28 {dimension_numbers = #tpu.dot_dimension_numbers<[2], [0], [0, 1], [1], [0, 0, 0, 1, 1, 1], [], []>} : vector<16x16x4xbf16>, vector<4x8xbf16>, vector<16x16x8xf32> -> vector<16x16x8xf32>
    %33 = arith.addf %26, %32 : vector<16x16x8xf32>
    %c1_i32_29 = arith.constant 1 : i32
    %34 = arith.addi %4, %c1_i32_29 : i32
    %35 = arith.index_cast %34 : i32 to index
    %c1_30 = arith.constant 1 : index
    %c0_31 = arith.constant 0 : index
    %36 = vector.load %arg7[%35, %c1_30, %c0_31] : memref<18x18x4xbf16, #tpu.memory_space<vmem>>, vector<16x16x4xbf16>
    %c1_32 = arith.constant 1 : index
    %c1_33 = arith.constant 1 : index
    %c0_34 = arith.constant 0 : index
    %c0_35 = arith.constant 0 : index
    %37 = vector.load %arg3[%c1_32, %c1_33, %c0_34, %c0_35] : memref<3x3x4x8xbf16, #tpu.memory_space<vmem>>, vector<1x1x4x8xbf16>
    %38 = vector.shape_cast %37 : vector<1x1x4x8xbf16> to vector<4x8xbf16>
    %cst_36 = arith.constant dense<0.000000e+00> : vector<16x16x8xf32>
    %39 = tpu.matmul %36, %38, %cst_36 {dimension_numbers = #tpu.dot_dimension_numbers<[2], [0], [0, 1], [1], [0, 0, 0, 1, 1, 1], [], []>} : vector<16x16x4xbf16>, vector<4x8xbf16>, vector<16x16x8xf32> -> vector<16x16x8xf32>
    %40 = arith.addf %33, %39 : vector<16x16x8xf32>
    %c1_i32_37 = arith.constant 1 : i32
    %41 = arith.addi %4, %c1_i32_37 : i32
    %42 = arith.index_cast %41 : i32 to index
    %c2_38 = arith.constant 2 : index
    %c0_39 = arith.constant 0 : index
    %43 = vector.load %arg7[%42, %c2_38, %c0_39] : memref<18x18x4xbf16, #tpu.memory_space<vmem>>, vector<16x16x4xbf16>
    %c1_40 = arith.constant 1 : index
    %c2_41 = arith.constant 2 : index
    %c0_42 = arith.constant 0 : index
    %c0_43 = arith.constant 0 : index
    %44 = vector.load %arg3[%c1_40, %c2_41, %c0_42, %c0_43] : memref<3x3x4x8xbf16, #tpu.memory_space<vmem>>, vector<1x1x4x8xbf16>
    %45 = vector.shape_cast %44 : vector<1x1x4x8xbf16> to vector<4x8xbf16>
    %cst_44 = arith.constant dense<0.000000e+00> : vector<16x16x8xf32>
    %46 = tpu.matmul %43, %45, %cst_44 {dimension_numbers = #tpu.dot_dimension_numbers<[2], [0], [0, 1], [1], [0, 0, 0, 1, 1, 1], [], []>} : vector<16x16x4xbf16>, vector<4x8xbf16>, vector<16x16x8xf32> -> vector<16x16x8xf32>
    %47 = arith.addf %40, %46 : vector<16x16x8xf32>
    %c2_i32 = arith.constant 2 : i32
    %48 = arith.addi %4, %c2_i32 : i32
    %49 = arith.index_cast %48 : i32 to index
    %c0_45 = arith.constant 0 : index
    %c0_46 = arith.constant 0 : index
    %50 = vector.load %arg7[%49, %c0_45, %c0_46] : memref<18x18x4xbf16, #tpu.memory_space<vmem>>, vector<16x16x4xbf16>
    %c2_47 = arith.constant 2 : index
    %c0_48 = arith.constant 0 : index
    %c0_49 = arith.constant 0 : index
    %c0_50 = arith.constant 0 : index
    %51 = vector.load %arg3[%c2_47, %c0_48, %c0_49, %c0_50] : memref<3x3x4x8xbf16, #tpu.memory_space<vmem>>, vector<1x1x4x8xbf16>
    %52 = vector.shape_cast %51 : vector<1x1x4x8xbf16> to vector<4x8xbf16>
    %cst_51 = arith.constant dense<0.000000e+00> : vector<16x16x8xf32>
    %53 = tpu.matmul %50, %52, %cst_51 {dimension_numbers = #tpu.dot_dimension_numbers<[2], [0], [0, 1], [1], [0, 0, 0, 1, 1, 1], [], []>} : vector<16x16x4xbf16>, vector<4x8xbf16>, vector<16x16x8xf32> -> vector<16x16x8xf32>
    %54 = arith.addf %47, %53 : vector<16x16x8xf32>
    %c2_i32_52 = arith.constant 2 : i32
    %55 = arith.addi %4, %c2_i32_52 : i32
    %56 = arith.index_cast %55 : i32 to index
    %c1_53 = arith.constant 1 : index
    %c0_54 = arith.constant 0 : index
    %57 = vector.load %arg7[%56, %c1_53, %c0_54] : memref<18x18x4xbf16, #tpu.memory_space<vmem>>, vector<16x16x4xbf16>
    %c2_55 = arith.constant 2 : index
    %c1_56 = arith.constant 1 : index
    %c0_57 = arith.constant 0 : index
    %c0_58 = arith.constant 0 : index
    %58 = vector.load %arg3[%c2_55, %c1_56, %c0_57, %c0_58] : memref<3x3x4x8xbf16, #tpu.memory_space<vmem>>, vector<1x1x4x8xbf16>
    %59 = vector.shape_cast %58 : vector<1x1x4x8xbf16> to vector<4x8xbf16>
    %cst_59 = arith.constant dense<0.000000e+00> : vector<16x16x8xf32>
    %60 = tpu.matmul %57, %59, %cst_59 {dimension_numbers = #tpu.dot_dimension_numbers<[2], [0], [0, 1], [1], [0, 0, 0, 1, 1, 1], [], []>} : vector<16x16x4xbf16>, vector<4x8xbf16>, vector<16x16x8xf32> -> vector<16x16x8xf32>
    %61 = arith.addf %54, %60 : vector<16x16x8xf32>
    %c2_i32_60 = arith.constant 2 : i32
    %62 = arith.addi %4, %c2_i32_60 : i32
    %63 = arith.index_cast %62 : i32 to index
    %c2_61 = arith.constant 2 : index
    %c0_62 = arith.constant 0 : index
    %64 = vector.load %arg7[%63, %c2_61, %c0_62] : memref<18x18x4xbf16, #tpu.memory_space<vmem>>, vector<16x16x4xbf16>
    %c2_63 = arith.constant 2 : index
    %c2_64 = arith.constant 2 : index
    %c0_65 = arith.constant 0 : index
    %c0_66 = arith.constant 0 : index
    %65 = vector.load %arg3[%c2_63, %c2_64, %c0_65, %c0_66] : memref<3x3x4x8xbf16, #tpu.memory_space<vmem>>, vector<1x1x4x8xbf16>
    %66 = vector.shape_cast %65 : vector<1x1x4x8xbf16> to vector<4x8xbf16>
    %cst_67 = arith.constant dense<0.000000e+00> : vector<16x16x8xf32>
    %67 = tpu.matmul %64, %66, %cst_67 {dimension_numbers = #tpu.dot_dimension_numbers<[2], [0], [0, 1], [1], [0, 0, 0, 1, 1, 1], [], []>} : vector<16x16x4xbf16>, vector<4x8xbf16>, vector<16x16x8xf32> -> vector<16x16x8xf32>
    %68 = arith.addf %61, %67 : vector<16x16x8xf32>
    %c0_68 = arith.constant 0 : index
    %c0_69 = arith.constant 0 : index
    %69 = vector.load %arg4[%c0_68, %c0_69] : memref<1x8xf32, #tpu.memory_space<vmem>>, vector<1x8xf32>
    %70 = vector.shape_cast %69 : vector<1x8xf32> to vector<1x1x8xf32>
    %71 = vector.broadcast %70 : vector<1x1x8xf32> to vector<16x16x8xf32>
    %72 = arith.mulf %68, %71 : vector<16x16x8xf32>
    %c0_70 = arith.constant 0 : index
    %c0_71 = arith.constant 0 : index
    %73 = vector.load %arg5[%c0_70, %c0_71] : memref<1x8xf32, #tpu.memory_space<vmem>>, vector<1x8xf32>
    %74 = vector.shape_cast %73 : vector<1x8xf32> to vector<1x1x8xf32>
    %75 = vector.broadcast %74 : vector<1x1x8xf32> to vector<16x16x8xf32>
    %76 = arith.addf %72, %75 : vector<16x16x8xf32>
    %cst_72 = arith.constant 0.000000e+00 : f32
    %77 = vector.broadcast %cst_72 : f32 to vector<16x16x8xf32>
    %78 = arith.subf %77, %76 : vector<16x16x8xf32>
    %79 = math.exp %78 : vector<16x16x8xf32>
    %cst_73 = arith.constant 1.000000e+00 : f32
    %80 = vector.broadcast %cst_73 : f32 to vector<16x16x8xf32>
    %81 = arith.addf %80, %79 : vector<16x16x8xf32>
    %82 = tpu.reciprocal %81 {approx = true} : vector<16x16x8xf32> -> vector<16x16x8xf32>
    %83 = arith.mulf %76, %82 : vector<16x16x8xf32>
    %c0_74 = arith.constant 0 : index
    %c0_75 = arith.constant 0 : index
    %c0_76 = arith.constant 0 : index
    %c0_77 = arith.constant 0 : index
    %84 = vector.load %arg6[%c0_74, %c0_75, %c0_76, %c0_77] : memref<1x16x16x8xf32, #tpu.memory_space<vmem>>, vector<1x16x16x8xf32>
    %85 = vector.shape_cast %84 : vector<1x16x16x8xf32> to vector<16x16x8xf32>
    %86 = vector.shape_cast %83 : vector<16x16x8xf32> to vector<1x16x16x8xf32>
    tpu.vector_store %arg6[%c0_74, %c0_75, %c0_76, %c0_77], %86 {strides = array<i32>} : memref<1x16x16x8xf32, #tpu.memory_space<vmem>>, vector<1x16x16x8xf32>,
    return
  }
  func.func @transform_0(%arg0: i32, %arg1: i32) -> (i32, i32, i32, i32) {
    %c0_i32 = arith.constant 0 : i32
    %c0_i32_0 = arith.constant 0 : i32
    %c0_i32_1 = arith.constant 0 : i32
    %c0_i32_2 = arith.constant 0 : i32
    return %arg0, %c0_i32, %c0_i32_0, %c0_i32_1 : i32, i32, i32, i32
  }
  func.func @transform_1(%arg0: i32, %arg1: i32) -> (i32, i32, i32, i32) {
    %c0_i32 = arith.constant 0 : i32
    %c0_i32_0 = arith.constant 0 : i32
    %c0_i32_1 = arith.constant 0 : i32
    %c0_i32_2 = arith.constant 0 : i32
    %c0_i32_3 = arith.constant 0 : i32
    return %c0_i32, %c0_i32_0, %c0_i32_1, %c0_i32_2 : i32, i32, i32, i32
  }
  func.func @transform_2(%arg0: i32, %arg1: i32) -> (i32, i32) {
    %c0_i32 = arith.constant 0 : i32
    %c0_i32_0 = arith.constant 0 : i32
    %c0_i32_1 = arith.constant 0 : i32
    return %c0_i32, %c0_i32_0 : i32, i32
  }
  func.func @transform_3(%arg0: i32, %arg1: i32) -> (i32, i32) {
    %c0_i32 = arith.constant 0 : i32
    %c0_i32_0 = arith.constant 0 : i32
    %c0_i32_1 = arith.constant 0 : i32
    return %c0_i32, %c0_i32_0 : i32, i32
  }
  func.func @transform_4(%arg0: i32, %arg1: i32) -> (i32, i32, i32, i32) {
    %c0_i32 = arith.constant 0 : i32
    %c0_i32_0 = arith.constant 0 : i32
    %c0_i32_1 = arith.constant 0 : i32
    return %arg0, %arg1, %c0_i32, %c0_i32_0 : i32, i32, i32, i32
  }
}

</mosaic_0001>

<bundles_post_ra>
// kernel: tpu_custom_call.1
= control target key start
LH: loop header
LB: loop body
LE: loop exit
PB: predicated region body
PF: predicated region fallthrough
CT: control target
= control target key end

     0   :  { %s6045_s15 = smov 0   ;;  %s6047_s16 = smov 0   ;;  %s7613_s0 = inlined_call_operand.vmem [shape: bf16[2,16,16,4], index: 0, kind: input, shape index: {}]   ;;  %s7614_s1 = inlined_call_operand.vmem [shape: bf16[3,3,4,8], index: 1, kind: input, shape index: {}]   ;;  %s7615_s2 = inlined_call_operand.vmem [shape: f32[1,8], index: 2, kind: input, shape index: {}]   ;;  %s7616_s3 = inlined_call_operand.vmem [shape: f32[1,8], index: 3, kind: input, shape index: {}]   ;;  %s7617_s4 = inlined_call_operand.vmem [shape: f32[2,16,16,8], index: 4, kind: output, shape index: {}]  }
   0x1   :  { %s6049_s17 = smov 0  }
   0x2 LB: > { %s26_s18 = sadd.s32 1, %s6013_s16  ;;  %p5138_p0 = scmp.ge.s32.totalorder %s6017_s17, 1  ;;  %s6017_s17 = sphi %s6049_s17, %s14_s17   ;;  %s6013_s16 = sphi %s6047_s16, %s7661_s16   ;;  %s6009_s15 = sphi %s6045_s15, %s7660_s15  }
   0x3   : > { %p28_p1 = scmp.ge.s32.totalorder %s26_s18, 2  ;;  %p176_p2 = scmp.lt.s32.totalorder %s6017_s17, 3 }
   0x5   : > { %s7663_s18 = smov (%p28_p1, %s26_s18), 0  ;;  %p177_p3 = pnand %p5138_p0, %p176_p2 }
   0x7   : > { %180 = sbr.rel (%p177_p3) target bundleno = 853 (0x355), region = 36 }
   0xc   : > { %v5143_v0 = vld [vmem:[%s7614_s1 + $0x2] sm:$0x3]  ;;  %vm1358_vm0 = vcmask 1041408   ;;  %p207_p4 = scmp.lt.s32.totalorder %s6009_s15, 1  ;;  %vm231_vm1 = vcmask 24576   ;;  %vm228_vm7 = vcmask 27648  }
   0xd   : > { %v1360_v1 = vsel %vm1358_vm0, %v5143_v0, 0  ;;  %vm238_vm2 = vsmask.f32 256  ;;  %v252_v2 = vld [vmem:[#allocation2 + $0x30] sm:$0x1]  ;;  %vm1309_vm12 = vcmask 31744  }
   0xe   : > { %5779 = vmatpush.bf16.msra.mxu1 %v1360_v1  ;;  %5780 = vmatpush.bf16.msra.mxu2 %v1360_v1  ;;  %s7665_s15 = smov (!%p207_p4, %s6009_s15), 1  ;;  %vm6071_vm3 = vmand %vm231_vm1, %vm238_vm2  ;;  %vm294_vm4 = vsmask.f32 7938  ;;  %v308_v4 = vld [vmem:[#allocation2 + $0x38] sm:$0x1]  ;;  %vm1721_vm14 = vcmask 1042432  }
   0xf   : > { %5781 = vmatpush.bf16.msra.mxu3 %v1360_v1  ;;  %1369 = vmatpush.bf16.msra.mxu0 %v1360_v1  ;;  %v253_v5 = vsel %vm6071_vm3, 0, %v252_v2  ;;  %vm6079_vm5 = vmand %vm231_vm1, %vm294_vm4  ;;  %s5729_s21 = sshll.u32 %s7665_s15, 7  ;;  %vm382_vm6 = vsmask.f32 4368  ;;  %v264_v8 = vld [vmem:[#allocation2 + $0x60] sm:$0x1] }
  0x10   : > { %254 = vst [vmem:[#allocation2 + $0x30] sm:$0x1] %v253_v5  ;;  %v309_v7 = vsel %vm6079_vm5, 0, %v308_v4  ;;  %s6089_s24 = scalar_lea.vmem %s7613_s0, %s5729_s21  ;;  %v320_v9 = vld [vmem:[#allocation2 + $0x68] sm:$0x1]  ;;  %v265_v12 = vsel %vm6071_vm3, 0, %v264_v8  ;;  %vm6101_vm8 = vmor %vm238_vm2, %vm382_vm6 }
  0x11   : > { %310 = vst [vmem:[#allocation2 + $0x38] sm:$0x1] %v309_v7  ;;  %v356_v10 = vld [vmem:[%s6089_s24 + $0x18] sm:$0xf]  ;;  %v357_v11 = vld [vmem:[%s6089_s24 + $0x1c] sm:$0xf]  ;;  %vm6107_vm9 = vmand %vm228_vm7, %vm294_vm4 }
  0x12   : > { %v321_v13 = vsel %vm6079_vm5, 0, %v320_v9  ;;  %v436_v14 = vshrl.u32 %v356_v10, 16  ;;  %v439_v15 = vshll.u32 %v356_v10, 16  ;;  %v444_v16 = vshrl.u32 %v357_v11, 16  ;;  %266 = vst [vmem:[#allocation2 + $0x60] sm:$0x1] %v265_v12 }
  0x13   : > { %v447_v17 = vshll.u32 %v357_v11, 16  ;;  %322 = vst [vmem:[#allocation2 + $0x68] sm:$0x1] %v321_v13  ;;  %v364_v18 = vld [vmem:[%s6089_s24 + $0x38] sm:$0xf]  ;;  %v6019_v4 = vmov 0  }
  0x14   : > { %v365_v19 = vld [vmem:[%s6089_s24 + $0x3c] sm:$0xf]  ;;  %v438_v21 = vrot.slane %v436_v14, 7  ;;  %v446_v22 = vrot.slane %v444_v16, 7  ;;  %v504_v23 = vshrl.u32 %v364_v18, 16  ;;  %v507_v26 = vshll.u32 %v364_v18, 16 }
  0x15   : > { %v276_v24 = vld [vmem:[#allocation2 + $0x90] sm:$0x1]  ;;  %v512_v27 = vshrl.u32 %v365_v19, 16  ;;  %v515_v28 = vshll.u32 %v365_v19, 16  ;;  %v332_v30 = vld [vmem:[#allocation2 + $0x98] sm:$0x1] }
  0x16   : > { %v277_v29 = vsel %vm6071_vm3, 0, %v276_v24  ;;  %v441_v31 = vor.u32 %v439_v15, %v438_v21  ;;  %v442_v32 = vrot.slane %v438_v21, 4  ;;  %v449_v33 = vor.u32 %v447_v17, %v446_v22  ;;  %v372_v43 = vld [vmem:[%s6089_s24 + $0x58] sm:$0xf]  ;;  %v373_v44 = vld [vmem:[%s6089_s24 + $0x5c] sm:$0xf] }
  0x17   : > { %v451_v34 = vrot.slane %v446_v22, 4  ;;  %v728_v35 = vld [vmem:[#allocation2 + $0x30] sm:$0xf]  ;;  %278 = vst [vmem:[#allocation2 + $0x90] sm:$0x1] %v277_v29  ;;  %v506_v37 = vrot.slane %v504_v23, 7 }
  0x18   : > { %v732_v36 = vld [vmem:[#allocation2 + $0x38] sm:$0x1]  ;;  %v514_v38 = vrot.slane %v512_v27, 7  ;;  %v333_v39 = vsel %vm6079_vm5, 0, %v332_v30  ;;  %v450_v40 = vsel %vm6101_vm8, %v442_v32, %v449_v33  ;;  %v729_v41 = vsel %vm6107_vm9, %v441_v31, %v728_v35  ;;  %v5240_v57 = vld [vmem:[%s7614_s1 + $0x4] sm:$0x3] }
  0x19   : > { %v733_v42 = vsel %vm6071_vm3, %v451_v34, %v732_v36  ;;  %334 = vst [vmem:[#allocation2 + $0x98] sm:$0x1] %v333_v39  ;;  %v509_v45 = vor.u32 %v507_v26, %v506_v37  ;;  %v510_v46 = vrot.slane %v506_v37, 4  ;;  %v756_v49 = vld [vmem:[#allocation2 + $0x60] sm:$0xf]  ;;  %v572_v51 = vshrl.u32 %v372_v43, 16 }
  0x1a   : > { %730 = vst [vmem:[#allocation2 + $0x30] sm:$0xf] %v729_v41  ;;  %v517_v47 = vor.u32 %v515_v28, %v514_v38  ;;  %v519_v48 = vrot.slane %v514_v38, 4  ;;  %v760_v50 = vld [vmem:[#allocation2 + $0x68] sm:$0x1]  ;;  %v575_v52 = vshll.u32 %v372_v43, 16 }
  0x1b   : > { %731 = vst.msk [vmem:[#allocation2 + $0x34] sm:$0xf] %vm228_vm7, %v450_v40  ;;  %v757_v54 = vsel %vm6107_vm9, %v509_v45, %v756_v49  ;;  %v580_v56 = vshrl.u32 %v373_v44, 16  ;;  %v574_v58 = vrot.slane %v572_v51, 7  ;;  %v583_v59 = vshll.u32 %v373_v44, 16  ;;  %s5730_s23 = sshll.u32 %s7665_s15, 8 }
  0x1c   : > { %734 = vst [vmem:[#allocation2 + $0x38] sm:$0x1] %v733_v42  ;;  %v518_v53 = vsel %vm6101_vm8, %v510_v46, %v517_v47  ;;  %v761_v55 = vsel %vm6071_vm3, %v519_v48, %v760_v50  ;;  %v1933_v60 = vsel %vm1358_vm0, %v5240_v57, 0  ;;  %vm874_vm10 = vsmask.f32 3328  ;;  %s7226_s25 = scalar_lea.vmem %s7617_s4, %s5730_s23 }
  0x1d   : > { %758 = vst [vmem:[#allocation2 + $0x60] sm:$0xf] %v757_v54  ;;  %v582_v61 = vrot.slane %v580_v56, 7  ;;  %1942 = vmatpush.bf16.msrb.mxu2 %v1933_v60  ;;  %v577_v63 = vor.u32 %v575_v52, %v574_v58  ;;  %v578_v0 = vrot.slane %v574_v58, 4  ;;  %vm875_vm11 = vsmask.f32 7440 }
  0x1e   : > { %759 = vst.msk [vmem:[#allocation2 + $0x64] sm:$0xf] %vm228_vm7, %v518_v53  ;;  %v784_v62 = vld [vmem:[#allocation2 + $0x90] sm:$0xf]  ;;  %v6144_v16 = vld [vmem:[#allocation2 + $0x3c] sm:$0x1]  ;;  %vm6152_vm13 = vmor %vm874_vm10, %vm875_vm11 }
  0x1f   : > { %762 = vst [vmem:[#allocation2 + $0x68] sm:$0x1] %v761_v55  ;;  %v585_v1 = vor.u32 %v583_v59, %v582_v61  ;;  %v587_v2 = vrot.slane %v582_v61, 4  ;;  %v785_v7 = vsel %vm6107_vm9, %v577_v63, %v784_v62  ;;  %v6148_v23 = vld [vmem:[#allocation2 + $0x44] sm:$0x1]  ;;  %v256_v43 = vsel %vm6071_vm3, 0, %v6144_v16 }
  0x20   : > { %229 = vst.msk [vmem:[#allocation2] sm:$0xf] %vm228_vm7, %v6019_v4  ;;  %v788_v8 = vld [vmem:[#allocation2 + $0x98] sm:$0x1]  ;;  %v312_v48 = vsel %vm6079_vm5, 0, %v6148_v23  ;;  %vm1722_vm15 = vcmask 1046532  }
  0x21   : > { %v831_v5 = vld [vmem:[#allocation2 + $0x30] sm:$0xf]  ;;  %230 = vst.msk [vmem:[#allocation2 + $0x4] sm:$0xf] %vm228_vm7, %v6019_v4  ;;  %v586_v12 = vsel %vm6101_vm8, %v578_v0, %v585_v1  ;;  %v789_v22 = vsel %vm6071_vm3, %v587_v2, %v788_v8 }
  0x22   : > { %v832_v9 = vld [vmem:[#allocation2 + $0x34] sm:$0xf]  ;;  %v974_v10 = vshrl.u32 %v831_v5, 16  ;;  %v977_v11 = vshll.u32 %v831_v5, 16  ;;  %786 = vst [vmem:[#allocation2 + $0x90] sm:$0xf] %v785_v7 }
  0x23   : > { %v860_v13 = vld [vmem:[#allocation2 + $0x38] sm:$0x1]  ;;  %v983_v14 = vshll.u32 %v832_v9, 16  ;;  %v987_v15 = vshrl.u32 %v832_v9, 16  ;;  %787 = vst.msk [vmem:[#allocation2 + $0x94] sm:$0xf] %vm228_vm7, %v586_v12 }
  0x24   : > { %v976_v17 = vrot.slane %v974_v10, 4  ;;  %v979_v18 = vrot.slane %v977_v11, 5  ;;  %v993_v19 = vshll.u32 %v860_v13, 16  ;;  %v839_v21 = vld [vmem:[#allocation2 + $0x60] sm:$0xf] }
  0x25   : > { %v985_v24 = vrot.slane %v983_v14, 5  ;;  %v989_v26 = vrot.slane %v987_v15, 4  ;;  %v840_v27 = vld [vmem:[#allocation2 + $0x64] sm:$0xf]  ;;  %v1070_v28 = vshrl.u32 %v839_v21, 16  ;;  %v1073_v29 = vshll.u32 %v839_v21, 16 }
  0x26   : > { %v980_v30 = vor.u32 %v979_v18, %v976_v17  ;;  %v995_v31 = vrot.slane %v993_v19, 5  ;;  %v864_v32 = vld [vmem:[#allocation2 + $0x68] sm:$0x1]  ;;  %v1079_v33 = vshll.u32 %v840_v27, 16  ;;  %v1083_v34 = vshrl.u32 %v840_v27, 16 }
  0x27   : > { %v990_v36 = vor.u32 %v989_v26, %v985_v24  ;;  %v1072_v37 = vrot.slane %v1070_v28, 4  ;;  %v1075_v38 = vrot.slane %v1073_v29, 5  ;;  %v1089_v39 = vshll.u32 %v864_v32, 16  ;;  %790 = vst [vmem:[#allocation2 + $0x98] sm:$0x1] %v789_v22 }
  0x28   : > { %v981_v40 = vrot.slane %v980_v30, 4  ;;  %v1081_v41 = vrot.slane %v1079_v33, 5  ;;  %v1085_v42 = vrot.slane %v1083_v34, 4  ;;  %232 = vst.msk [vmem:[#allocation2 + $0x8] sm:$0x1] %vm231_vm1, %v6019_v4 }
  0x29   : > { %v991_v44 = vrot.slane %v990_v36, 4  ;;  %v1076_v45 = vor.u32 %v1075_v38, %v1072_v37  ;;  %v1091_v46 = vrot.slane %v1089_v39, 5  ;;  %v847_v47 = vld [vmem:[#allocation2 + $0x90] sm:$0xf]  ;;  %v240_v54 = vld [vmem:[#allocation2] sm:$0x1] }
  0x2a   : > { %v986_v49 = vsel %vm6152_vm13, %v981_v40, %v985_v24  ;;  %v1086_v50 = vor.u32 %v1085_v42, %v1081_v41  ;;  %v848_v51 = vld [vmem:[#allocation2 + $0x94] sm:$0xf]  ;;  %v1166_v52 = vshrl.u32 %v847_v47, 16  ;;  %v1169_v53 = vshll.u32 %v847_v47, 16  ;;  %v824_v59 = vld [vmem:[#allocation2 + $0x4] sm:$0xf] }
  0x2b   : > { %v996_v55 = vsel %vm6152_vm13, %v991_v44, %v995_v31  ;;  %v1269_v56 = vunpack.c.l.b16 %v986_v49  ;;  %v1077_v57 = vrot.slane %v1076_v45, 4  ;;  %v1175_v58 = vshll.u32 %v848_v51, 16  ;;  %234 = vst.msk [vmem:[#allocation2 + $0xcc] sm:$0xf] %vm228_vm7, %v6019_v4  ;;  %v5305_v12 = vld [vmem:[%s7614_s1 + $0x6] sm:$0x3] }
  0x2c   : > { %v1270_v60 = vunpack.c.l.b16 %v996_v55  ;;  %v1087_v61 = vrot.slane %v1086_v50, 4  ;;  %v1168_v62 = vrot.slane %v1166_v52, 4  ;;  %v1171_v63 = vrot.slane %v1169_v53, 5  ;;  %235 = vst.msk [vmem:[#allocation2 + $0xd0] sm:$0xf] %vm228_vm7, %v6019_v4 }
  0x2d   : > { %v1082_v0 = vsel %vm6152_vm13, %v1077_v57, %v1081_v41  ;;  %v1177_v1 = vrot.slane %v1175_v58, 5  ;;  %v1179_v2 = vshrl.u32 %v848_v51, 16  ;;  %v241_v5 = vsel %vm6071_vm3, 0, %v240_v54  ;;  %236 = vst.msk [vmem:[#allocation2 + $0xd4] sm:$0x1] %vm231_vm1, %v6019_v4  ;;  %vm6443_vm1 = vmor %vm1721_vm14, %vm1722_vm15 }
  0x2e   : > { %v1297_v7 = vpack.c.b16 %v1270_v60, %v1269_v56  ;;  %v1092_v8 = vsel %vm6152_vm13, %v1087_v61, %v1091_v46  ;;  %v1277_v9 = vunpack.c.l.b16 %v1082_v0  ;;  %v868_v10 = vld [vmem:[#allocation2 + $0x98] sm:$0x1]  ;;  %v1172_v11 = vor.u32 %v1171_v63, %v1168_v62  ;;  %242 = vst [vmem:[#allocation2] sm:$0x1] %v241_v5  ;;  %v855_v4 = vld [vmem:[%s7614_s1] sm:$0x3] }
  0x2f   : > { %v1278_v13 = vunpack.c.l.b16 %v1092_v8  ;;  %v1181_v14 = vrot.slane %v1179_v2, 4  ;;  %v1185_v15 = vshll.u32 %v868_v10, 16  ;;  %v296_v16 = vld [vmem:[#allocation2 + $0x8] sm:$0x1]  ;;  %v887_v19 = vshll.u32 %v824_v59, 16 }
  0x30   : > { %5148 = vmatmul.msk.bf16.vlgmr.msra.gmra.mxu1 %vm1309_vm12, %v1297_v7  ;;  %v1173_v17 = vrot.slane %v1172_v11, 4  ;;  %v297_v18 = vsel %vm6079_vm5, 0, %v296_v16  ;;  %v891_v21 = vshrl.u32 %v824_v59, 16  ;;  %v5434_v22 = vld [vmem:[%s7614_s1 + $0x8] sm:$0x3]  ;;  %v2223_v27 = vsel %vm1358_vm0, %v5305_v12, 0 }
  0x31   : > { %v1301_v23 = vpack.c.b16 %v1278_v13, %v1277_v9  ;;  %v1182_v24 = vor.u32 %v1181_v14, %v1177_v1  ;;  %v1187_v26 = vrot.slane %v1185_v15, 5  ;;  %298 = vst [vmem:[#allocation2 + $0x8] sm:$0x1] %v297_v18  ;;  %v358_v28 = vld [vmem:[%s6089_s24 + $0x20] sm:$0xf]  ;;  %v6196_v30 = vrot.slane %v887_v19, 5  ;;  %2232 = vmatpush.bf16.msrb.mxu3 %v2223_v27 }
  0x32   : > { %v1178_v29 = vsel %vm6152_vm13, %v1173_v17, %v1177_v1  ;;  %v893_v31 = vrot.slane %v891_v21, 4  ;;  %v1580_v32 = vsel %vm1358_vm0, %v855_v4, 0  ;;  %257 = vst [vmem:[#allocation2 + $0x3c] sm:$0x1] %v256_v43  ;;  %v2877_v34 = vsel %vm1358_vm0, %v5434_v22, 0 }
  0x33   : > { %5152 = vmatmul.msk.bf16.vlgmr.msra.gmra.mxu2 %vm1309_vm12, %v1301_v23  ;;  %v1183_v33 = vrot.slane %v1182_v24, 4  ;;  %1589 = vmatpush.bf16.msrb.mxu1 %v1580_v32  ;;  %313 = vst [vmem:[#allocation2 + $0x44] sm:$0x1] %v312_v48  ;;  %v359_v36 = vld [vmem:[%s6089_s24 + $0x24] sm:$0xf]  ;;  %v1285_v37 = vunpack.c.l.b16 %v1178_v29  ;;  %v453_v38 = vshrl.u32 %v358_v28, 16 }
  0x34   : > { %2886 = vmatpush.bf16.msrb.mxu0 %v2877_v34  ;;  %v461_v39 = vshrl.u32 %v359_v36, 16  ;;  %v267_v40 = vld [vmem:[#allocation2 + $0x6c] sm:$0x1]  ;;  %v894_v43 = vor.u32 %v893_v31, %v6196_v30  ;;  %v456_v44 = vshll.u32 %v358_v28, 16  ;;  %v323_v46 = vld [vmem:[#allocation2 + $0x74] sm:$0x1] }
  0x35   : > { %v1188_v41 = vsel %vm6152_vm13, %v1183_v33, %v1187_v26  ;;  %v823_v42 = vld [vmem:[#allocation2] sm:$0xf]  ;;  %v268_v45 = vsel %vm6071_vm3, 0, %v267_v40  ;;  %v464_v50 = vshll.u32 %v359_v36, 16  ;;  %v455_v51 = vrot.slane %v453_v38, 7 }
  0x36   : > { %v1286_v47 = vunpack.c.l.b16 %v1188_v41  ;;  %v878_v48 = vshrl.u32 %v823_v42, 16  ;;  %v881_v49 = vshll.u32 %v823_v42, 16  ;;  %269 = vst [vmem:[#allocation2 + $0x6c] sm:$0x1] %v268_v45  ;;  %v463_v52 = vrot.slane %v461_v39, 7 }
  0x37   : > { %v324_v53 = vsel %vm6079_vm5, 0, %v323_v46  ;;  %v366_v54 = vld [vmem:[%s6089_s24 + $0x40] sm:$0xf]  ;;  %v895_v59 = vrot.slane %v894_v43, 4  ;;  %v458_v61 = vor.u32 %v456_v44, %v455_v51  ;;  %v459_v62 = vrot.slane %v455_v51, 4 }
  0x38   : > { %v1305_v55 = vpack.c.b16 %v1286_v47, %v1285_v37  ;;  %v856_v56 = vld [vmem:[#allocation2 + $0x8] sm:$0x1]  ;;  %v880_v57 = vrot.slane %v878_v48, 4  ;;  %v883_v58 = vrot.slane %v881_v49, 5  ;;  %325 = vst [vmem:[#allocation2 + $0x74] sm:$0x1] %v324_v53  ;;  %v466_v1 = vor.u32 %v464_v50, %v463_v52 }
  0x39   : > { %v897_v60 = vshll.u32 %v856_v56, 16  ;;  %v735_v63 = vld [vmem:[#allocation2 + $0x3c] sm:$0xf]  ;;  %v468_v2 = vrot.slane %v463_v52, 4  ;;  %v367_v7 = vld [vmem:[%s6089_s24 + $0x44] sm:$0xf] }
  0x3a   : > { %5156 = vmatmul.msk.bf16.vlgmr.msra.gmra.mxu3 %vm1309_vm12, %v1305_v55  ;;  %v884_v0 = vor.u32 %v883_v58, %v880_v57  ;;  %v739_v5 = vld [vmem:[#allocation2 + $0x44] sm:$0x1]  ;;  %v521_v8 = vshrl.u32 %v366_v54, 16  ;;  %v736_v10 = vsel %vm6107_vm9, %v458_v61, %v735_v63  ;;  %v524_v11 = vshll.u32 %v366_v54, 16  ;;  %v279_v13 = vld [vmem:[#allocation2 + $0x9c] sm:$0x1] }
  0x3b   : > { %v899_v9 = vrot.slane %v897_v60, 5  ;;  %v529_v12 = vshrl.u32 %v367_v7, 16  ;;  %v467_v15 = vsel %vm6101_vm8, %v459_v62, %v466_v1  ;;  %737 = vst [vmem:[#allocation2 + $0x3c] sm:$0xf] %v736_v10  ;;  %v740_v16 = vsel %vm6071_vm3, %v468_v2, %v739_v5  ;;  %v335_v17 = vld [vmem:[#allocation2 + $0xa4] sm:$0x1] }
  0x3c   : > { %v885_v14 = vrot.slane %v884_v0, 4  ;;  %v523_v4 = vrot.slane %v521_v8, 7  ;;  %738 = vst.msk [vmem:[#allocation2 + $0x40] sm:$0xf] %vm228_vm7, %v467_v15  ;;  %v532_v21 = vshll.u32 %v367_v7, 16  ;;  %v280_v34 = vsel %vm6071_vm3, 0, %v279_v13 }
  0x3d   : > { %v900_v18 = vsel %vm6152_vm13, %v895_v59, %v899_v9  ;;  %v531_v19 = vrot.slane %v529_v12, 7  ;;  %v763_v22 = vld [vmem:[#allocation2 + $0x6c] sm:$0xf]  ;;  %741 = vst [vmem:[#allocation2 + $0x44] sm:$0x1] %v740_v16 }
  0x3e   : > { %v890_v23 = vsel %vm6152_vm13, %v885_v14, %v6196_v30  ;;  %v1262_v24 = vunpack.c.l.b16 %v900_v18  ;;  %v526_v26 = vor.u32 %v524_v11, %v523_v4  ;;  %v527_v27 = vrot.slane %v523_v4, 4  ;;  %v374_v28 = vld [vmem:[%s6089_s24 + $0x60] sm:$0xf]  ;;  %v375_v36 = vld [vmem:[%s6089_s24 + $0x64] sm:$0xf] }
  0x3f   : > { %v1261_v29 = vunpack.c.l.b16 %v890_v23  ;;  %v534_v31 = vor.u32 %v532_v21, %v531_v19  ;;  %v536_v32 = vrot.slane %v531_v19, 4  ;;  %v767_v33 = vld [vmem:[#allocation2 + $0x74] sm:$0x1]  ;;  %281 = vst [vmem:[#allocation2 + $0x9c] sm:$0x1] %v280_v34  ;;  %v336_v30 = vsel %vm6079_vm5, 0, %v335_v17 }
  0x40   : > { %v764_v37 = vsel %vm6107_vm9, %v526_v26, %v763_v22  ;;  %v589_v38 = vshrl.u32 %v374_v28, 16  ;;  %v592_v39 = vshll.u32 %v374_v28, 16  ;;  %v597_v43 = vshrl.u32 %v375_v36, 16  ;;  %v243_v44 = vld [vmem:[#allocation2 + $0xc] sm:$0x1] }
  0x41   : > { %v1293_v40 = vpack.c.b16 %v1262_v24, %v1261_v29  ;;  %v535_v41 = vsel %vm6101_vm8, %v527_v27, %v534_v31  ;;  %765 = vst [vmem:[#allocation2 + $0x6c] sm:$0xf] %v764_v37  ;;  %v768_v42 = vsel %vm6071_vm3, %v536_v32, %v767_v33  ;;  %v600_v46 = vshll.u32 %v375_v36, 16  ;;  %v299_v2 = vld [vmem:[#allocation2 + $0x14] sm:$0x1] }
  0x42   : > { %766 = vst.msk [vmem:[#allocation2 + $0x70] sm:$0xf] %vm228_vm7, %v535_v41  ;;  %v591_v45 = vrot.slane %v589_v38, 7  ;;  %v833_v47 = vld [vmem:[#allocation2 + $0x3c] sm:$0xf]  ;;  %v599_v48 = vrot.slane %v597_v43, 7 }
  0x43   : > { %5144 = vmatmul.msk.bf16.vlgmr.msra.gmra.mxu0 %vm1309_vm12, %v1293_v40  ;;  %769 = vst [vmem:[#allocation2 + $0x74] sm:$0x1] %v768_v42  ;;  %v244_v49 = vsel %vm6071_vm3, 0, %v243_v44  ;;  %v834_v50 = vld [vmem:[#allocation2 + $0x40] sm:$0xf]  ;;  %v998_v51 = vshrl.u32 %v833_v47, 16 }
  0x44   : > { %v1001_v52 = vshll.u32 %v833_v47, 16  ;;  %337 = vst [vmem:[#allocation2 + $0xa4] sm:$0x1] %v336_v30  ;;  %v594_v53 = vor.u32 %v592_v39, %v591_v45  ;;  %v861_v54 = vld [vmem:[#allocation2 + $0x44] sm:$0x1]  ;;  %v1007_v55 = vshll.u32 %v834_v50, 16  ;;  %v602_v58 = vor.u32 %v600_v46, %v599_v48 }
  0x45   : > { %v1011_v56 = vshrl.u32 %v834_v50, 16  ;;  %v595_v57 = vrot.slane %v591_v45, 4  ;;  %v1000_v59 = vrot.slane %v998_v51, 4  ;;  %v1017_v61 = vshll.u32 %v861_v54, 16  ;;  %245 = vst [vmem:[#allocation2 + $0xc] sm:$0x1] %v244_v49 }
  0x46   : > { %v1003_v60 = vrot.slane %v1001_v52, 5  ;;  %v1009_v62 = vrot.slane %v1007_v55, 5  ;;  %v791_v1 = vld [vmem:[#allocation2 + $0x9c] sm:$0xf]  ;;  %v300_v10 = vsel %vm6079_vm5, 0, %v299_v2  ;;  %v604_v18 = vrot.slane %v599_v48, 4 }
  0x47   : > { %v1013_v63 = vrot.slane %v1011_v56, 4  ;;  %v603_v0 = vsel %vm6101_vm8, %v595_v57, %v602_v58  ;;  %v1019_v7 = vrot.slane %v1017_v61, 5  ;;  %v792_v9 = vsel %vm6107_vm9, %v594_v53, %v791_v1  ;;  %301 = vst [vmem:[#allocation2 + $0x14] sm:$0x1] %v300_v10  ;;  %v350_v34 = vld [vmem:[%s6089_s24] sm:$0xf] }
  0x48   : > { %v1004_v5 = vor.u32 %v1003_v60, %v1000_v59  ;;  %v841_v8 = vld [vmem:[#allocation2 + $0x6c] sm:$0xf]  ;;  %794 = vst.msk [vmem:[#allocation2 + $0xa0] sm:$0xf] %vm228_vm7, %v603_v0  ;;  %v385_v38 = vshrl.u32 %v350_v34, 16  ;;  %v388_v41 = vshll.u32 %v350_v34, 16 }
  0x49   : > { %v1014_v11 = vor.u32 %v1013_v63, %v1009_v62  ;;  %v842_v12 = vld [vmem:[#allocation2 + $0x70] sm:$0xf]  ;;  %v1094_v13 = vshrl.u32 %v841_v8, 16  ;;  %v1097_v14 = vshll.u32 %v841_v8, 16  ;;  %793 = vst [vmem:[#allocation2 + $0x9c] sm:$0xf] %v792_v9 }
  0x4a   : > { %v1005_v15 = vrot.slane %v1004_v5, 4  ;;  %v865_v16 = vld [vmem:[#allocation2 + $0x74] sm:$0x1]  ;;  %v1103_v4 = vshll.u32 %v842_v12, 16  ;;  %v1107_v17 = vshrl.u32 %v842_v12, 16  ;;  %v387_v51 = vrot.slane %v385_v38, 7 }
  0x4b   : > { %v1015_v19 = vrot.slane %v1014_v11, 4  ;;  %v1096_v21 = vrot.slane %v1094_v13, 4  ;;  %v1099_v22 = vrot.slane %v1097_v14, 5  ;;  %v1113_v23 = vshll.u32 %v865_v16, 16  ;;  %v795_v24 = vld [vmem:[#allocation2 + $0xa4] sm:$0x1] }
  0x4c   : > { %v1010_v26 = vsel %vm6152_vm13, %v1005_v15, %v1009_v62  ;;  %v1105_v27 = vrot.slane %v1103_v4, 5  ;;  %v1109_v28 = vrot.slane %v1107_v17, 4  ;;  %v796_v30 = vsel %vm6071_vm3, %v604_v18, %v795_v24  ;;  %v351_v50 = vld [vmem:[%s6089_s24 + $0x4] sm:$0xf]  ;;  %v707_v56 = vld [vmem:[#allocation2 + $0xc] sm:$0xf] }
  0x4d   : > { %v1020_v29 = vsel %vm6152_vm13, %v1015_v19, %v1019_v7  ;;  %v1271_v31 = vunpack.c.l.b16 %v1010_v26  ;;  %v1100_v32 = vor.u32 %v1099_v22, %v1096_v21  ;;  %v1115_v33 = vrot.slane %v1113_v23, 5  ;;  %797 = vst [vmem:[#allocation2 + $0xa4] sm:$0x1] %v796_v30  ;;  %v258_v57 = vld [vmem:[#allocation2 + $0x48] sm:$0x1] }
  0x4e   : > { %v1272_v36 = vunpack.c.l.b16 %v1020_v29  ;;  %v1110_v37 = vor.u32 %v1109_v28, %v1105_v27  ;;  %v390_v61 = vor.u32 %v388_v41, %v387_v51  ;;  %v393_v63 = vshrl.u32 %v351_v50, 16  ;;  %v314_v1 = vld [vmem:[#allocation2 + $0x50] sm:$0x1]  ;;  %v360_v2 = vld [vmem:[%s6089_s24 + $0x28] sm:$0xf] }
  0x4f   : > { %v1101_v39 = vrot.slane %v1100_v32, 4  ;;  %v850_v40 = vld [vmem:[#allocation2 + $0xa0] sm:$0xf]  ;;  %v396_v0 = vshll.u32 %v351_v50, 16  ;;  %v711_v9 = vld [vmem:[#allocation2 + $0x14] sm:$0x1] }
  0x50   : > { %v1298_v42 = vpack.c.b16 %v1272_v36, %v1271_v31  ;;  %v1111_v43 = vrot.slane %v1110_v37, 4  ;;  %v849_v44 = vld [vmem:[#allocation2 + $0x9c] sm:$0xf]  ;;  %v1199_v45 = vshll.u32 %v850_v40, 16  ;;  %v1203_v46 = vshrl.u32 %v850_v40, 16 }
  0x51   : > { %v1106_v47 = vsel %vm6152_vm13, %v1101_v39, %v1105_v27  ;;  %v1190_v48 = vshrl.u32 %v849_v44, 16  ;;  %v1193_v49 = vshll.u32 %v849_v44, 16  ;;  %v708_v8 = vsel %vm6107_vm9, %v390_v61, %v707_v56  ;;  %v361_v11 = vld [vmem:[%s6089_s24 + $0x2c] sm:$0xf]  ;;  %v270_v15 = vld [vmem:[#allocation2 + $0x78] sm:$0x1] }
  0x52   : > { %5149 = vmatmul.msk.bf16.gmra.mxu1 %vm1309_vm12, %v1298_v42  ;;  %v1116_v52 = vsel %vm6152_vm13, %v1111_v43, %v1115_v33  ;;  %v1279_v53 = vunpack.c.l.b16 %v1106_v47  ;;  %v1201_v54 = vrot.slane %v1199_v45, 5  ;;  %v1205_v55 = vrot.slane %v1203_v46, 4  ;;  %709 = vst [vmem:[#allocation2 + $0xc] sm:$0xf] %v708_v8  ;;  %v326_v16 = vld [vmem:[#allocation2 + $0x80] sm:$0x1] }
  0x53   : > { %v1280_v58 = vunpack.c.l.b16 %v1116_v52  ;;  %v1192_v59 = vrot.slane %v1190_v48, 4  ;;  %v1195_v60 = vrot.slane %v1193_v49, 5  ;;  %v259_v10 = vsel %vm6071_vm3, 0, %v258_v57  ;;  %v368_v31 = vld [vmem:[%s6089_s24 + $0x48] sm:$0xf] }
  0x54   : > { %v1206_v62 = vor.u32 %v1205_v55, %v1201_v54  ;;  %v869_v12 = vld [vmem:[#allocation2 + $0xa4] sm:$0x1]  ;;  %v391_v13 = vrot.slane %v387_v51, 4  ;;  %v395_v14 = vrot.slane %v393_v63, 7  ;;  %260 = vst [vmem:[#allocation2 + $0x48] sm:$0x1] %v259_v10 }
  0x55   : > { %v1302_v5 = vpack.c.b16 %v1280_v58, %v1279_v53  ;;  %v1196_v7 = vor.u32 %v1195_v60, %v1192_v59  ;;  %v1209_v18 = vshll.u32 %v869_v12, 16  ;;  %v315_v19 = vsel %vm6079_vm5, 0, %v314_v1  ;;  %v369_v37 = vld [vmem:[%s6089_s24 + $0x4c] sm:$0xf]  ;;  %v282_v45 = vld [vmem:[#allocation2 + $0xa8] sm:$0x1] }
  0x56   : > { %v1207_v17 = vrot.slane %v1206_v62, 4  ;;  %v398_v21 = vor.u32 %v396_v0, %v395_v14  ;;  %v400_v22 = vrot.slane %v395_v14, 4  ;;  %316 = vst [vmem:[#allocation2 + $0x50] sm:$0x1] %v315_v19  ;;  %v470_v23 = vshrl.u32 %v360_v2, 16 }
  0x57   : > { %5153 = vmatmul.msk.bf16.gmra.mxu2 %vm1309_vm12, %v1302_v5  ;;  %v1197_v4 = vrot.slane %v1196_v7, 4  ;;  %v473_v24 = vshll.u32 %v360_v2, 16  ;;  %v1211_v27 = vrot.slane %v1209_v18, 5  ;;  %v478_v28 = vshrl.u32 %v361_v11, 16  ;;  %v338_v50 = vld [vmem:[#allocation2 + $0xb0] sm:$0x1] }
  0x58   : > { %v481_v29 = vshll.u32 %v361_v11, 16  ;;  %v399_v33 = vsel %vm6101_vm8, %v391_v13, %v398_v21  ;;  %v712_v34 = vsel %vm6071_vm3, %v400_v22, %v711_v9  ;;  %v472_v36 = vrot.slane %v470_v23, 7  ;;  %v376_v60 = vld [vmem:[%s6089_s24 + $0x68] sm:$0xf]  ;;  %v377_v11 = vld [vmem:[%s6089_s24 + $0x6c] sm:$0xf] }
  0x59   : > { %v1202_v26 = vsel %vm6152_vm13, %v1197_v4, %v1201_v54  ;;  %v1212_v30 = vsel %vm6152_vm13, %v1207_v17, %v1211_v27  ;;  %710 = vst.msk [vmem:[#allocation2 + $0x10] sm:$0xf] %vm228_vm7, %v399_v33  ;;  %v480_v38 = vrot.slane %v478_v28, 7  ;;  %v271_v39 = vsel %vm6071_vm3, 0, %v270_v15  ;;  %v825_v46 = vld [vmem:[#allocation2 + $0xc] sm:$0xf] }
  0x5a   : > { %v1287_v32 = vunpack.c.l.b16 %v1202_v26  ;;  %v327_v40 = vsel %vm6079_vm5, 0, %v326_v16  ;;  %v1288_v41 = vunpack.c.l.b16 %v1212_v30  ;;  %713 = vst [vmem:[#allocation2 + $0x14] sm:$0x1] %v712_v34  ;;  %v475_v42 = vor.u32 %v473_v24, %v472_v36 }
  0x5b   : > { %v476_v43 = vrot.slane %v472_v36, 4  ;;  %v538_v44 = vshrl.u32 %v368_v31, 16  ;;  %v483_v47 = vor.u32 %v481_v29, %v480_v38  ;;  %v485_v48 = vrot.slane %v480_v38, 4  ;;  %272 = vst [vmem:[#allocation2 + $0x78] sm:$0x1] %v271_v39 }
  0x5c   : > { %v541_v49 = vshll.u32 %v368_v31, 16  ;;  %v1306_v51 = vpack.c.b16 %v1288_v41, %v1287_v32  ;;  %v902_v52 = vshrl.u32 %v825_v46, 16  ;;  %v905_v53 = vshll.u32 %v825_v46, 16  ;;  %v742_v54 = vld [vmem:[#allocation2 + $0x48] sm:$0xf] }
  0x5d   : > { %328 = vst [vmem:[#allocation2 + $0x80] sm:$0x1] %v327_v40  ;;  %v484_v55 = vsel %vm6101_vm8, %v476_v43, %v483_v47  ;;  %v743_v56 = vsel %vm6107_vm9, %v475_v42, %v742_v54  ;;  %v746_v57 = vld [vmem:[#allocation2 + $0x50] sm:$0x1]  ;;  %v540_v58 = vrot.slane %v538_v44, 7  ;;  %v546_v59 = vshrl.u32 %v369_v37, 16 }
  0x5e   : > { %5157 = vmatmul.msk.bf16.gmra.mxu3 %vm1309_vm12, %v1306_v51  ;;  %v904_v61 = vrot.slane %v902_v52, 4  ;;  %v907_v62 = vrot.slane %v905_v53, 5  ;;  %744 = vst [vmem:[#allocation2 + $0x48] sm:$0xf] %v743_v56  ;;  %v747_v63 = vsel %vm6071_vm3, %v485_v48, %v746_v57  ;;  %v549_v0 = vshll.u32 %v369_v37, 16 }
  0x5f   : > { %745 = vst.msk [vmem:[#allocation2 + $0x4c] sm:$0xf] %vm228_vm7, %v484_v55  ;;  %v543_v1 = vor.u32 %v541_v49, %v540_v58  ;;  %v544_v2 = vrot.slane %v540_v58, 4  ;;  %v548_v5 = vrot.slane %v546_v59, 7  ;;  %v283_v7 = vsel %vm6071_vm3, 0, %v282_v45 }
  0x60   : > { %v6295_v8 = vld [vmem:[#allocation2 + $0x10] sm:$0xf]  ;;  %v908_v9 = vor.u32 %v907_v62, %v904_v61  ;;  %748 = vst [vmem:[#allocation2 + $0x50] sm:$0x1] %v747_v63  ;;  %v339_v10 = vsel %vm6079_vm5, 0, %v338_v50  ;;  %v606_v12 = vshrl.u32 %v376_v60, 16 }
  0x61   : > { %v6300_v13 = vld [vmem:[#allocation2 + $0x14] sm:$0x1]  ;;  %v911_v14 = vshll.u32 %v6295_v8, 16  ;;  %v915_v15 = vshrl.u32 %v6295_v8, 16  ;;  %v551_v16 = vor.u32 %v549_v0, %v548_v5  ;;  %v553_v4 = vrot.slane %v548_v5, 4 }
  0x62   : > { %v909_v17 = vrot.slane %v908_v9, 4  ;;  %v921_v18 = vshll.u32 %v6300_v13, 16  ;;  %v770_v19 = vld [vmem:[#allocation2 + $0x78] sm:$0xf]  ;;  %284 = vst [vmem:[#allocation2 + $0xa8] sm:$0x1] %v283_v7 }
  0x63   : > { %v913_v21 = vrot.slane %v911_v14, 5  ;;  %v917_v22 = vrot.slane %v915_v15, 4  ;;  %v552_v23 = vsel %vm6101_vm8, %v544_v2, %v551_v16  ;;  %v771_v24 = vsel %vm6107_vm9, %v543_v1, %v770_v19  ;;  %340 = vst [vmem:[#allocation2 + $0xb0] sm:$0x1] %v339_v10  ;;  %v246_v32 = vld [vmem:[#allocation2 + $0x18] sm:$0x1] }
  0x64   : > { %v774_v26 = vld [vmem:[#allocation2 + $0x80] sm:$0x1]  ;;  %v923_v27 = vrot.slane %v921_v18, 5  ;;  %772 = vst [vmem:[#allocation2 + $0x78] sm:$0xf] %v771_v24  ;;  %v608_v29 = vrot.slane %v606_v12, 7 }
  0x65   : > { %v775_v28 = vsel %vm6071_vm3, %v553_v4, %v774_v26  ;;  %v609_v31 = vshll.u32 %v376_v60, 16  ;;  %v914_v33 = vsel %vm6152_vm13, %v909_v17, %v913_v21  ;;  %v918_v34 = vor.u32 %v917_v22, %v913_v21  ;;  %v835_v36 = vld [vmem:[#allocation2 + $0x48] sm:$0xf]  ;;  %773 = vst.msk [vmem:[#allocation2 + $0x7c] sm:$0xf] %vm228_vm7, %v552_v23 }
  0x66   : > { %v614_v37 = vshrl.u32 %v377_v11, 16  ;;  %v617_v30 = vshll.u32 %v377_v11, 16  ;;  %v1263_v38 = vunpack.c.l.b16 %v914_v33  ;;  %v836_v39 = vld [vmem:[#allocation2 + $0x4c] sm:$0xf]  ;;  %v1022_v40 = vshrl.u32 %v835_v36, 16 }
  0x67   : > { %v1025_v41 = vshll.u32 %v835_v36, 16  ;;  %776 = vst [vmem:[#allocation2 + $0x80] sm:$0x1] %v775_v28  ;;  %v611_v42 = vor.u32 %v609_v31, %v608_v29  ;;  %v919_v43 = vrot.slane %v918_v34, 4  ;;  %v862_v44 = vld [vmem:[#allocation2 + $0x50] sm:$0x1] }
  0x68   : > { %v1031_v45 = vshll.u32 %v836_v39, 16  ;;  %v1035_v46 = vshrl.u32 %v836_v39, 16  ;;  %v612_v47 = vrot.slane %v608_v29, 4  ;;  %v1024_v48 = vrot.slane %v1022_v40, 4  ;;  %v302_v52 = vld [vmem:[#allocation2 + $0x20] sm:$0x1] }
  0x69   : > { %v1027_v49 = vrot.slane %v1025_v41, 5  ;;  %v1041_v50 = vshll.u32 %v862_v44, 16  ;;  %v616_v51 = vrot.slane %v614_v37, 7  ;;  %v924_v53 = vsel %vm6152_vm13, %v919_v43, %v923_v27  ;;  %v798_v56 = vld [vmem:[#allocation2 + $0xa8] sm:$0xf] }
  0x6a   : > { %v1033_v54 = vrot.slane %v1031_v45, 5  ;;  %v1037_v55 = vrot.slane %v1035_v46, 4  ;;  %v247_v57 = vsel %vm6071_vm3, 0, %v246_v32  ;;  %v1264_v58 = vunpack.c.l.b16 %v924_v53  ;;  %v802_v12 = vld [vmem:[#allocation2 + $0xb0] sm:$0x1] }
  0x6b   : > { %v1028_v59 = vor.u32 %v1027_v49, %v1024_v48  ;;  %v1043_v60 = vrot.slane %v1041_v50, 5  ;;  %v619_v61 = vor.u32 %v617_v30, %v616_v51  ;;  %248 = vst [vmem:[#allocation2 + $0x18] sm:$0x1] %v247_v57  ;;  %v843_v63 = vld [vmem:[#allocation2 + $0x78] sm:$0xf]  ;;  %v621_v0 = vrot.slane %v616_v51, 4 }
  0x6c   : > { %v1038_v62 = vor.u32 %v1037_v55, %v1033_v54  ;;  %v799_v1 = vsel %vm6107_vm9, %v611_v42, %v798_v56  ;;  %v303_v2 = vsel %vm6079_vm5, 0, %v302_v52  ;;  %v1294_v5 = vpack.c.b16 %v1264_v58, %v1263_v38  ;;  %v844_v9 = vld [vmem:[#allocation2 + $0x7c] sm:$0xf]  ;;  %v352_v14 = vld [vmem:[%s6089_s24 + $0x8] sm:$0xf] }
  0x6d   : > { %v1029_v7 = vrot.slane %v1028_v59, 4  ;;  %v1118_v10 = vshrl.u32 %v843_v63, 16  ;;  %v1121_v11 = vshll.u32 %v843_v63, 16  ;;  %v1127_v4 = vshll.u32 %v844_v9, 16  ;;  %800 = vst [vmem:[#allocation2 + $0xa8] sm:$0xf] %v799_v1 }
  0x6e   : > { %v1039_v15 = vrot.slane %v1038_v62, 4  ;;  %v866_v16 = vld [vmem:[#allocation2 + $0x80] sm:$0x1]  ;;  %v1131_v17 = vshrl.u32 %v844_v9, 16  ;;  %v620_v18 = vsel %vm6101_vm8, %v612_v47, %v619_v61  ;;  %5145 = vmatmul.msk.bf16.gmra.mxu0 %vm1309_vm12, %v1294_v5  ;;  %v353_v29 = vld [vmem:[%s6089_s24 + $0xc] sm:$0xf]  ;;  %v803_v37 = vsel %vm6071_vm3, %v621_v0, %v802_v12 }
  0x6f   : > { %v1034_v19 = vsel %vm6152_vm13, %v1029_v7, %v1033_v54  ;;  %v1120_v21 = vrot.slane %v1118_v10, 4  ;;  %v1123_v22 = vrot.slane %v1121_v11, 5  ;;  %v1137_v23 = vshll.u32 %v866_v16, 16  ;;  %801 = vst.msk [vmem:[#allocation2 + $0xac] sm:$0xf] %vm228_vm7, %v620_v18 }
  0x70   : > { %v1044_v24 = vsel %vm6152_vm13, %v1039_v15, %v1043_v60  ;;  %v1273_v26 = vunpack.c.l.b16 %v1034_v19  ;;  %v1129_v27 = vrot.slane %v1127_v4, 5  ;;  %v1133_v28 = vrot.slane %v1131_v17, 4  ;;  %304 = vst [vmem:[#allocation2 + $0x20] sm:$0x1] %v303_v2  ;;  %v261_v34 = vld [vmem:[#allocation2 + $0x54] sm:$0x1] }
  0x71   : > { %v1274_v31 = vunpack.c.l.b16 %v1044_v24  ;;  %v1124_v32 = vor.u32 %v1123_v22, %v1120_v21  ;;  %v1139_v33 = vrot.slane %v1137_v23, 5  ;;  %v402_v30 = vshrl.u32 %v352_v14, 16  ;;  %v317_v39 = vld [vmem:[#allocation2 + $0x5c] sm:$0x1]  ;;  %804 = vst [vmem:[#allocation2 + $0xb0] sm:$0x1] %v803_v37 }
  0x72   : > { %v1134_v36 = vor.u32 %v1133_v28, %v1129_v27  ;;  %v405_v38 = vshll.u32 %v352_v14, 16  ;;  %v410_v42 = vshrl.u32 %v353_v29, 16  ;;  %v413_v43 = vshll.u32 %v353_v29, 16  ;;  %v362_v48 = vld [vmem:[%s6089_s24 + $0x30] sm:$0xf] }
  0x73   : > { %v1299_v40 = vpack.c.b16 %v1274_v31, %v1273_v26  ;;  %v1125_v41 = vrot.slane %v1124_v32, 4  ;;  %v404_v45 = vrot.slane %v402_v30, 7  ;;  %v262_v46 = vsel %vm6071_vm3, 0, %v261_v34  ;;  %v714_v51 = vld [vmem:[#allocation2 + $0x18] sm:$0xf] }
  0x74   : > { %v1135_v44 = vrot.slane %v1134_v36, 4  ;;  %v318_v47 = vsel %vm6079_vm5, 0, %v317_v39  ;;  %v412_v50 = vrot.slane %v410_v42, 7  ;;  %263 = vst [vmem:[#allocation2 + $0x54] sm:$0x1] %v262_v46  ;;  %v487_v52 = vshrl.u32 %v362_v48, 16 }
  0x75   : > { %5150 = vmatmul.msk.bf16.gmra.mxu1 %vm1309_vm12, %v1299_v40  ;;  %v1130_v49 = vsel %vm6152_vm13, %v1125_v41, %v1129_v27  ;;  %v851_v55 = vld [vmem:[#allocation2 + $0xa8] sm:$0xf]  ;;  %v407_v56 = vor.u32 %v405_v38, %v404_v45  ;;  %v408_v57 = vrot.slane %v404_v45, 4  ;;  %319 = vst [vmem:[#allocation2 + $0x5c] sm:$0x1] %v318_v47  ;;  %v490_v24 = vshll.u32 %v362_v48, 16 }
  0x76   : > { %v1140_v53 = vsel %vm6152_vm13, %v1135_v44, %v1139_v33  ;;  %v1281_v54 = vunpack.c.l.b16 %v1130_v49  ;;  %v852_v59 = vld [vmem:[#allocation2 + $0xac] sm:$0xf]  ;;  %v1214_v60 = vshrl.u32 %v851_v55, 16  ;;  %v1217_v61 = vshll.u32 %v851_v55, 16  ;;  %v363_v63 = vld [vmem:[%s6089_s24 + $0x34] sm:$0xf] }
  0x77   : > { %v1282_v58 = vunpack.c.l.b16 %v1140_v53  ;;  %v415_v62 = vor.u32 %v413_v43, %v412_v50  ;;  %v1223_v0 = vshll.u32 %v852_v59, 16  ;;  %v1227_v1 = vshrl.u32 %v852_v59, 16  ;;  %v718_v7 = vld [vmem:[#allocation2 + $0x20] sm:$0x1]  ;;  %v273_v14 = vld [vmem:[#allocation2 + $0x84] sm:$0x1] }
  0x78   : > { %v417_v2 = vrot.slane %v412_v50, 4  ;;  %v715_v5 = vsel %vm6107_vm9, %v407_v56, %v714_v51  ;;  %v1216_v10 = vrot.slane %v1214_v60, 4  ;;  %v1219_v11 = vrot.slane %v1217_v61, 5  ;;  %v870_v15 = vld [vmem:[#allocation2 + $0xb0] sm:$0x1] }
  0x79   : > { %v1303_v9 = vpack.c.b16 %v1282_v58, %v1281_v54  ;;  %v416_v12 = vsel %vm6101_vm8, %v408_v57, %v415_v62  ;;  %716 = vst [vmem:[#allocation2 + $0x18] sm:$0xf] %v715_v5  ;;  %v1225_v16 = vrot.slane %v1223_v0, 5  ;;  %v1229_v4 = vrot.slane %v1227_v1, 4  ;;  %v329_v22 = vld [vmem:[#allocation2 + $0x8c] sm:$0x1] }
  0x7a   : > { %717 = vst.msk [vmem:[#allocation2 + $0x1c] sm:$0xf] %vm228_vm7, %v416_v12  ;;  %v719_v17 = vsel %vm6071_vm3, %v417_v2, %v718_v7  ;;  %v1220_v18 = vor.u32 %v1219_v11, %v1216_v10  ;;  %v1233_v19 = vshll.u32 %v870_v15, 16  ;;  %v489_v21 = vrot.slane %v487_v52, 7  ;;  %v370_v40 = vld [vmem:[%s6089_s24 + $0x50] sm:$0xf] }
  0x7b   : > { %5154 = vmatmul.msk.bf16.gmra.mxu2 %vm1309_vm12, %v1303_v9  ;;  %720 = vst [vmem:[#allocation2 + $0x20] sm:$0x1] %v719_v17  ;;  %v1230_v23 = vor.u32 %v1229_v4, %v1225_v16  ;;  %v495_v26 = vshrl.u32 %v363_v63, 16  ;;  %v498_v27 = vshll.u32 %v363_v63, 16  ;;  %v749_v32 = vld [vmem:[#allocation2 + $0x54] sm:$0xf] }
  0x7c   : > { %v1221_v28 = vrot.slane %v1220_v18, 4  ;;  %v1235_v29 = vrot.slane %v1233_v19, 5  ;;  %v493_v31 = vrot.slane %v489_v21, 4  ;;  %v274_v33 = vsel %vm6071_vm3, 0, %v273_v14  ;;  %v753_v39 = vld [vmem:[#allocation2 + $0x5c] sm:$0x1] }
  0x7d   : > { %v1231_v34 = vrot.slane %v1230_v23, 4  ;;  %v492_v36 = vor.u32 %v490_v24, %v489_v21  ;;  %v497_v37 = vrot.slane %v495_v26, 7  ;;  %275 = vst [vmem:[#allocation2 + $0x84] sm:$0x1] %v274_v33  ;;  %v330_v30 = vsel %vm6079_vm5, 0, %v329_v22 }
  0x7e   : > { %v1226_v38 = vsel %vm6152_vm13, %v1221_v28, %v1225_v16  ;;  %331 = vst [vmem:[#allocation2 + $0x8c] sm:$0x1] %v330_v30  ;;  %v371_v46 = vld [vmem:[%s6089_s24 + $0x54] sm:$0xf]  ;;  %v341_v53 = vld [vmem:[#allocation2 + $0xbc] sm:$0x1] }
  0x7f   : > { %v1236_v41 = vsel %vm6152_vm13, %v1231_v34, %v1235_v29  ;;  %v1289_v42 = vunpack.c.l.b16 %v1226_v38  ;;  %v500_v44 = vor.u32 %v498_v27, %v497_v37  ;;  %v502_v45 = vrot.slane %v497_v37, 4  ;;  %v285_v52 = vld [vmem:[#allocation2 + $0xb4] sm:$0x1]  ;;  %v378_v17 = vld [vmem:[%s6089_s24 + $0x70] sm:$0xf] }
  0x80   : > { %v827_v43 = vld [vmem:[#allocation2 + $0x18] sm:$0xf]  ;;  %v1290_v47 = vunpack.c.l.b16 %v1236_v41  ;;  %v750_v51 = vsel %vm6107_vm9, %v492_v36, %v749_v32  ;;  %v555_v1 = vshrl.u32 %v370_v40, 16  ;;  %v558_v2 = vshll.u32 %v370_v40, 16  ;;  %v379_v37 = vld [vmem:[%s6089_s24 + $0x74] sm:$0xf] }
  0x81   : > { %v6363_v48 = vld [vmem:[#allocation2 + $0x1c] sm:$0xf]  ;;  %v926_v49 = vshrl.u32 %v827_v43, 16  ;;  %v929_v50 = vshll.u32 %v827_v43, 16  ;;  %v501_v57 = vsel %vm6101_vm8, %v493_v31, %v500_v44  ;;  %751 = vst [vmem:[#allocation2 + $0x54] sm:$0xf] %v750_v51  ;;  %v754_v58 = vsel %vm6071_vm3, %v502_v45, %v753_v39 }
  0x82   : > { %v6367_v54 = vld [vmem:[#allocation2 + $0x20] sm:$0x1]  ;;  %v935_v55 = vshll.u32 %v6363_v48, 16  ;;  %v939_v56 = vshrl.u32 %v6363_v48, 16  ;;  %v1307_v59 = vpack.c.b16 %v1290_v47, %v1289_v42  ;;  %752 = vst.msk [vmem:[#allocation2 + $0x58] sm:$0xf] %vm228_vm7, %v501_v57 }
  0x83   : > { %v928_v60 = vrot.slane %v926_v49, 4  ;;  %v931_v61 = vrot.slane %v929_v50, 5  ;;  %v945_v62 = vshll.u32 %v6367_v54, 16  ;;  %755 = vst [vmem:[#allocation2 + $0x5c] sm:$0x1] %v754_v58  ;;  %v563_v9 = vshrl.u32 %v371_v46, 16 }
  0x84   : > { %v937_v63 = vrot.slane %v935_v55, 5  ;;  %v941_v0 = vrot.slane %v939_v56, 4  ;;  %5158 = vmatmul.msk.bf16.gmra.mxu3 %vm1309_vm12, %v1307_v59  ;;  %v566_v10 = vshll.u32 %v371_v46, 16  ;;  %v557_v12 = vrot.slane %v555_v1, 7  ;;  %v777_v22 = vld [vmem:[#allocation2 + $0x84] sm:$0xf] }
  0x85   : > { %v932_v5 = vor.u32 %v931_v61, %v928_v60  ;;  %v947_v7 = vrot.slane %v945_v62, 5  ;;  %v286_v14 = vsel %vm6071_vm3, 0, %v285_v52  ;;  %v342_v15 = vsel %vm6079_vm5, 0, %v341_v53  ;;  %v781_v28 = vld [vmem:[#allocation2 + $0x8c] sm:$0x1] }
  0x86   : > { %v942_v11 = vor.u32 %v941_v0, %v937_v63  ;;  %v565_v4 = vrot.slane %v563_v9, 7  ;;  %287 = vst [vmem:[#allocation2 + $0xb4] sm:$0x1] %v286_v14  ;;  %v560_v19 = vor.u32 %v558_v2, %v557_v12  ;;  %v561_v21 = vrot.slane %v557_v12, 4  ;;  %v249_v42 = vld [vmem:[#allocation2 + $0x24] sm:$0x1] }
  0x87   : > { %v933_v16 = vrot.slane %v932_v5, 4  ;;  %343 = vst [vmem:[#allocation2 + $0xbc] sm:$0x1] %v342_v15  ;;  %v623_v29 = vshrl.u32 %v378_v17, 16  ;;  %v305_v47 = vld [vmem:[#allocation2 + $0x2c] sm:$0x1] }
  0x88   : > { %v943_v18 = vrot.slane %v942_v11, 4  ;;  %v837_v24 = vld [vmem:[#allocation2 + $0x54] sm:$0xf]  ;;  %v568_v26 = vor.u32 %v566_v10, %v565_v4  ;;  %v570_v27 = vrot.slane %v565_v4, 4  ;;  %v778_v46 = vsel %vm6107_vm9, %v560_v19, %v777_v22  ;;  %v354_v53 = vld [vmem:[%s6089_s24 + $0x10] sm:$0xf] }
  0x89   : > { %v938_v23 = vsel %vm6152_vm13, %v933_v16, %v937_v63  ;;  %v6387_v33 = vld [vmem:[#allocation2 + $0x58] sm:$0xf]  ;;  %v1046_v34 = vshrl.u32 %v837_v24, 16  ;;  %v1049_v36 = vshll.u32 %v837_v24, 16  ;;  %779 = vst [vmem:[#allocation2 + $0x84] sm:$0xf] %v778_v46 }
  0x8a   : > { %v948_v31 = vsel %vm6152_vm13, %v943_v18, %v947_v7  ;;  %v1265_v32 = vunpack.c.l.b16 %v938_v23  ;;  %v6390_v38 = vld [vmem:[#allocation2 + $0x5c] sm:$0x1]  ;;  %v1055_v39 = vshll.u32 %v6387_v33, 16  ;;  %v1059_v40 = vshrl.u32 %v6387_v33, 16  ;;  %v6404_v58 = vld [vmem:[%s6089_s24 + $0x14] sm:$0xf] }
  0x8b   : > { %v1266_v30 = vunpack.c.l.b16 %v948_v31  ;;  %v569_v41 = vsel %vm6101_vm8, %v561_v21, %v568_v26  ;;  %v1048_v43 = vrot.slane %v1046_v34, 4  ;;  %v1051_v44 = vrot.slane %v1049_v36, 5 }
  0x8c   : > { %v1065_v45 = vshll.u32 %v6390_v38, 16  ;;  %780 = vst.msk [vmem:[#allocation2 + $0x88] sm:$0xf] %vm228_vm7, %v569_v41  ;;  %v1057_v50 = vrot.slane %v1055_v39, 5  ;;  %v1061_v51 = vrot.slane %v1059_v40, 4  ;;  %v782_v52 = vsel %vm6071_vm3, %v570_v27, %v781_v28 }
  0x8d   : > { %v1295_v49 = vpack.c.b16 %v1266_v30, %v1265_v32  ;;  %v1052_v55 = vor.u32 %v1051_v44, %v1048_v43  ;;  %783 = vst [vmem:[#allocation2 + $0x8c] sm:$0x1] %v782_v52  ;;  %v625_v56 = vrot.slane %v623_v29, 7  ;;  %v626_v57 = vshll.u32 %v378_v17, 16  ;;  %v805_v63 = vld [vmem:[#allocation2 + $0xb4] sm:$0xf] }
  0x8e   : > { %v1062_v59 = vor.u32 %v1061_v51, %v1057_v50  ;;  %v1067_v60 = vrot.slane %v1065_v45, 5  ;;  %v631_v61 = vshrl.u32 %v379_v37, 16  ;;  %v634_v62 = vshll.u32 %v379_v37, 16  ;;  %v809_v5 = vld [vmem:[#allocation2 + $0xbc] sm:$0x1] }
  0x8f   : > { %5146 = vmatmul.msk.bf16.gmra.mxu0 %vm1309_vm12, %v1295_v49  ;;  %v1053_v0 = vrot.slane %v1052_v55, 4  ;;  %v628_v1 = vor.u32 %v626_v57, %v625_v56  ;;  %v629_v2 = vrot.slane %v625_v56, 4  ;;  %v250_v7 = vsel %vm6071_vm3, 0, %v249_v42 }
  0x90   : > { %v1063_v9 = vrot.slane %v1062_v59, 4  ;;  %v633_v10 = vrot.slane %v631_v61, 7  ;;  %251 = vst [vmem:[#allocation2 + $0x24] sm:$0x1] %v250_v7  ;;  %v306_v11 = vsel %vm6079_vm5, 0, %v305_v47  ;;  %v419_v12 = vshrl.u32 %v354_v53, 16 }
  0x91   : > { %v1058_v14 = vsel %vm6152_vm13, %v1053_v0, %v1057_v50  ;;  %v806_v15 = vsel %vm6107_vm9, %v628_v1, %v805_v63  ;;  %307 = vst [vmem:[#allocation2 + $0x2c] sm:$0x1] %v306_v11  ;;  %v422_v16 = vshll.u32 %v354_v53, 16  ;;  %v427_v4 = vshrl.u32 %v6404_v58, 16  ;;  %v845_v24 = vld [vmem:[#allocation2 + $0x84] sm:$0xf] }
  0x92   : > { %v1068_v17 = vsel %vm6152_vm13, %v1063_v9, %v1067_v60  ;;  %v1275_v18 = vunpack.c.l.b16 %v1058_v14  ;;  %v636_v21 = vor.u32 %v634_v62, %v633_v10  ;;  %v638_v22 = vrot.slane %v633_v10, 4  ;;  %807 = vst [vmem:[#allocation2 + $0xb4] sm:$0xf] %v806_v15 }
  0x93   : > { %v846_v19 = vld [vmem:[#allocation2 + $0x88] sm:$0xf]  ;;  %v1276_v23 = vunpack.c.l.b16 %v1068_v17  ;;  %v421_v28 = vrot.slane %v419_v12, 7  ;;  %v1142_v31 = vshrl.u32 %v845_v24, 16  ;;  %v1145_v32 = vshll.u32 %v845_v24, 16 }
  0x94   : > { %v1151_v26 = vshll.u32 %v846_v19, 16  ;;  %v1155_v27 = vshrl.u32 %v846_v19, 16  ;;  %v867_v29 = vld [vmem:[#allocation2 + $0x8c] sm:$0x1]  ;;  %v637_v34 = vsel %vm6101_vm8, %v629_v2, %v636_v21  ;;  %v810_v36 = vsel %vm6071_vm3, %v638_v22, %v809_v5 }
  0x95   : > { %v1300_v37 = vpack.c.b16 %v1276_v23, %v1275_v18  ;;  %v1161_v40 = vshll.u32 %v867_v29, 16  ;;  %808 = vst.msk [vmem:[#allocation2 + $0xb8] sm:$0xf] %vm228_vm7, %v637_v34  ;;  %v1144_v41 = vrot.slane %v1142_v31, 4  ;;  %v1147_v42 = vrot.slane %v1145_v32, 5 }
  0x96   : > { %v1153_v30 = vrot.slane %v1151_v26, 5  ;;  %v1157_v39 = vrot.slane %v1155_v27, 4  ;;  %811 = vst [vmem:[#allocation2 + $0xbc] sm:$0x1] %v810_v36  ;;  %v424_v43 = vor.u32 %v422_v16, %v421_v28  ;;  %v429_v46 = vrot.slane %v427_v4, 7 }
  0x97   : > { %5151 = vmatmul.msk.bf16.gmra.mxu1 %vm1309_vm12, %v1300_v37  ;;  %v1163_v45 = vrot.slane %v1161_v40, 5  ;;  %v721_v47 = vld [vmem:[#allocation2 + $0x24] sm:$0xf]  ;;  %v1148_v49 = vor.u32 %v1147_v42, %v1144_v41  ;;  %v425_v50 = vrot.slane %v421_v28, 4  ;;  %v430_v51 = vshll.u32 %v6404_v58, 16 }
  0x98   : > { %v1158_v44 = vor.u32 %v1157_v39, %v1153_v30  ;;  %v722_v52 = vsel %vm6107_vm9, %v424_v43, %v721_v47  ;;  %v725_v53 = vld [vmem:[#allocation2 + $0x2c] sm:$0x1]  ;;  %v434_v57 = vrot.slane %v429_v46, 4  ;;  %v1671_v16 = vld [vmem:[#allocation2] sm:$0xe] }
  0x99   : > { %v853_v56 = vld [vmem:[#allocation2 + $0xb4] sm:$0xf]  ;;  %723 = vst [vmem:[#allocation2 + $0x24] sm:$0xf] %v722_v52  ;;  %v1149_v59 = vrot.slane %v1148_v49, 4  ;;  %v432_v62 = vor.u32 %v430_v51, %v429_v46  ;;  %v5241_v31 = vrot.slane %v1671_v16, 9 }
  0x9a   : > { %v1159_v55 = vrot.slane %v1158_v44, 4  ;;  %v1238_v60 = vshrl.u32 %v853_v56, 16  ;;  %v1241_v61 = vshll.u32 %v853_v56, 16  ;;  %v726_v0 = vsel %vm6071_vm3, %v434_v57, %v725_v53  ;;  %v5532_v58 = vld [vmem:[%s7614_s1 + $0xc] sm:$0x3]  ;;  %v5731_v46 = vld [vmem:[#allocation2] sm:$0xff] }
  0x9b   : > { %v1154_v1 = vsel %vm6152_vm13, %v1149_v59, %v1153_v30  ;;  %727 = vst [vmem:[#allocation2 + $0x2c] sm:$0x1] %v726_v0  ;;  %v433_v15 = vsel %vm6101_vm8, %v425_v50, %v432_v62  ;;  %v5937_v18 = vld [vmem:[#allocation2 + $0x4] sm:$0xf]  ;;  %v3565_v24 = vsel %vm1358_vm0, %v5532_v58, 0 }
  0x9c   : > { %v1164_v63 = vsel %vm6152_vm13, %v1159_v55, %v1163_v45  ;;  %v854_v5 = vld [vmem:[#allocation2 + $0xb8] sm:$0xf]  ;;  %v1240_v7 = vrot.slane %v1238_v60, 4  ;;  %v1243_v9 = vrot.slane %v1241_v61, 5  ;;  %v1283_v10 = vunpack.c.l.b16 %v1154_v1  ;;  %724 = vst.msk [vmem:[#allocation2 + $0x28] sm:$0xf] %vm228_vm7, %v433_v15  ;;  %3574 = vmatpush.bf16.msra.mxu2 %v3565_v24 }
  0x9d   : > { %v1284_v2 = vunpack.c.l.b16 %v1164_v63  ;;  %v871_v11 = vld [vmem:[#allocation2 + $0xbc] sm:$0x1]  ;;  %v1247_v12 = vshll.u32 %v854_v5, 16  ;;  %v1251_v14 = vshrl.u32 %v854_v5, 16  ;;  %v1726_v19 = vrot.slane %v5937_v18, 5 }
  0x9e   : > { %v1244_v4 = vor.u32 %v1243_v9, %v1240_v7  ;;  %v1257_v17 = vshll.u32 %v871_v11, 16  ;;  %v5938_v26 = vld [vmem:[#allocation2 + $0x8] sm:$0x1]  ;;  %v5386_v41 = vld [vmem:[#allocation2 + $0xc] sm:$0xf] }
  0x9f   : > { %v1304_v21 = vpack.c.b16 %v1284_v2, %v1283_v10  ;;  %v1249_v22 = vrot.slane %v1247_v12, 5  ;;  %v1253_v23 = vrot.slane %v1251_v14, 4  ;;  %v1729_v27 = vrot.slane %v5938_v26, 5  ;;  %v5387_v51 = vld [vmem:[#allocation2 + $0x10] sm:$0xf] }
  0xa0   : > { %v1245_v28 = vrot.slane %v1244_v4, 4  ;;  %v829_v29 = vld [vmem:[#allocation2 + $0x24] sm:$0xf]  ;;  %v1728_v32 = vrot.slane %v1726_v19, 4  ;;  %v1259_v36 = vrot.slane %v1257_v17, 5  ;;  %v1727_v49 = vsel %vm6443_vm1, %v5241_v31, %v1726_v19 }
  0xa1   : > { %5155 = vmatmul.msk.bf16.gmra.mxu2 %vm1309_vm12, %v1304_v21  ;;  %v1254_v34 = vor.u32 %v1253_v23, %v1249_v22  ;;  %v950_v37 = vshrl.u32 %v829_v29, 16  ;;  %v953_v30 = vshll.u32 %v829_v29, 16  ;;  %v2397_v56 = vshrl.u32 %v5386_v41, 16  ;;  %v5661_v1 = vld [vmem:[%s7614_s1 + $0xe] sm:$0x3] }
  0xa2   : > { %v1250_v40 = vsel %vm6152_vm13, %v1245_v28, %v1249_v22  ;;  %v6449_v43 = vld [vmem:[#allocation2 + $0x2c] sm:$0x1]  ;;  %v1730_v50 = vsel %vm6443_vm1, %v1728_v32, %v1729_v27  ;;  %v2400_v57 = vshll.u32 %v5386_v41, 16  ;;  %v2406_v0 = vshll.u32 %v5387_v51, 16  ;;  %v5467_v14 = vld [vmem:[%s7614_s1 + $0xa] sm:$0x3] }
  0xa3   : > { %v1255_v42 = vrot.slane %v1254_v34, 4  ;;  %v952_v44 = vrot.slane %v950_v37, 4  ;;  %v955_v45 = vrot.slane %v953_v30, 5  ;;  %v1291_v47 = vunpack.c.l.b16 %v1250_v40  ;;  %v6457_v53 = vld [vmem:[#allocation2 + $0x28] sm:$0xf] }
  0xa4   : > { %v959_v60 = vshll.u32 %v6457_v53, 16  ;;  %v963_v61 = vshrl.u32 %v6457_v53, 16  ;;  %v969_v62 = vshll.u32 %v6449_v43, 16  ;;  %v2410_v58 = vshrl.u32 %v5387_v51, 16  ;;  %v5694_v18 = vld [vmem:[%s7614_s1 + $0x10] sm:$0x3] }
  0xa5   : > { %v1260_v52 = vsel %vm6152_vm13, %v1255_v42, %v1259_v36  ;;  %v956_v55 = vor.u32 %v955_v45, %v952_v44  ;;  %v1836_v9 = vunpack.c.l.b16 %v1727_v49  ;;  %v1837_v10 = vunpack.c.l.b16 %v1730_v50  ;;  %v5388_v23 = vld [vmem:[#allocation2 + $0x14] sm:$0x1]  ;;  %v1672_v30 = vld [vmem:[#allocation2 + $0xc] sm:$0xe]  ;;  %v1673_v50 = vld [vmem:[#allocation2 + $0x18] sm:$0xe] }
  0xa6   : > { %v1292_v59 = vunpack.c.l.b16 %v1260_v52  ;;  %v961_v5 = vrot.slane %v959_v60, 5  ;;  %v965_v7 = vrot.slane %v963_v61, 4  ;;  %v2399_v11 = vrot.slane %v2397_v56, 4  ;;  %v5732_v49 = vld [vmem:[#allocation2 + $0xc] sm:$0xff]  ;;  %v5389_v51 = vld [vmem:[#allocation2 + $0x18] sm:$0xf] }
  0xa7   : > { %v957_v63 = vrot.slane %v956_v55, 4  ;;  %5224 = vmatmul.msk.bf16.vlgmr.msrb.gmra.mxu1 %vm1309_vm12, %v5731_v46  ;;  %v2402_v12 = vrot.slane %v2400_v57, 5  ;;  %v971_v4 = vrot.slane %v969_v62, 5  ;;  %v4219_v17 = vsel %vm1358_vm0, %v5661_v1, 0  ;;  %v5390_v55 = vld [vmem:[#allocation2 + $0x1c] sm:$0xf] }
  0xa8   : > { %v1308_v2 = vpack.c.b16 %v1292_v59, %v1291_v47  ;;  %v966_v16 = vor.u32 %v965_v7, %v961_v5  ;;  %v2408_v19 = vrot.slane %v2406_v0, 5  ;;  %v2412_v21 = vrot.slane %v2410_v58, 4  ;;  %4228 = vmatpush.bf16.msra.mxu3 %v4219_v17  ;;  %v5747_v59 = vld [vmem:[#allocation2 + $0xc] sm:$0xff] }
  0xa9   : > { %v962_v15 = vsel %vm6152_vm13, %v957_v63, %v961_v5  ;;  %v3275_v24 = vsel %vm1358_vm0, %v5467_v14, 0  ;;  %v1868_v27 = vpack.c.b16 %v1837_v10, %v1836_v9  ;;  %v4617_v28 = vsel %vm1358_vm0, %v5694_v18, 0  ;;  %v5391_v18 = vld [vmem:[#allocation2 + $0x20] sm:$0x1] }
  0xaa   : > { %5159 = vmatmul.msk.bf16.gmra.mxu3 %vm1309_vm12, %v1308_v2  ;;  %v967_v22 = vrot.slane %v966_v16, 4  ;;  %v1267_v26 = vunpack.c.l.b16 %v962_v15  ;;  %3284 = vmatpush.bf16.msra.mxu1 %v3275_v24  ;;  %v2403_v31 = vor.u32 %v2402_v12, %v2399_v11  ;;  %v1733_v32 = vrot.slane %v6295_v8, 5  ;;  %v5392_v24 = vld [vmem:[#allocation2 + $0x24] sm:$0xf] }
  0xab   : > { %4626 = vmatpush.bf16.msra.mxu0 %v4617_v28  ;;  %v2413_v36 = vor.u32 %v2412_v21, %v2408_v19  ;;  %v2416_v37 = vshll.u32 %v5388_v23, 16  ;;  %v5242_v42 = vrot.slane %v1672_v30, 9  ;;  %v1736_v45 = vrot.slane %v6300_v13, 5 }
  0xac   : > { %v972_v29 = vsel %vm6152_vm13, %v967_v22, %v971_v4  ;;  %v2404_v41 = vrot.slane %v2403_v31, 4  ;;  %v1735_v44 = vrot.slane %v1733_v32, 4  ;;  %v1740_v8 = vrot.slane %v6363_v48, 5 }
  0xad   : > { %v1268_v34 = vunpack.c.l.b16 %v972_v29  ;;  %v2414_v46 = vrot.slane %v2413_v36, 4  ;;  %v2418_v47 = vrot.slane %v2416_v37, 5  ;;  %v5243_v52 = vrot.slane %v1673_v50, 9  ;;  %v5748_v36 = vld [vmem:[#allocation2 + $0x18] sm:$0xff] }
  0xae   : > { %v1742_v56 = vrot.slane %v1740_v8, 4  ;;  %v1743_v57 = vrot.slane %v6367_v54, 5  ;;  %v2409_v60 = vsel %vm6152_vm13, %v2404_v41, %v2408_v19  ;;  %v1734_v13 = vsel %vm6443_vm1, %v5242_v42, %v1733_v32 }
  0xaf   : > { %v1296_v40 = vpack.c.b16 %v1268_v34, %v1267_v26  ;;  %v1737_v61 = vsel %vm6443_vm1, %v1735_v44, %v1736_v45  ;;  %v1741_v62 = vsel %vm6443_vm1, %v5243_v52, %v1740_v8  ;;  %v2419_v48 = vsel %vm6152_vm13, %v2414_v46, %v2418_v47  ;;  %v5733_v26 = vld [vmem:[#allocation2 + $0x18] sm:$0xff]  ;;  %v5394_v45 = vld [vmem:[#allocation2 + $0x2c] sm:$0x1] }
  0xb0   : > { %v2421_v63 = vshrl.u32 %v5389_v51, 16  ;;  %v1744_v54 = vsel %vm6443_vm1, %v1742_v56, %v1743_v57  ;;  %v1840_v0 = vunpack.c.l.b16 %v1741_v62  ;;  %v2424_v58 = vshll.u32 %v5389_v51, 16  ;;  %v1674_v57 = vld [vmem:[#allocation2 + $0x24] sm:$0xe] }
  0xb1   : > { %5257 = vmatmul.msk.bf16.vlgmr.msrb.gmra.mxu2 %vm1309_vm12, %v1868_v27  ;;  %5147 = vmatmul.msk.bf16.gmra.mxu0 %vm1309_vm12, %v1296_v40  ;;  %v2430_v1 = vshll.u32 %v5390_v55, 16  ;;  %v2434_v2 = vshrl.u32 %v5390_v55, 16  ;;  %v1841_v5 = vunpack.c.l.b16 %v1744_v54  ;;  %v1838_v7 = vunpack.c.l.b16 %v1734_v13  ;;  %v5393_v27 = vld [vmem:[#allocation2 + $0x28] sm:$0xf]  ;;  %v5395_v54 = vld [vmem:[#allocation2 + $0x30] sm:$0xf] }
  0xb2   : > { %v1839_v9 = vunpack.c.l.b16 %v1737_v61  ;;  %v2780_v11 = vunpack.c.l.b16 %v2409_v60  ;;  %v2781_v12 = vunpack.c.l.b16 %v2419_v48  ;;  %v2423_v14 = vrot.slane %v2421_v63, 4  ;;  %v5734_v63 = vld [vmem:[#allocation2 + $0x24] sm:$0xff] }
  0xb3   : > { %v1870_v10 = vpack.c.b16 %v1841_v5, %v1840_v0  ;;  %v2426_v15 = vrot.slane %v2424_v58, 5  ;;  %v2432_v16 = vrot.slane %v2430_v1, 5  ;;  %v2436_v4 = vrot.slane %v2434_v2, 4  ;;  %v5396_v0 = vld [vmem:[#allocation2 + $0x34] sm:$0xf]  ;;  %v5749_v58 = vld [vmem:[#allocation2 + $0x24] sm:$0xff] }
  0xb4   : > { %v1869_v17 = vpack.c.b16 %v1839_v9, %v1838_v7  ;;  %v2812_v19 = vpack.c.b16 %v2781_v12, %v2780_v11  ;;  %v2440_v23 = vshll.u32 %v5391_v18, 16  ;;  %v2445_v32 = vshrl.u32 %v5392_v24, 16 }
  0xb5   : > { %v2427_v21 = vor.u32 %v2426_v15, %v2423_v14  ;;  %v2437_v22 = vor.u32 %v2436_v4, %v2432_v16  ;;  %v2448_v34 = vshll.u32 %v5392_v24, 16  ;;  %v2454_v37 = vshll.u32 %v5393_v27, 16 }
  0xb6   : > { %v2442_v31 = vrot.slane %v2440_v23, 5  ;;  %v2458_v30 = vshrl.u32 %v5393_v27, 16  ;;  %v2447_v42 = vrot.slane %v2445_v32, 4  ;;  %v2464_v51 = vshll.u32 %v5394_v45, 16  ;;  %v5939_v23 = vld [vmem:[#allocation2 + $0x34] sm:$0xf] }
  0xb7   : > { %5225 = vmatmul.msk.bf16.gmra.mxu1 %vm1309_vm12, %v5732_v49  ;;  %v2428_v28 = vrot.slane %v2427_v21, 4  ;;  %v2438_v29 = vrot.slane %v2437_v22, 4  ;;  %v2450_v44 = vrot.slane %v2448_v34, 5  ;;  %v2456_v46 = vrot.slane %v2454_v37, 5  ;;  %v5397_v21 = vld [vmem:[#allocation2 + $0x38] sm:$0x1] }
  0xb8   : > { %v2460_v47 = vrot.slane %v2458_v30, 4  ;;  %v1747_v55 = vrot.slane %v6457_v53, 5  ;;  %v2466_v60 = vrot.slane %v2464_v51, 5  ;;  %v5244_v61 = vrot.slane %v1674_v57, 9  ;;  %v5398_v45 = vld [vmem:[#allocation2 + $0x3c] sm:$0xf] }
  0xb9   : > { %v2433_v40 = vsel %vm6152_vm13, %v2428_v28, %v2432_v16  ;;  %v2443_v41 = vsel %vm6152_vm13, %v2438_v29, %v2442_v31  ;;  %v2451_v8 = vor.u32 %v2450_v44, %v2447_v42  ;;  %v1750_v48 = vrot.slane %v6449_v43, 5  ;;  %v6522_v16 = vpop.f32.mrf.mxu1  ;;  %v1675_v31 = vld [vmem:[#allocation2 + $0x30] sm:$0xe] }
  0xba   : > { %5370 = vmatmul.msk.bf16.vlgmr.msrb.gmra.mxu3 %vm1309_vm12, %v5747_v59  ;;  %v2782_v49 = vunpack.c.l.b16 %v2433_v40  ;;  %v2783_v50 = vunpack.c.l.b16 %v2443_v41  ;;  %v2461_v52 = vor.u32 %v2460_v47, %v2456_v46  ;;  %v1749_v62 = vrot.slane %v1747_v55, 4  ;;  %v5735_v42 = vld [vmem:[#allocation2 + $0x30] sm:$0xff] }
  0xbb   : > { %v2452_v59 = vrot.slane %v2451_v8, 4  ;;  %v1748_v2 = vsel %vm6443_vm1, %v5244_v61, %v1747_v55  ;;  %v2469_v43 = vshrl.u32 %v5395_v54, 16  ;;  %v2472_v7 = vshll.u32 %v5395_v54, 16  ;;  %v5750_v47 = vld [vmem:[#allocation2 + $0x30] sm:$0xff] }
  0xbc   : > { %v2813_v56 = vpack.c.b16 %v2783_v50, %v2782_v49  ;;  %v2462_v13 = vrot.slane %v2461_v52, 4  ;;  %v1751_v5 = vsel %vm6443_vm1, %v1749_v62, %v1750_v48  ;;  %v2478_v9 = vshll.u32 %v5396_v0, 16 }
  0xbd   : > { %v2457_v53 = vsel %vm6152_vm13, %v2452_v59, %v2456_v46  ;;  %v1842_v11 = vunpack.c.l.b16 %v1748_v2  ;;  %v1843_v12 = vunpack.c.l.b16 %v1751_v5  ;;  %v2471_v4 = vrot.slane %v2469_v43, 4  ;;  %v5399_v46 = vld [vmem:[#allocation2 + $0x40] sm:$0xf]  ;;  %v6537_v59 = vpop.f32.mrf.mxu2 }
  0xbe   : > { %v2467_v1 = vsel %vm6152_vm13, %v2462_v13, %v2466_v60  ;;  %v2784_v14 = vunpack.c.l.b16 %v2457_v53  ;;  %v2480_v18 = vrot.slane %v2478_v9, 5  ;;  %v1754_v24 = vrot.slane %v5939_v23, 5  ;;  %v5941_v2 = vld [vmem:[#allocation2 + $0x40] sm:$0xf] }
  0xbf   : > { %v2785_v15 = vunpack.c.l.b16 %v2467_v1  ;;  %v1871_v22 = vpack.c.b16 %v1843_v12, %v1842_v11  ;;  %v2488_v29 = vshll.u32 %v5397_v21, 16  ;;  %v5245_v32 = vrot.slane %v1675_v31, 9  ;;  %v5400_v1 = vld [vmem:[#allocation2 + $0x44] sm:$0x1]  ;;  %v6543_v12 = vpop.f32.mrf.mxu3  ;;  %v5736_v21 = vld [vmem:[#allocation2 + $0x3c] sm:$0xff] }
  0xc0   : > { %v1756_v34 = vrot.slane %v1754_v24, 4  ;;  %v2493_v52 = vshrl.u32 %v5398_v45, 16  ;;  %v2496_v55 = vshll.u32 %v5398_v45, 16  ;;  %v2506_v57 = vshrl.u32 %v5399_v46, 16  ;;  %v6548_v23 = vpop.f32.mrf.mxu0  ;;  %v5751_v31 = vld [vmem:[#allocation2 + $0x3c] sm:$0xff] }
  0xc1   : > { %5258 = vmatmul.msk.bf16.gmra.mxu2 %vm1309_vm12, %v1869_v17  ;;  %5435 = vmatmul.msk.bf16.vlgmr.msrb.gmra.mxu0 %vm1309_vm12, %v2812_v19  ;;  %v2474_v17 = vrot.slane %v2472_v7, 5  ;;  %v2490_v41 = vrot.slane %v2488_v29, 5  ;;  %v6526_v44 = vpop.f32.mrf.mxu1  ;;  %v1755_v49 = vsel %vm6443_vm1, %v5245_v32, %v1754_v24  ;;  %v1761_v5 = vrot.slane %v5941_v2, 5  ;;  %v1676_v7 = vld [vmem:[#allocation2 + $0x3c] sm:$0xe] }
  0xc2   : > { %v1844_v60 = vunpack.c.l.b16 %v1755_v49  ;;  %v2495_v48 = vrot.slane %v2493_v52, 4  ;;  %v2512_v11 = vshll.u32 %v5400_v1, 16  ;;  %v5403_v49 = vld [vmem:[#allocation2 + $0x50] sm:$0x1]  ;;  %vm5004_vm0 = vcmask 64512  }
  0xc3   : > { %v2475_v27 = vor.u32 %v2474_v17, %v2471_v4  ;;  %v1763_v4 = vrot.slane %v1761_v5, 4  ;;  %v5942_v17 = vld [vmem:[#allocation2 + $0x44] sm:$0x1] }
  0xc5   : > { %v2476_v30 = vrot.slane %v2475_v27, 4  ;;  %v2514_v27 = vrot.slane %v2512_v11, 5  ;;  %v5737_v11 = vld [vmem:[#allocation2 + $0x48] sm:$0xff] }
  0xc7   : > { %5226 = vmatmul.msk.bf16.gmra.mxu1 %vm1309_vm12, %v5733_v26  ;;  %v2814_v26 = vpack.c.b16 %v2785_v15, %v2784_v14  ;;  %v2481_v8 = vsel %vm6152_vm13, %v2476_v30, %v2480_v18  ;;  %v6545_v14 = vpop.f32.mrf.mxu2  ;;  %v5246_v15 = vrot.slane %v1676_v7, 9 }
  0xc8   : > { %v2786_v61 = vunpack.c.l.b16 %v2481_v8 }
  0xc9   : > { %v1762_v32 = vsel %vm6443_vm1, %v5246_v15, %v1761_v5  ;;  %v5404_v15 = vld [vmem:[#allocation2 + $0x54] sm:$0xf] }
  0xca   : > { %5371 = vmatmul.msk.bf16.gmra.mxu3 %vm1309_vm12, %v5748_v36  ;;  %v5940_v36 = vld [vmem:[#allocation2 + $0x38] sm:$0x1] }
  0xcb   : > { %v1757_v37 = vrot.slane %v5940_v36, 5 }
  0xcd   : > { %v1758_v50 = vsel %vm6443_vm1, %v1756_v34, %v1757_v37 }
  0xce   : > { %v1845_v13 = vunpack.c.l.b16 %v1758_v50 }
  0xd0   : > { %v1872_v53 = vpack.c.b16 %v1845_v13, %v1844_v60  ;;  %v2536_v13 = vshll.u32 %v5403_v49, 16  ;;  %v5406_v49 = vld [vmem:[#allocation2 + $0x5c] sm:$0x1] }
  0xd1   : > { %5259 = vmatmul.msk.bf16.gmra.mxu2 %vm1309_vm12, %v1870_v10  ;;  %5436 = vmatmul.msk.bf16.gmra.mxu0 %vm1309_vm12, %v2813_v56  ;;  %v2482_v10 = vshrl.u32 %v5396_v0, 16  ;;  %v2502_v56 = vshll.u32 %v5399_v46, 16  ;;  %v2508_v0 = vrot.slane %v2506_v57, 4 }
  0xd2   : > { %v2538_v2 = vrot.slane %v2536_v13, 5  ;;  %v2560_v13 = vshll.u32 %v5406_v49, 16 }
  0xd3   : > { %v2484_v19 = vrot.slane %v2482_v10, 4  ;;  %v2504_v54 = vrot.slane %v2502_v56, 5 }
  0xd5   : > { %v2485_v28 = vor.u32 %v2484_v19, %v2480_v18  ;;  %v2509_v10 = vor.u32 %v2508_v0, %v2504_v54  ;;  %v1764_v18 = vrot.slane %v5942_v17, 5  ;;  %v5401_v19 = vld [vmem:[#allocation2 + $0x48] sm:$0xf] }
  0xd6   : > { %v2520_v29 = vshll.u32 %v5401_v19, 16  ;;  %v1677_v0 = vld [vmem:[#allocation2 + $0x48] sm:$0xe] }
  0xd7   : > { %5227 = vmatmul.msk.bf16.gmra.mxu1 %vm1309_vm12, %v5734_v63  ;;  %v2486_v40 = vrot.slane %v2485_v28, 4  ;;  %v2498_v63 = vrot.slane %v2496_v55, 5  ;;  %v2517_v28 = vshrl.u32 %v5401_v19, 16  ;;  %v1765_v34 = vsel %vm6443_vm1, %v1763_v4, %v1764_v18  ;;  %v6562_v55 = vpop.f32.mrf.mxu3  ;;  %v5405_v4 = vld [vmem:[#allocation2 + $0x58] sm:$0xf]  ;;  %v5752_v18 = vld [vmem:[#allocation2 + $0x48] sm:$0xff] }
  0xd8   : > { %v1847_v45 = vunpack.c.l.b16 %v1765_v34 }
  0xd9   : > { %v2491_v51 = vsel %vm6152_vm13, %v2486_v40, %v2490_v41  ;;  %v2499_v9 = vor.u32 %v2498_v63, %v2495_v48  ;;  %v2519_v46 = vrot.slane %v2517_v28, 4  ;;  %v5943_v48 = vld [vmem:[#allocation2 + $0x4c] sm:$0xf]  ;;  %v2544_v28 = vshll.u32 %v5404_v15, 16 }
  0xda   : > { %5372 = vmatmul.msk.bf16.gmra.mxu3 %vm1309_vm12, %v5749_v58  ;;  %v2787_v62 = vunpack.c.l.b16 %v2491_v51  ;;  %v6540_v58 = vpop.f32.mrf.mxu1  ;;  %v6564_v56 = vpop.f32.mrf.mxu2  ;;  %v1768_v63 = vrot.slane %v5943_v48, 5 }
  0xdb   : > { %v2500_v24 = vrot.slane %v2499_v9, 4  ;;  %v5944_v9 = vld [vmem:[#allocation2 + $0x50] sm:$0x1] }
  0xdc   : > { %v2815_v43 = vpack.c.b16 %v2787_v62, %v2786_v61  ;;  %v6566_v61 = vpop.f32.mrf.mxu0  ;;  %v1770_v7 = vrot.slane %v1768_v63, 4 }
  0xdd   : > { %v2505_v40 = vsel %vm6152_vm13, %v2500_v24, %v2504_v54 }
  0xde   : > { %v2788_v51 = vunpack.c.l.b16 %v2505_v40 }
  0xe1   : > { %5260 = vmatmul.msk.bf16.gmra.mxu2 %vm1309_vm12, %v1871_v22  ;;  %5437 = vmatmul.msk.bf16.gmra.mxu0 %vm1309_vm12, %v2814_v26  ;;  %v5402_v22 = vld [vmem:[#allocation2 + $0x4c] sm:$0xf]  ;;  %v2510_v26 = vrot.slane %v2509_v10, 4  ;;  %v1771_v10 = vrot.slane %v5944_v9, 5  ;;  %v6572_v17 = vpop.f32.mrf.mxu3  ;;  %v5407_v9 = vld [vmem:[#allocation2 + $0x60] sm:$0xf] }
  0xe2   : > { %v2526_v36 = vshll.u32 %v5402_v22, 16  ;;  %v2530_v37 = vshrl.u32 %v5402_v22, 16  ;;  %v6554_v30 = vpop.f32.mrf.mxu1  ;;  %v6578_v22 = vpop.f32.mrf.mxu2 }
  0xe3   : > { %v2515_v41 = vsel %vm6152_vm13, %v2510_v26, %v2514_v27  ;;  %v1772_v26 = vsel %vm6443_vm1, %v1770_v7, %v1771_v10  ;;  %v2541_v27 = vshrl.u32 %v5404_v15, 16  ;;  %v5408_v10 = vld [vmem:[#allocation2 + $0x64] sm:$0xf] }
  0xe4   : > { %v2528_v50 = vrot.slane %v2526_v36, 5  ;;  %v2532_v8 = vrot.slane %v2530_v37, 4  ;;  %v2789_v52 = vunpack.c.l.b16 %v2515_v41  ;;  %v1849_v36 = vunpack.c.l.b16 %v1772_v26 }
  0xe5   : > { %v2578_v26 = vshrl.u32 %v5408_v10, 16 }
  0xe6   : > { %v2533_v62 = vor.u32 %v2532_v8, %v2528_v50  ;;  %v2816_v54 = vpack.c.b16 %v2789_v52, %v2788_v51  ;;  %v1775_v8 = vrot.slane %v6387_v33, 5 }
  0xe7   : > { %5228 = vmatmul.msk.bf16.gmra.mxu1 %vm1309_vm12, %v5735_v42  ;;  %v1846_v42 = vunpack.c.l.b16 %v1762_v32 }
  0xe8   : > { %v2534_v5 = vrot.slane %v2533_v62, 4  ;;  %v1678_v62 = vld [vmem:[#allocation2 + $0x54] sm:$0xe] }
  0xe9   : > { %v1873_v57 = vpack.c.b16 %v1847_v45, %v1846_v42  ;;  %v2543_v42 = vrot.slane %v2541_v27, 4  ;;  %v2546_v45 = vrot.slane %v2544_v28, 5  ;;  %v6591_v52 = vpop.f32.mrf.mxu3 }
  0xea   : > { %5373 = vmatmul.msk.bf16.gmra.mxu3 %vm1309_vm12, %v5750_v47  ;;  %v2522_v47 = vrot.slane %v2520_v29, 5  ;;  %v2550_v29 = vshll.u32 %v5405_v4, 16 }
  0xeb   : > { %v6585_v32 = vpop.f32.mrf.mxu0 }
  0xec   : > { %v2523_v60 = vor.u32 %v2522_v47, %v2519_v46  ;;  %v2552_v46 = vrot.slane %v2550_v29, 5 }
  0xee   : > { %v2524_v1 = vrot.slane %v2523_v60, 4 }
  0xf0   : > { %v2529_v19 = vsel %vm6152_vm13, %v2524_v1, %v2528_v50  ;;  %v1778_v1 = vrot.slane %v6390_v38, 5 }
  0xf1   : > { %5261 = vmatmul.msk.bf16.gmra.mxu2 %vm1309_vm12, %v1872_v53  ;;  %5438 = vmatmul.msk.bf16.gmra.mxu0 %vm1309_vm12, %v2815_v43  ;;  %v5247_v43 = vrot.slane %v1677_v0, 9  ;;  %v2790_v37 = vunpack.c.l.b16 %v2529_v19  ;;  %v1777_v0 = vrot.slane %v1775_v8, 4  ;;  %v2565_v19 = vshrl.u32 %v5407_v9, 16 }
  0xf2   : > { %v6568_v53 = vpop.f32.mrf.mxu1 }
  0xf3   : > { %v1769_v24 = vsel %vm6443_vm1, %v5247_v43, %v1768_v63  ;;  %v6596_v63 = vpop.f32.mrf.mxu0  ;;  %v5738_v43 = vld [vmem:[#allocation2 + $0x54] sm:$0xff] }
  0xf4   : > { %v1848_v34 = vunpack.c.l.b16 %v1769_v24  ;;  %v2574_v24 = vshll.u32 %v5408_v10, 16 }
  0xf6   : > { %v1874_v50 = vpack.c.b16 %v1849_v36, %v1848_v34 }
  0xf7   : > { %5229 = vmatmul.msk.bf16.gmra.mxu1 %vm1309_vm12, %v5736_v21  ;;  %v2539_v21 = vsel %vm6152_vm13, %v2534_v5, %v2538_v2  ;;  %v2562_v5 = vrot.slane %v2560_v13, 5 }
  0xf8   : > { %v2791_v40 = vunpack.c.l.b16 %v2539_v21  ;;  %v2568_v21 = vshll.u32 %v5407_v9, 16 }
  0xfa   : > { %5374 = vmatmul.msk.bf16.gmra.mxu3 %vm1309_vm12, %v5751_v31  ;;  %v2554_v31 = vshrl.u32 %v5405_v4, 16  ;;  %v6588_v41 = vpop.f32.mrf.mxu1  ;;  %v2817_v51 = vpack.c.b16 %v2791_v40, %v2790_v37  ;;  %v1779_v4 = vsel %vm6443_vm1, %v1777_v0, %v1778_v1  ;;  %v2567_v40 = vrot.slane %v2565_v19, 4  ;;  %v5946_v0 = vld [vmem:[#allocation2 + $0x68] sm:$0x1] }
  0xfb   : > { %v1851_v29 = vunpack.c.l.b16 %v1779_v4  ;;  %v1785_v1 = vrot.slane %v5946_v0, 5 }
  0xfc   : > { %v2556_v47 = vrot.slane %v2554_v31, 4 }
  0xfe   : > { %v2557_v60 = vor.u32 %v2556_v47, %v2552_v46  ;;  %v6593_v48 = vpop.f32.mrf.mxu2 }
 0x100   : > { %v2558_v2 = vrot.slane %v2557_v60, 4  ;;  %v1679_v60 = vld [vmem:[#allocation2 + $0x60] sm:$0xe] }
 0x101   : > { %5262 = vmatmul.msk.bf16.gmra.mxu2 %vm1309_vm12, %v1873_v57  ;;  %5439 = vmatmul.msk.bf16.gmra.mxu0 %vm1309_vm12, %v2816_v54  ;;  %v2547_v57 = vor.u32 %v2546_v45, %v2543_v42  ;;  %v5248_v54 = vrot.slane %v1678_v62, 9  ;;  %v2570_v42 = vrot.slane %v2568_v21, 5  ;;  %v2576_v45 = vrot.slane %v2574_v24, 5  ;;  %v5754_v21 = vld [vmem:[#allocation2 + $0x60] sm:$0xff] }
 0x103   : > { %v2548_v33 = vrot.slane %v2547_v57, 4  ;;  %v1776_v15 = vsel %vm6443_vm1, %v5248_v54, %v1775_v8  ;;  %v5945_v8 = vld [vmem:[#allocation2 + $0x64] sm:$0xf]  ;;  %v2571_v13 = vor.u32 %v2570_v42, %v2567_v40 }
 0x104   : > { %v1850_v28 = vunpack.c.l.b16 %v1776_v15 }
 0x105   : > { %v2553_v38 = vsel %vm6152_vm13, %v2548_v33, %v2552_v46  ;;  %v2580_v46 = vrot.slane %v2578_v26, 4  ;;  %v5249_v33 = vrot.slane %v1679_v60, 9  ;;  %v2572_v9 = vrot.slane %v2571_v13, 4 }
 0x106   : > { %v6614_v31 = vpop.f32.mrf.mxu2  ;;  %v2792_v34 = vunpack.c.l.b16 %v2553_v38  ;;  %v1875_v49 = vpack.c.b16 %v1851_v29, %v1850_v28  ;;  %v5410_v38 = vld [vmem:[#allocation2 + $0x6c] sm:$0xf] }
 0x107   : > { %5230 = vmatmul.msk.bf16.gmra.mxu1 %vm1309_vm12, %v5737_v11  ;;  %v5753_v11 = vld [vmem:[#allocation2 + $0x54] sm:$0xff]  ;;  %v6611_v27 = vpop.f32.mrf.mxu3  ;;  %v2581_v62 = vor.u32 %v2580_v46, %v2576_v45  ;;  %v2589_v28 = vshrl.u32 %v5410_v38, 16  ;;  %v2592_v29 = vshll.u32 %v5410_v38, 16 }
 0x108   : > { %7630 = vst [vmem:[#allocation3_spill] sm:$0xff] %v6611_v27 }
 0x109   : > { %v2582_v10 = vrot.slane %v2581_v62, 4 }
 0x10a   : > { %5375 = vmatmul.msk.bf16.gmra.mxu3 %vm1309_vm12, %v5752_v18  ;;  %v2563_v18 = vsel %vm6152_vm13, %v2558_v2, %v2562_v5 }
 0x10b   : > { %v2793_v36 = vunpack.c.l.b16 %v2563_v18  ;;  %v5411_v18 = vld [vmem:[#allocation2 + $0x70] sm:$0xf] }
 0x10c   : > { %v6616_v37 = vpop.f32.mrf.mxu0  ;;  %v2598_v40 = vshll.u32 %v5411_v18, 16  ;;  %v2602_v42 = vshrl.u32 %v5411_v18, 16 }
 0x10d   : > { %v2818_v57 = vpack.c.b16 %v2793_v36, %v2792_v34  ;;  %v2577_v34 = vsel %vm6152_vm13, %v2572_v9, %v2576_v45 }
 0x10e   : > { %v2600_v13 = vrot.slane %v2598_v40, 5  ;;  %v2604_v62 = vrot.slane %v2602_v42, 4  ;;  %v5740_v40 = vld [vmem:[#allocation2 + $0x6c] sm:$0xff] }
 0x10f   : > { %v6622_v5 = vpop.f32.mrf.mxu3 }
 0x110   : > { %7631 = vst [vmem:[#allocation4_spill] sm:$0xff] %v6622_v5  ;;  %v2605_v38 = vor.u32 %v2604_v62, %v2600_v13 }
 0x111   : > { %5263 = vmatmul.msk.bf16.gmra.mxu2 %vm1309_vm12, %v1874_v50  ;;  %5440 = vmatmul.msk.bf16.gmra.mxu0 %vm1309_vm12, %v2817_v51  ;;  %v5409_v50 = vld [vmem:[#allocation2 + $0x68] sm:$0x1]  ;;  %v1782_v51 = vrot.slane %v5945_v8, 5 }
 0x112   : > { %v2584_v54 = vshll.u32 %v5409_v50, 16  ;;  %v2794_v50 = vunpack.c.l.b16 %v2577_v34  ;;  %v2606_v42 = vrot.slane %v2605_v38, 4 }
 0x113   : > { %v1784_v2 = vrot.slane %v1782_v51, 4  ;;  %v1783_v24 = vsel %vm6443_vm1, %v5249_v33, %v1782_v51  ;;  %v2591_v51 = vrot.slane %v2589_v28, 4  ;;  %v5947_v33 = vld [vmem:[#allocation2 + $0x70] sm:$0xf] }
 0x114   : > { %v6600_v7 = vpop.f32.mrf.mxu1  ;;  %v6626_v19 = vpop.f32.mrf.mxu0  ;;  %v1852_v46 = vunpack.c.l.b16 %v1783_v24 }
 0x115   : > { %v1786_v26 = vsel %vm6443_vm1, %v1784_v2, %v1785_v1  ;;  %v5412_v1 = vld [vmem:[#allocation2 + $0x74] sm:$0x1]  ;;  %v1789_v2 = vrot.slane %v5947_v33, 5 }
 0x116   : > { %v2608_v18 = vshll.u32 %v5412_v1, 16  ;;  %v5755_v1 = vld [vmem:[#allocation2 + $0x6c] sm:$0xff] }
 0x117   : > { %5231 = vmatmul.msk.bf16.gmra.mxu1 %vm1309_vm12, %v5738_v43  ;;  %v5739_v43 = vld [vmem:[#allocation2 + $0x60] sm:$0xff]  ;;  %v1791_v28 = vrot.slane %v1789_v2, 4 }
 0x11a   : > { %5376 = vmatmul.msk.bf16.gmra.mxu3 %vm1309_vm12, %v5753_v11  ;;  %v2586_v11 = vrot.slane %v2584_v54, 5 }
 0x11c   : > { %v6618_v47 = vpop.f32.mrf.mxu1  ;;  %v2587_v36 = vsel %vm6152_vm13, %v2582_v10, %v2586_v11  ;;  %v1680_v10 = vld [vmem:[#allocation2 + $0x6c] sm:$0xe] }
 0x11d   : > { %v2795_v8 = vunpack.c.l.b16 %v2587_v36 }
 0x121   : > { %5264 = vmatmul.msk.bf16.gmra.mxu2 %vm1309_vm12, %v1875_v49  ;;  %5441 = vmatmul.msk.bf16.gmra.mxu0 %vm1309_vm12, %v2818_v57  ;;  %v1853_v49 = vunpack.c.l.b16 %v1786_v26  ;;  %v2594_v57 = vrot.slane %v2592_v29, 5  ;;  %v5250_v26 = vrot.slane %v1680_v10, 9  ;;  %v5413_v29 = vld [vmem:[#allocation2 + $0x78] sm:$0xf] }
 0x122   : > { %v2613_v62 = vshrl.u32 %v5413_v29, 16 }
 0x123   : > { %v1876_v45 = vpack.c.b16 %v1853_v49, %v1852_v46  ;;  %v2595_v9 = vor.u32 %v2594_v57, %v2591_v51  ;;  %v2610_v46 = vrot.slane %v2608_v18, 5  ;;  %v1790_v33 = vsel %vm6443_vm1, %v5250_v26, %v1789_v2 }
 0x124   : > { %v6624_v15 = vpop.f32.mrf.mxu2  ;;  %v1591_v4 = vpop.f32.mrf.mxu1  ;;  %v1854_v18 = vunpack.c.l.b16 %v1790_v33 }
 0x125   : > { %v1592_v34 = vadd.f32 %v1591_v4, %v6548_v23  ;;  %v2596_v36 = vrot.slane %v2595_v9, 4  ;;  %v2611_v38 = vsel %vm6152_vm13, %v2606_v42, %v2610_v46  ;;  %v5949_v46 = vld [vmem:[#allocation2 + $0x7c] sm:$0xf] }
 0x126   : > { %v1796_v33 = vrot.slane %v5949_v46, 5 }
 0x127   : > { %5232 = vmatmul.msk.bf16.gmra.mxu1 %vm1309_vm12, %v5739_v43  ;;  %v2819_v43 = vpack.c.b16 %v2795_v8, %v2794_v50  ;;  %v5414_v8 = vld [vmem:[#allocation2 + $0x7c] sm:$0xf]  ;;  %v2601_v23 = vsel %vm6152_vm13, %v2596_v36, %v2600_v13 }
 0x128   : > { %v2622_v4 = vshll.u32 %v5414_v8, 16  ;;  %v2626_v9 = vshrl.u32 %v5414_v8, 16  ;;  %v2796_v2 = vunpack.c.l.b16 %v2601_v23  ;;  %v1798_v27 = vrot.slane %v1796_v33, 4 }
 0x12a   : > { %5377 = vmatmul.msk.bf16.gmra.mxu3 %vm1309_vm12, %v5754_v21  ;;  %v5948_v21 = vld [vmem:[#allocation2 + $0x74] sm:$0x1]  ;;  %v2624_v13 = vrot.slane %v2622_v4, 5  ;;  %v5950_v4 = vld [vmem:[#allocation2 + $0x80] sm:$0x1] }
 0x12b   : > { %v1792_v24 = vrot.slane %v5948_v21, 5 }
 0x12c   : > { %v6638_v60 = vpop.f32.mrf.mxu2  ;;  %v1593_v54 = vpop.f32.mrf.mxu1 }
 0x12d   : > { %v6640_v0 = vpop.f32.mrf.mxu3  ;;  %v1594_v26 = vadd.f32 %v1593_v54, %v6566_v61 }
 0x12e   : > { %7632 = vst [vmem:[#allocation5_spill] sm:$0xff] %v6640_v0  ;;  %v6642_v11 = vpop.f32.mrf.mxu0 }
 0x131   : > { %5265 = vmatmul.msk.bf16.gmra.mxu2 %vm1309_vm12, %v1876_v45  ;;  %5442 = vmatmul.msk.bf16.gmra.mxu0 %vm1309_vm12, %v2819_v43  ;;  %v2616_v45 = vshll.u32 %v5413_v29, 16  ;;  %v1793_v43 = vsel %vm6443_vm1, %v1791_v28, %v1792_v24  ;;  %v2615_v29 = vrot.slane %v2613_v62, 4  ;;  %v2797_v24 = vunpack.c.l.b16 %v2611_v38 }
 0x132   : > { %v1855_v21 = vunpack.c.l.b16 %v1793_v43  ;;  %v2628_v28 = vrot.slane %v2626_v9, 4  ;;  %v1799_v9 = vrot.slane %v5950_v4, 5 }
 0x133   : > { %v2820_v62 = vpack.c.b16 %v2797_v24, %v2796_v2 }
 0x134   : > { %v1944_v49 = vpop.f32.mrf.mxu2  ;;  %v1596_v50 = vpop.f32.mrf.mxu1  ;;  %v1877_v0 = vpack.c.b16 %v1855_v21, %v1854_v18 }
 0x135   : > { %v6647_v51 = vpop.f32.mrf.mxu3  ;;  %v2024_v57 = vadd.f32 %v1944_v49, %v1592_v34  ;;  %v2618_v34 = vrot.slane %v2616_v45, 5  ;;  %v2629_v45 = vor.u32 %v2628_v28, %v2624_v13 }
 0x136   : > { %7633 = vst [vmem:[#allocation6_spill] sm:$0xff] %v6647_v51  ;;  %v6656_v10 = vpop.f32.mrf.mxu0 }
 0x137   : > { %5233 = vmatmul.msk.bf16.gmra.mxu1 %vm1309_vm12, %v5740_v40  ;;  %v5415_v40 = vld [vmem:[#allocation2 + $0x80] sm:$0x1]  ;;  %v2619_v5 = vor.u32 %v2618_v34, %v2615_v29  ;;  %v2630_v18 = vrot.slane %v2629_v45, 4  ;;  %v5741_v29 = vld [vmem:[#allocation2 + $0x78] sm:$0xff]  ;;  %v5416_v34 = vld [vmem:[#allocation2 + $0x84] sm:$0xf] }
 0x138   : > { %v2632_v43 = vshll.u32 %v5415_v40, 16 }
 0x139   : > { %v2620_v61 = vrot.slane %v2619_v5, 4 }
 0x13a   : > { %5378 = vmatmul.msk.bf16.gmra.mxu3 %vm1309_vm12, %v5755_v1  ;;  %v1681_v1 = vld [vmem:[#allocation2 + $0x78] sm:$0xe]  ;;  %v2634_v21 = vrot.slane %v2632_v43, 5 }
 0x13b   : > { %v5251_v38 = vrot.slane %v1681_v1, 9  ;;  %v2625_v5 = vsel %vm6152_vm13, %v2620_v61, %v2624_v13 }
 0x13c   : > { %v1946_v36 = vpop.f32.mrf.mxu2  ;;  %v1598_v49 = vpop.f32.mrf.mxu1  ;;  %v2635_v46 = vsel %vm6152_vm13, %v2630_v18, %v2634_v21  ;;  %v5418_v18 = vld [vmem:[#allocation2 + $0x8c] sm:$0x1] }
 0x13d   : > { %v2234_v8 = vpop.f32.mrf.mxu3  ;;  %v2025_v51 = vadd.f32 %v1946_v36, %v1594_v26  ;;  %v5417_v26 = vld [vmem:[#allocation2 + $0x88] sm:$0xf] }
 0x13e   : > { %v2314_v42 = vadd.f32 %v2234_v8, %v2024_v57  ;;  %v2888_v23 = vpop.f32.mrf.mxu0  ;;  %v1597_v57 = vadd.f32 %v1596_v50, %v6585_v32  ;;  %v5756_v8 = vld [vmem:[#allocation2 + $0x78] sm:$0xff]  ;;  %v1800_v32 = vsel %vm6443_vm1, %v1798_v27, %v1799_v9  ;;  %v2637_v50 = vshrl.u32 %v5416_v34, 16 }
 0x13f   : > { %v2646_v45 = vshll.u32 %v5417_v26, 16  ;;  %v2650_v13 = vshrl.u32 %v5417_v26, 16  ;;  %v1599_v27 = vadd.f32 %v1598_v49, %v6596_v63 }
 0x140   : > { %v6663_v54 = vadd.f32 %v2888_v23, %v2314_v42  ;;  %v1797_v42 = vsel %vm6443_vm1, %v5251_v38, %v1796_v33  ;;  %v2798_v33 = vunpack.c.l.b16 %v2625_v5  ;;  %v2799_v23 = vunpack.c.l.b16 %v2635_v46  ;;  %v5952_v46 = vld [vmem:[#allocation2 + $0x8c] sm:$0x1] }
 0x141   : > { %5266 = vmatmul.msk.bf16.gmra.mxu2 %vm1309_vm12, %v1877_v0  ;;  %5443 = vmatmul.msk.bf16.gmra.mxu0 %vm1309_vm12, %v2820_v62  ;;  %v2640_v62 = vshll.u32 %v5416_v34, 16  ;;  %v1856_v1 = vunpack.c.l.b16 %v1797_v42  ;;  %v2639_v61 = vrot.slane %v2637_v50, 4  ;;  %v2648_v9 = vrot.slane %v2646_v45, 5  ;;  %v1682_v50 = vld [vmem:[#allocation2 + $0x84] sm:$0xe] }
 0x142   : > { %v2652_v38 = vrot.slane %v2650_v13, 4  ;;  %v5252_v45 = vrot.slane %v1682_v50, 9 }
 0x143   : > { %v2642_v4 = vrot.slane %v2640_v62, 5  ;;  %v1806_v62 = vrot.slane %v5952_v46, 5 }
 0x144   : > { %v1949_v2 = vpop.f32.mrf.mxu2  ;;  %v1601_v24 = vpop.f32.mrf.mxu1  ;;  %v2653_v42 = vor.u32 %v2652_v38, %v2648_v9  ;;  %v5420_v38 = vld [vmem:[#allocation2 + $0x94] sm:$0xf] }
 0x145   : > { %v2236_v28 = vpop.f32.mrf.mxu3  ;;  %v2026_v0 = vadd.f32 %v1949_v2, %v1597_v57  ;;  %v1602_v36 = vadd.f32 %v1601_v24, %v6616_v37  ;;  %v1857_v37 = vunpack.c.l.b16 %v1800_v32  ;;  %v2643_v5 = vor.u32 %v2642_v4, %v2639_v61  ;;  %v5419_v4 = vld [vmem:[#allocation2 + $0x90] sm:$0xf] }
 0x146   : > { %v2315_v40 = vadd.f32 %v2236_v28, %v2025_v51  ;;  %v2890_v43 = vpop.f32.mrf.mxu0  ;;  %v5951_v28 = vld [vmem:[#allocation2 + $0x88] sm:$0xf]  ;;  %v2656_v32 = vshll.u32 %v5418_v18, 16 }
 0x147   : > { %5234 = vmatmul.msk.bf16.gmra.mxu1 %vm1309_vm12, %v5741_v29  ;;  %v1878_v2 = vpack.c.b16 %v1857_v37, %v1856_v1  ;;  %v5742_v1 = vld [vmem:[#allocation2 + $0x84] sm:$0xff] }
 0x148   : > { %v6677_v51 = vadd.f32 %v2890_v43, %v2315_v40  ;;  %v1803_v40 = vrot.slane %v5951_v28, 5  ;;  %v2658_v43 = vrot.slane %v2656_v32, 5  ;;  %v5757_v18 = vld [vmem:[#allocation2 + $0x84] sm:$0xff]  ;;  %v2664_v28 = vshll.u32 %v5419_v4, 16 }
 0x14a   : > { %5379 = vmatmul.msk.bf16.gmra.mxu3 %vm1309_vm12, %v5756_v8  ;;  %v2821_v8 = vpack.c.b16 %v2799_v23, %v2798_v33  ;;  %v1805_v13 = vrot.slane %v1803_v40, 4  ;;  %v2666_v46 = vrot.slane %v2664_v28, 5 }
 0x14c   : > { %v1951_v57 = vpop.f32.mrf.mxu2  ;;  %v1603_v21 = vpop.f32.mrf.mxu1 }
 0x14d   : > { %v2239_v29 = vpop.f32.mrf.mxu3  ;;  %v2027_v34 = vadd.f32 %v1951_v57, %v1599_v27  ;;  %v1604_v24 = vadd.f32 %v1603_v21, %v6626_v19  ;;  %v2644_v19 = vrot.slane %v2643_v5, 4  ;;  %v1804_v21 = vsel %vm6443_vm1, %v5252_v45, %v1803_v40 }
 0x14e   : > { %v2316_v26 = vadd.f32 %v2239_v29, %v2026_v0  ;;  %v2893_v63 = vpop.f32.mrf.mxu0  ;;  %v2654_v0 = vrot.slane %v2653_v42, 4  ;;  %v1807_v29 = vsel %vm6443_vm1, %v1805_v13, %v1806_v62  ;;  %v1858_v5 = vunpack.c.l.b16 %v1804_v21 }
 0x14f   : > { %v1859_v42 = vunpack.c.l.b16 %v1807_v29 }
 0x150   : > { %v6683_v49 = vadd.f32 %v2893_v63, %v2316_v26  ;;  %v2659_v26 = vsel %vm6152_vm13, %v2654_v0, %v2658_v43 }
 0x151   : > { %5267 = vmatmul.msk.bf16.gmra.mxu2 %vm1309_vm12, %v1878_v2  ;;  %5444 = vmatmul.msk.bf16.gmra.mxu0 %vm1309_vm12, %v2821_v8  ;;  %v2649_v2 = vsel %vm6152_vm13, %v2644_v19, %v2648_v9  ;;  %v2670_v8 = vshll.u32 %v5420_v38, 16  ;;  %v2801_v50 = vunpack.c.l.b16 %v2659_v26  ;;  %v1879_v43 = vpack.c.b16 %v1859_v42, %v1858_v5 }
 0x152   : > { %v2800_v40 = vunpack.c.l.b16 %v2649_v2 }
 0x153   : > { %v2672_v62 = vrot.slane %v2670_v8, 5  ;;  %v5422_v8 = vld [vmem:[#allocation2 + $0x9c] sm:$0xf] }
 0x154   : > { %v1954_v37 = vpop.f32.mrf.mxu2  ;;  %v1606_v33 = vpop.f32.mrf.mxu1 }
 0x155   : > { %v2241_v23 = vpop.f32.mrf.mxu3  ;;  %v2028_v61 = vadd.f32 %v1954_v37, %v1602_v36  ;;  %v1607_v27 = vadd.f32 %v1606_v33, %v6642_v11  ;;  %v2661_v11 = vshrl.u32 %v5419_v4, 16 }
 0x156   : > { %v2317_v57 = vadd.f32 %v2241_v23, %v2027_v34  ;;  %v2895_v36 = vpop.f32.mrf.mxu0  ;;  %v2674_v34 = vshrl.u32 %v5420_v38, 16  ;;  %v5953_v23 = vld [vmem:[#allocation2 + $0x94] sm:$0xf]  ;;  %v2822_v38 = vpack.c.b16 %v2801_v50, %v2800_v40  ;;  %v5423_v50 = vld [vmem:[#allocation2 + $0xa0] sm:$0xf] }
 0x157   : > { %5235 = vmatmul.msk.bf16.gmra.mxu1 %vm1309_vm12, %v5742_v1  ;;  %v2663_v9 = vrot.slane %v2661_v11, 4  ;;  %v5421_v1 = vld [vmem:[#allocation2 + $0x98] sm:$0x1]  ;;  %v1810_v4 = vrot.slane %v5953_v23, 5  ;;  %v2698_v23 = vshrl.u32 %v5423_v50, 16 }
 0x158   : > { %v6696_v32 = vadd.f32 %v2895_v36, %v2317_v57  ;;  %v2676_v45 = vrot.slane %v2674_v34, 4  ;;  %v1683_v57 = vld [vmem:[#allocation2 + $0x90] sm:$0xe]  ;;  %v2680_v2 = vshll.u32 %v5421_v1, 16  ;;  %v5954_v36 = vld [vmem:[#allocation2 + $0x98] sm:$0x1] }
 0x159   : > { %v2667_v21 = vor.u32 %v2666_v46, %v2663_v9  ;;  %v1813_v11 = vrot.slane %v5954_v36, 5  ;;  %v1812_v28 = vrot.slane %v1810_v4, 4  ;;  %v2685_v46 = vshrl.u32 %v5422_v8, 16 }
 0x15a   : > { %5380 = vmatmul.msk.bf16.gmra.mxu3 %vm1309_vm12, %v5757_v18  ;;  %v2677_v29 = vor.u32 %v2676_v45, %v2672_v62  ;;  %v2682_v5 = vrot.slane %v2680_v2, 5  ;;  %v2688_v1 = vshll.u32 %v5422_v8, 16 }
 0x15c   : > { %v1956_v63 = vpop.f32.mrf.mxu2  ;;  %v1608_v13 = vpop.f32.mrf.mxu1  ;;  %v2678_v34 = vrot.slane %v2677_v29, 4  ;;  %v2690_v29 = vrot.slane %v2688_v1, 5  ;;  %v5956_v1 = vld [vmem:[#allocation2 + $0xa4] sm:$0x1] }
 0x15d   : > { %v2244_v19 = vpop.f32.mrf.mxu3  ;;  %v2029_v0 = vadd.f32 %v1956_v63, %v1604_v24  ;;  %v1609_v37 = vadd.f32 %v1608_v13, %v6656_v10  ;;  %v5253_v24 = vrot.slane %v1683_v57, 9  ;;  %v5743_v10 = vld [vmem:[#allocation2 + $0x90] sm:$0xff] }
 0x15e   : > { %v2318_v33 = vadd.f32 %v2244_v19, %v2028_v61  ;;  %v2898_v18 = vpop.f32.mrf.mxu0  ;;  %v2668_v61 = vrot.slane %v2667_v21, 4  ;;  %v5758_v13 = vld [vmem:[#allocation2 + $0x90] sm:$0xff] }
 0x15f   : > { %v1811_v19 = vsel %vm6443_vm1, %v5253_v24, %v1810_v4  ;;  %v2687_v4 = vrot.slane %v2685_v46, 4 }
 0x160   : > { %v6701_v26 = vadd.f32 %v2898_v18, %v2318_v33  ;;  %v2694_v33 = vshll.u32 %v5423_v50, 16  ;;  %v2673_v57 = vsel %vm6152_vm13, %v2668_v61, %v2672_v62 }
 0x161   : > { %5268 = vmatmul.msk.bf16.gmra.mxu2 %vm1309_vm12, %v1879_v43  ;;  %5445 = vmatmul.msk.bf16.gmra.mxu0 %vm1309_vm12, %v2822_v38  ;;  %v1814_v43 = vsel %vm6443_vm1, %v1812_v28, %v1813_v11  ;;  %v2802_v2 = vunpack.c.l.b16 %v2673_v57  ;;  %v5424_v11 = vld [vmem:[#allocation2 + $0xa4] sm:$0x1]  ;;  %v2700_v28 = vrot.slane %v2698_v23, 4 }
 0x162   : > { %7634 = vst [vmem:[#allocation7_spill] sm:$0xff] %v6701_v26  ;;  %v1861_v18 = vunpack.c.l.b16 %v1814_v43  ;;  %v2696_v24 = vrot.slane %v2694_v33, 5 }
 0x164   : > { %v1959_v42 = vpop.f32.mrf.mxu2  ;;  %v1611_v40 = vpop.f32.mrf.mxu1  ;;  %v2701_v43 = vor.u32 %v2700_v28, %v2696_v24 }
 0x165   : > { %v2246_v63 = vpop.f32.mrf.mxu3  ;;  %v2030_v9 = vadd.f32 %v1959_v42, %v1607_v27  ;;  %v2683_v27 = vsel %vm6152_vm13, %v2678_v34, %v2682_v5  ;;  %v2691_v34 = vor.u32 %v2690_v29, %v2687_v4  ;;  %v2704_v5 = vshll.u32 %v5424_v11, 16  ;;  %v5425_v4 = vld [vmem:[#allocation2 + $0xa8] sm:$0xf]  ;;  %v288_v29 = vld [vmem:[#allocation2 + $0xc0] sm:$0x1] }
 0x166   : > { %v2319_v45 = vadd.f32 %v2246_v63, %v2029_v0  ;;  %v2900_v38 = vpop.f32.mrf.mxu0  ;;  %v1860_v0 = vunpack.c.l.b16 %v1811_v19  ;;  %v2803_v36 = vunpack.c.l.b16 %v2683_v27  ;;  %v5955_v63 = vld [vmem:[#allocation2 + $0xa0] sm:$0xf]  ;;  %v289_v11 = vsel %vm6071_vm3, 0, %v288_v29 }
 0x167   : > { %5236 = vmatmul.msk.bf16.gmra.mxu1 %vm1309_vm12, %v5743_v10  ;;  %v2692_v23 = vrot.slane %v2691_v34, 4  ;;  %v2706_v57 = vrot.slane %v2704_v5, 5  ;;  %290 = vst [vmem:[#allocation2 + $0xc0] sm:$0x1] %v289_v11  ;;  %v2709_v34 = vshrl.u32 %v5425_v4, 16 }
 0x168   : > { %v6713_v21 = vadd.f32 %v2900_v38, %v2319_v45  ;;  %v1880_v61 = vpack.c.b16 %v1861_v18, %v1860_v0  ;;  %v1817_v45 = vrot.slane %v5955_v63, 5  ;;  %v2823_v19 = vpack.c.b16 %v2803_v36, %v2802_v2  ;;  %v5744_v18 = vld [vmem:[#allocation2 + $0x9c] sm:$0xff]  ;;  %v380_v5 = vld [vmem:[%s6089_s24 + $0x78] sm:$0xf] }
 0x169   : > { %v1820_v38 = vrot.slane %v5956_v1, 5  ;;  %v2702_v0 = vrot.slane %v2701_v43, 4  ;;  %v2697_v63 = vsel %vm6152_vm13, %v2692_v23, %v2696_v24  ;;  %v2712_v43 = vshll.u32 %v5425_v4, 16 }
 0x16a   : > { %7635 = vst [vmem:[#allocation8_spill] sm:$0xff] %v6713_v21  ;;  %5381 = vmatmul.msk.bf16.gmra.mxu3 %vm1309_vm12, %v5758_v13  ;;  %v1684_v13 = vld [vmem:[#allocation2 + $0x9c] sm:$0xe]  ;;  %v2711_v24 = vrot.slane %v2709_v34, 4 }
 0x16b   : > { %v5254_v27 = vrot.slane %v1684_v13, 9  ;;  %v640_v13 = vshrl.u32 %v380_v5, 16 }
 0x16c   : > { %v1961_v8 = vpop.f32.mrf.mxu2  ;;  %v1613_v10 = vpop.f32.mrf.mxu1 }
 0x16d   : > { %v2249_v42 = vpop.f32.mrf.mxu3  ;;  %v2031_v62 = vadd.f32 %v1961_v8, %v1609_v37  ;;  %v1819_v37 = vrot.slane %v1817_v45, 4  ;;  %v642_v23 = vrot.slane %v640_v13, 7  ;;  %v5957_v13 = vld [vmem:[#allocation2 + $0xac] sm:$0xf] }
 0x16e   : > { %v2320_v50 = vadd.f32 %v2249_v42, %v2030_v9  ;;  %v2903_v46 = vpop.f32.mrf.mxu0  ;;  %v1612_v9 = vadd.f32 %v1611_v40, %v6522_v16  ;;  %v5426_v42 = vld [vmem:[#allocation2 + $0xac] sm:$0xf]  ;;  %v1818_v16 = vsel %vm6443_vm1, %v5254_v27, %v1817_v45 }
 0x16f   : > { %v1821_v40 = vsel %vm6443_vm1, %v1819_v37, %v1820_v38  ;;  %v2722_v1 = vshrl.u32 %v5426_v42, 16  ;;  %v1862_v45 = vunpack.c.l.b16 %v1818_v16  ;;  %v2804_v38 = vunpack.c.l.b16 %v2697_v63  ;;  %v344_v63 = vld [vmem:[#allocation2 + $0xc8] sm:$0x1] }
 0x170   : > { %v6717_v33 = vadd.f32 %v2903_v46, %v2320_v50  ;;  %v5759_v50 = vld [vmem:[#allocation2 + $0x9c] sm:$0xff]  ;;  %v2718_v46 = vshll.u32 %v5426_v42, 16  ;;  %v1863_v27 = vunpack.c.l.b16 %v1821_v40 }
 0x171   : > { %5269 = vmatmul.msk.bf16.gmra.mxu2 %vm1309_vm12, %v1880_v61  ;;  %5446 = vmatmul.msk.bf16.gmra.mxu0 %vm1309_vm12, %v2823_v19  ;;  %v2707_v19 = vsel %vm6152_vm13, %v2702_v0, %v2706_v57  ;;  %v1614_v57 = vadd.f32 %v1613_v10, %v6526_v44  ;;  %v2714_v0 = vrot.slane %v2712_v43, 5  ;;  %v646_v43 = vrot.slane %v642_v23, 4 }
 0x172   : > { %7636 = vst [vmem:[#allocation9_spill] sm:$0xff] %v6717_v33  ;;  %v2805_v37 = vunpack.c.l.b16 %v2707_v19  ;;  %v6740_v11 = vrot.slane %v2718_v46, 5  ;;  %v1881_v40 = vpack.c.b16 %v1863_v27, %v1862_v45  ;;  %v345_v27 = vsel %vm6079_vm5, 0, %v344_v63 }
 0x173   : > { %v2715_v10 = vor.u32 %v2714_v0, %v2711_v24  ;;  %346 = vst [vmem:[#allocation2 + $0xc8] sm:$0x1] %v345_v27 }
 0x174   : > { %v1964_v2 = vpop.f32.mrf.mxu2  ;;  %v6721_v36 = vpop.f32.mrf.mxu1  ;;  %v2824_v19 = vpack.c.b16 %v2805_v37, %v2804_v38  ;;  %v5958_v38 = vld [vmem:[#allocation2 + $0xb0] sm:$0x1] }
 0x175   : > { %v2251_v28 = vpop.f32.mrf.mxu3  ;;  %v2032_v8 = vadd.f32 %v1964_v2, %v1612_v9  ;;  %v381_v9 = vld [vmem:[%s6089_s24 + $0x7c] sm:$0xf]  ;;  %v1617_v25 = vadd.f32 %v6721_v36, %v6540_v58  ;;  %v2716_v0 = vrot.slane %v2715_v10, 4 }
 0x176   : > { %v2321_v61 = vadd.f32 %v2251_v28, %v2031_v62  ;;  %v2905_v62 = vpop.f32.mrf.mxu0  ;;  %v648_v4 = vshrl.u32 %v381_v9, 16  ;;  %v2724_v28 = vrot.slane %v2722_v1, 4  ;;  %v651_v46 = vshll.u32 %v381_v9, 16 }
 0x177   : > { %5237 = vmatmul.msk.bf16.gmra.mxu1 %vm1309_vm12, %v5744_v18  ;;  %v643_v18 = vshll.u32 %v380_v5, 16  ;;  %v1685_v5 = vld [vmem:[#allocation2 + $0xa8] sm:$0xe] }
 0x178   : > { %v6736_v29 = vadd.f32 %v2905_v62, %v2321_v61  ;;  %v5427_v62 = vld [vmem:[#allocation2 + $0xb0] sm:$0x1]  ;;  %v650_v33 = vrot.slane %v648_v4, 7  ;;  %v2725_v1 = vor.u32 %v2724_v28, %v6740_v11 }
 0x179   : > { %v645_v44 = vor.u32 %v643_v18, %v642_v23  ;;  %v2728_v26 = vshll.u32 %v5427_v62, 16  ;;  %v5255_v23 = vrot.slane %v1685_v5, 9  ;;  %v5745_v18 = vld [vmem:[#allocation2 + $0xa8] sm:$0xff] }
 0x17a   : > { %7637 = vst [vmem:[#allocation10_spill] sm:$0xff] %v6736_v29  ;;  %5382 = vmatmul.msk.bf16.gmra.mxu3 %vm1309_vm12, %v5759_v50  ;;  %v812_v50 = vld [vmem:[#allocation2 + $0xc0] sm:$0xf]  ;;  %v1824_v29 = vrot.slane %v5957_v13, 5  ;;  %v653_v37 = vor.u32 %v651_v46, %v650_v33  ;;  %v5760_v13 = vld [vmem:[#allocation2 + $0xa8] sm:$0xff]  ;;  %v655_v36 = vrot.slane %v650_v33, 4 }
 0x17b   : > { %v813_v45 = vsel %vm6107_vm9, %v645_v44, %v812_v50  ;;  %v2730_v28 = vrot.slane %v2728_v26, 5  ;;  %v2721_v26 = vsel %vm6152_vm13, %v2716_v0, %v6740_v11  ;;  %v5959_v0 = vld [vmem:[#allocation2 + $0xb8] sm:$0xf] }
 0x17c   : > { %v1966_v2 = vpop.f32.mrf.mxu2  ;;  %v6742_v42 = vpop.f32.mrf.mxu1  ;;  %814 = vst [vmem:[#allocation2 + $0xc0] sm:$0xf] %v813_v45  ;;  %v1826_v9 = vrot.slane %v1824_v29, 4  ;;  %v654_v4 = vsel %vm6101_vm8, %v646_v43, %v653_v37  ;;  %v1825_v58 = vsel %vm6443_vm1, %v5255_v23, %v1824_v29  ;;  %v2806_v33 = vunpack.c.l.b16 %v2721_v26  ;;  %v5430_v37 = vld [vmem:[#allocation2 + $0xbc] sm:$0x1] }
 0x17d   : > { %v2254_v16 = vpop.f32.mrf.mxu3  ;;  %v2033_v61 = vadd.f32 %v1966_v2, %v1614_v57  ;;  %v5428_v57 = vld [vmem:[#allocation2 + $0xb4] sm:$0xf]  ;;  %v2726_v2 = vrot.slane %v2725_v1, 4  ;;  %815 = vst.msk [vmem:[#allocation2 + $0xc4] sm:$0xf] %vm228_vm7, %v654_v4  ;;  %v1864_v43 = vunpack.c.l.b16 %v1825_v58 }
 0x17e   : > { %v2322_v34 = vadd.f32 %v2254_v16, %v2032_v8  ;;  %v2908_v21 = vpop.f32.mrf.mxu0  ;;  %v1827_v8 = vrot.slane %v5958_v38, 5  ;;  %v2733_v63 = vshrl.u32 %v5428_v57, 16  ;;  %v816_v1 = vld [vmem:[#allocation2 + $0xc8] sm:$0x1] }
 0x17f   : > { %v817_v11 = vsel %vm6071_vm3, %v655_v36, %v816_v1  ;;  %v5746_v1 = vld [vmem:[#allocation2 + $0xb4] sm:$0xff] }
 0x180   : > { %v6750_v24 = vadd.f32 %v2908_v21, %v2322_v34  ;;  %v5429_v21 = vld [vmem:[#allocation2 + $0xb8] sm:$0xf]  ;;  %v2736_v34 = vshll.u32 %v5428_v57, 16  ;;  %v1828_v20 = vsel %vm6443_vm1, %v1826_v9, %v1827_v8  ;;  %v2735_v45 = vrot.slane %v2733_v63, 4  ;;  %818 = vst [vmem:[#allocation2 + $0xc8] sm:$0x1] %v817_v11 }
 0x181   : > { %5270 = vmatmul.msk.bf16.gmra.mxu2 %vm1309_vm12, %v1881_v40  ;;  %5447 = vmatmul.msk.bf16.gmra.mxu0 %vm1309_vm12, %v2824_v19  ;;  %v2742_v44 = vshll.u32 %v5429_v21, 16  ;;  %v2746_v10 = vshrl.u32 %v5429_v21, 16  ;;  %v1865_v46 = vunpack.c.l.b16 %v1828_v20  ;;  %v1619_v8 = vadd.f32 %v6742_v42, %v6554_v30 }
 0x182   : > { %v2738_v27 = vrot.slane %v2736_v34, 5  ;;  %v2752_v63 = vshll.u32 %v5430_v37, 16 }
 0x183   : > { %v2744_v23 = vrot.slane %v2742_v44, 5  ;;  %v2748_v9 = vrot.slane %v2746_v10, 4  ;;  %v5431_v36 = vld [vmem:[#allocation2 + $0xc0] sm:$0xf]  ;;  %v5961_v10 = vld [vmem:[#allocation2 + $0x10] sm:$0xf] }
 0x184   : > { %v1969_v16 = vpop.f32.mrf.mxu2  ;;  %v1621_v40 = vpop.f32.mrf.mxu1  ;;  %v5432_v26 = vld [vmem:[#allocation2 + $0xc4] sm:$0xf] }
 0x185   : > { %v2256_v62 = vpop.f32.mrf.mxu3  ;;  %v2034_v50 = vadd.f32 %v1969_v16, %v1617_v25  ;;  %v1686_v16 = vld [vmem:[#allocation2 + $0xb4] sm:$0xe]  ;;  %v2766_v37 = vshll.u32 %v5432_v26, 16 }
 0x186   : > { %v2323_v19 = vadd.f32 %v2256_v62, %v2033_v61  ;;  %v2910_v5 = vpop.f32.mrf.mxu0  ;;  %v2731_v61 = vsel %vm6152_vm13, %v2726_v2, %v2730_v28  ;;  %v1882_v28 = vpack.c.b16 %v1865_v46, %v1864_v43  ;;  %v2739_v62 = vor.u32 %v2738_v27, %v2735_v45 }
 0x187   : > { %5238 = vmatmul.msk.bf16.gmra.mxu1 %vm1309_vm12, %v5745_v18  ;;  %v2807_v38 = vunpack.c.l.b16 %v2731_v61  ;;  %v1831_v18 = vrot.slane %v5959_v0, 5  ;;  %v5256_v42 = vrot.slane %v1686_v16, 9  ;;  %v2754_v43 = vrot.slane %v2752_v63, 5 }
 0x188   : > { %v6768_v29 = vadd.f32 %v2910_v5, %v2323_v19  ;;  %v2749_v19 = vor.u32 %v2748_v9, %v2744_v23  ;;  %v3068_v5 = vrot.slane %v5961_v10, 5  ;;  %v2740_v61 = vrot.slane %v2739_v62, 4 }
 0x189   : > { %v2825_v34 = vpack.c.b16 %v2807_v38, %v2806_v33  ;;  %v1833_v20 = vrot.slane %v1831_v18, 4  ;;  %v2757_v33 = vshrl.u32 %v5431_v36, 16  ;;  %v2760_v45 = vshll.u32 %v5431_v36, 16 }
 0x18a   : > { %5383 = vmatmul.msk.bf16.gmra.mxu3 %vm1309_vm12, %v5760_v13  ;;  %v5960_v13 = vld [vmem:[#allocation2 + $0xbc] sm:$0x1]  ;;  %v2750_v46 = vrot.slane %v2749_v19, 4  ;;  %v1832_v38 = vsel %vm6443_vm1, %v5256_v42, %v1831_v18  ;;  %v2770_v9 = vshrl.u32 %v5432_v26, 16  ;;  %v5451_v42 = vld [vmem:[#allocation2 + $0xc] sm:$0xe] }
 0x18b   : > { %v1834_v58 = vrot.slane %v5960_v13, 5  ;;  %v2759_v63 = vrot.slane %v2757_v33, 4  ;;  %v2762_v18 = vrot.slane %v2760_v45, 5  ;;  %v5468_v36 = vrot.slane %v5451_v42, 9  ;;  %v6793_v33 = vld [vmem:[#allocation2 + $0x1c] sm:$0xf] }
 0x18c   : > { %v1971_v57 = vpop.f32.mrf.mxu2  ;;  %v1623_v25 = vpop.f32.mrf.mxu1  ;;  %v2755_v13 = vsel %vm6152_vm13, %v2750_v46, %v2754_v43 }
 0x18d   : > { %v2259_v4 = vpop.f32.mrf.mxu3  ;;  %v2035_v2 = vadd.f32 %v1971_v57, %v1619_v8  ;;  %v1835_v8 = vsel %vm6443_vm1, %v1833_v20, %v1834_v58  ;;  %v2768_v58 = vrot.slane %v2766_v37, 5  ;;  %v5613_v20 = vld [vmem:[#allocation2 + $0x18] sm:$0xf]  ;;  %v2809_v26 = vunpack.c.l.b16 %v2755_v13 }
 0x18e   : > { %v2324_v21 = vadd.f32 %v2259_v4, %v2034_v50  ;;  %v2913_v30 = vpop.f32.mrf.mxu0  ;;  %v1622_v50 = vadd.f32 %v1621_v40, %v6568_v53  ;;  %v5962_v4 = vld [vmem:[#allocation2 + $0x14] sm:$0x1]  ;;  %v2745_v40 = vsel %vm6152_vm13, %v2740_v61, %v2744_v23  ;;  %v1867_v62 = vunpack.c.l.b16 %v1835_v8 }
 0x18f   : > { %v5761_v53 = vld [vmem:[#allocation2 + $0xb4] sm:$0xff]  ;;  %v2808_v23 = vunpack.c.l.b16 %v2745_v40  ;;  %v1624_v10 = vadd.f32 %v1623_v25, %v6588_v41  ;;  %v3739_v8 = vshrl.u32 %v5613_v20, 16  ;;  %v3742_v41 = vshll.u32 %v5613_v20, 16  ;;  %v6806_v20 = vld [vmem:[#allocation2 + $0x20] sm:$0x1] }
 0x190   : > { %v6776_v44 = vadd.f32 %v2913_v30, %v2324_v21  ;;  %v1866_v21 = vunpack.c.l.b16 %v1832_v38  ;;  %v2772_v30 = vrot.slane %v2770_v9, 4  ;;  %v3752_v40 = vshrl.u32 %v6793_v33, 16 }
 0x191   : > { %5271 = vmatmul.msk.bf16.gmra.mxu2 %vm1309_vm12, %v1882_v28  ;;  %5448 = vmatmul.msk.bf16.gmra.mxu0 %vm1309_vm12, %v2825_v34  ;;  %v3071_v28 = vrot.slane %v5962_v4, 5  ;;  %v3070_v34 = vrot.slane %v3068_v5, 4 }
 0x192   : > { %v1883_v61 = vpack.c.b16 %v1867_v62, %v1866_v21  ;;  %v2773_v43 = vor.u32 %v2772_v30, %v2768_v58  ;;  %v2826_v21 = vpack.c.b16 %v2809_v26, %v2808_v23  ;;  %v3754_v42 = vrot.slane %v3752_v40, 4 }
 0x193   : > { %v3072_v38 = vsel %vm6443_vm1, %v3070_v34, %v3071_v28  ;;  %v3744_v28 = vrot.slane %v3742_v41, 5 }
 0x194   : > { %v1974_v27 = vpop.f32.mrf.mxu2  ;;  %v1626_v11 = vpop.f32.mrf.mxu1  ;;  %v3179_v4 = vunpack.c.l.b16 %v3072_v38  ;;  %v3758_v38 = vshll.u32 %v6806_v20, 16 }
 0x195   : > { %v2261_v57 = vpop.f32.mrf.mxu3  ;;  %v2036_v0 = vadd.f32 %v1974_v27, %v1622_v50  ;;  %v5433_v50 = vld [vmem:[#allocation2 + $0xc8] sm:$0x1]  ;;  %v3069_v27 = vsel %vm6443_vm1, %v5468_v36, %v3068_v5 }
 0x196   : > { %v2325_v16 = vadd.f32 %v2261_v57, %v2035_v2  ;;  %v2915_v19 = vpop.f32.mrf.mxu0  ;;  %v3178_v57 = vunpack.c.l.b16 %v3069_v27 }
 0x197   : > { %5239 = vmatmul.msk.bf16.gmra.mxu1 %vm1309_vm12, %v5746_v1  ;;  %v2763_v1 = vor.u32 %v2762_v18, %v2759_v63  ;;  %v3741_v18 = vrot.slane %v3739_v8, 4 }
 0x198   : > { %v6789_v2 = vadd.f32 %v2915_v19, %v2325_v16  ;;  %v2776_v16 = vshll.u32 %v5433_v50, 16  ;;  %v3210_v62 = vpack.c.b16 %v3179_v4, %v3178_v57  ;;  %v2774_v19 = vrot.slane %v2773_v43, 4 }
 0x199   : > { %v2764_v5 = vrot.slane %v2763_v1, 4  ;;  %v3745_v50 = vor.u32 %v3744_v28, %v3741_v18 }
 0x19a   : > { %5384 = vmatmul.msk.bf16.gmra.mxu3 %vm1309_vm12, %v5761_v53  ;;  %v3748_v53 = vshll.u32 %v6793_v33, 16  ;;  %v2778_v13 = vrot.slane %v2776_v16, 5 }
 0x19c   : > { %v1976_v45 = vpop.f32.mrf.mxu2  ;;  %v1628_v46 = vpop.f32.mrf.mxu1  ;;  %v3750_v30 = vrot.slane %v3748_v53, 5  ;;  %v2779_v43 = vsel %vm6152_vm13, %v2774_v19, %v2778_v13  ;;  %v3760_v53 = vrot.slane %v3758_v38, 5  ;;  %v6822_v13 = vld [vmem:[#allocation2 + $0x28] sm:$0xf] }
 0x19d   : > { %v2264_v37 = vpop.f32.mrf.mxu3  ;;  %v2037_v9 = vadd.f32 %v1976_v45, %v1624_v10  ;;  %v2769_v10 = vsel %vm6152_vm13, %v2764_v5, %v2768_v58  ;;  %v5762_v45 = vld [vmem:[#allocation2 + $0xc0] sm:$0xff]  ;;  %v2811_v41 = vunpack.c.l.b16 %v2779_v43  ;;  %v3746_v58 = vrot.slane %v3745_v50, 4 }
 0x19e   : > { %v2326_v25 = vadd.f32 %v2264_v37, %v2036_v0  ;;  %v2918_v63 = vpop.f32.mrf.mxu0  ;;  %v1627_v0 = vadd.f32 %v1626_v11, %v6600_v7  ;;  %v3755_v27 = vor.u32 %v3754_v42, %v3750_v30  ;;  %v5963_v7 = vld [vmem:[#allocation2 + $0x20] sm:$0x1]  ;;  %v5964_v37 = vld [vmem:[#allocation2 + $0x1c] sm:$0xf]  ;;  %v2810_v4 = vunpack.c.l.b16 %v2769_v10 }
 0x19f   : > { %v3078_v11 = vrot.slane %v5963_v7, 5  ;;  %v3075_v57 = vrot.slane %v5964_v37, 5  ;;  %v3751_v10 = vsel %vm6152_vm13, %v3746_v58, %v3750_v30  ;;  %v3772_v7 = vshll.u32 %v6822_v13, 16 }
 0x1a0   : > { %v6802_v34 = vadd.f32 %v2918_v63, %v2326_v25  ;;  %v5452_v25 = vld [vmem:[#allocation2 + $0x18] sm:$0xe]  ;;  %v1629_v63 = vadd.f32 %v1628_v46, %v6618_v47  ;;  %v2827_v42 = vpack.c.b16 %v2811_v41, %v2810_v4  ;;  %v4410_v47 = vrot.slane %v6793_v33, 5 }
 0x1a1   : > { %5272 = vmatmul.msk.bf16.gmra.mxu2 %vm1309_vm12, %v1883_v61  ;;  %5449 = vmatmul.msk.bf16.gmra.mxu0 %vm1309_vm12, %v2826_v21  ;;  %v5469_v40 = vrot.slane %v5452_v25, 9  ;;  %v3077_v21 = vrot.slane %v3075_v57, 4  ;;  %v4122_v37 = vunpack.c.l.b16 %v3751_v10  ;;  %v4413_v41 = vrot.slane %v6806_v20, 5  ;;  %v5965_v10 = vld [vmem:[#allocation2 + $0x2c] sm:$0x1] }
 0x1a2   : > { %v4412_v4 = vrot.slane %v4410_v47, 4 }
 0x1a3   : > { %v3076_v28 = vsel %vm6443_vm1, %v5469_v40, %v3075_v57  ;;  %v3079_v19 = vsel %vm6443_vm1, %v3077_v21, %v3078_v11  ;;  %v3776_v11 = vshrl.u32 %v6822_v13, 16 }
 0x1a4   : > { %v1979_v23 = vpop.f32.mrf.mxu2  ;;  %v1631_v36 = vpop.f32.mrf.mxu1  ;;  %v3181_v38 = vunpack.c.l.b16 %v3079_v19  ;;  %v4414_v20 = vsel %vm6443_vm1, %v4412_v4, %v4413_v41 }
 0x1a5   : > { %v2266_v26 = vpop.f32.mrf.mxu3  ;;  %v2038_v61 = vadd.f32 %v1979_v23, %v1627_v0  ;;  %v3778_v40 = vrot.slane %v3776_v11, 4  ;;  %v5619_v11 = vld [vmem:[#allocation2 + $0x30] sm:$0xf] }
 0x1a6   : > { %v2327_v1 = vadd.f32 %v2266_v26, %v2037_v9  ;;  %v2920_v8 = vpop.f32.mrf.mxu0  ;;  %v3756_v9 = vrot.slane %v3755_v27, 4  ;;  %v5763_v26 = vld [vmem:[#allocation2 + $0x18] sm:$0xff]  ;;  %v3180_v27 = vunpack.c.l.b16 %v3076_v28 }
 0x1a7   : > { %5484 = vmatmul.msk.bf16.vlgmr.msra.gmra.mxu1 %vm1309_vm12, %v3210_v62  ;;  %v5616_v62 = vld [vmem:[#allocation2 + $0x24] sm:$0xf] }
 0x1a8   : > { %v6814_v16 = vadd.f32 %v2920_v8, %v2327_v1  ;;  %v3761_v50 = vsel %vm6152_vm13, %v3756_v9, %v3760_v53  ;;  %v5678_v1 = vld [vmem:[#allocation2 + $0x18] sm:$0xe]  ;;  %v3766_v43 = vshll.u32 %v5616_v62, 16  ;;  %v3211_v25 = vpack.c.b16 %v3181_v38, %v3180_v27 }
 0x1a9   : > { %v4123_v30 = vunpack.c.l.b16 %v3761_v50  ;;  %v5695_v57 = vrot.slane %v5678_v1, 9  ;;  %v3774_v53 = vrot.slane %v3772_v7, 5  ;;  %v5966_v1 = vld [vmem:[#allocation2 + $0x28] sm:$0xf]  ;;  %v4521_v27 = vunpack.c.l.b16 %v4414_v20 }
 0x1aa   : > { %5385 = vmatmul.msk.bf16.gmra.mxu3 %vm1309_vm12, %v5762_v45  ;;  %v3763_v45 = vshrl.u32 %v5616_v62, 16  ;;  %v3768_v9 = vrot.slane %v3766_v43, 5  ;;  %v6837_v62 = vld [vmem:[#allocation2 + $0x2c] sm:$0x1]  ;;  %v5453_v43 = vld [vmem:[#allocation2 + $0x24] sm:$0xe] }
 0x1ab   : > { %v5470_v38 = vrot.slane %v5453_v43, 9 }
 0x1ac   : > { %v1981_v5 = vpop.f32.mrf.mxu2  ;;  %v1633_v18 = vpop.f32.mrf.mxu1  ;;  %v3765_v58 = vrot.slane %v3763_v45, 4  ;;  %v3082_v45 = vrot.slane %v5966_v1, 5 }
 0x1ad   : > { %v2269_v0 = vpop.f32.mrf.mxu3  ;;  %v2039_v23 = vadd.f32 %v1981_v5, %v1629_v63 }
 0x1ae   : > { %v2328_v46 = vadd.f32 %v2269_v0, %v2038_v61  ;;  %v2923_v8 = vpop.f32.mrf.mxu0  ;;  %v1632_v61 = vadd.f32 %v1631_v36, %v6537_v59  ;;  %v4154_v0 = vpack.c.b16 %v4123_v30, %v4122_v37  ;;  %v4411_v59 = vsel %vm6443_vm1, %v5695_v57, %v4410_v47 }
 0x1af   : > { %v3769_v36 = vor.u32 %v3768_v9, %v3765_v58  ;;  %v4520_v47 = vunpack.c.l.b16 %v4411_v59  ;;  %v3084_v7 = vrot.slane %v3082_v45, 4  ;;  %v3083_v58 = vsel %vm6443_vm1, %v5470_v38, %v3082_v45 }
 0x1b0   : > { %v6832_v33 = vadd.f32 %v2923_v8, %v2328_v46  ;;  %v3085_v46 = vrot.slane %v5965_v10, 5  ;;  %v1634_v8 = vadd.f32 %v1633_v18, %v6545_v14 }
 0x1b1   : > { %5597 = vmatmul.msk.bf16.vlgmr.msra.gmra.mxu2 %vm1309_vm12, %v5763_v26  ;;  %5450 = vmatmul.msk.bf16.gmra.mxu0 %vm1309_vm12, %v2827_v42  ;;  %v3779_v42 = vor.u32 %v3778_v40, %v3774_v53  ;;  %v3782_v26 = vshll.u32 %v6837_v62, 16  ;;  %v3770_v37 = vrot.slane %v3769_v36, 4 }
 0x1b3   : > { %v3780_v30 = vrot.slane %v3779_v42, 4  ;;  %v3784_v57 = vrot.slane %v3782_v26, 5  ;;  %v3775_v20 = vsel %vm6152_vm13, %v3770_v37, %v3774_v53  ;;  %v3182_v42 = vunpack.c.l.b16 %v3083_v58 }
 0x1b4   : > { %v1984_v21 = vpop.f32.mrf.mxu2  ;;  %v1636_v63 = vpop.f32.mrf.mxu1  ;;  %v4124_v43 = vunpack.c.l.b16 %v3775_v20  ;;  %v4420_v37 = vrot.slane %v6837_v62, 5 }
 0x1b5   : > { %v2271_v5 = vpop.f32.mrf.mxu3  ;;  %v2040_v28 = vadd.f32 %v1984_v21, %v1632_v61  ;;  %v6849_v61 = vld [vmem:[#allocation2 + $0x34] sm:$0xf]  ;;  %v5764_v21 = vld [vmem:[#allocation2 + $0x24] sm:$0xff]  ;;  %v3785_v36 = vsel %vm6152_vm13, %v3780_v30, %v3784_v57  ;;  %v1637_v53 = vadd.f32 %v1636_v63, %v6564_v56  ;;  %v5967_v56 = vld [vmem:[#allocation2 + $0x38] sm:$0x1] }
 0x1b6   : > { %v2329_v19 = vadd.f32 %v2271_v5, %v2039_v23  ;;  %v2925_v50 = vpop.f32.mrf.mxu0  ;;  %v3787_v5 = vshrl.u32 %v5619_v11, 16  ;;  %v3796_v18 = vshll.u32 %v6849_v61, 16  ;;  %v3800_v59 = vshrl.u32 %v6849_v61, 16 }
 0x1b7   : > { %5485 = vmatmul.msk.bf16.gmra.mxu1 %vm1309_vm12, %v3211_v25  ;;  %v3086_v25 = vsel %vm6443_vm1, %v3084_v7, %v3085_v46  ;;  %v4417_v46 = vrot.slane %v6822_v13, 5  ;;  %v3092_v63 = vrot.slane %v5967_v56, 5 }
 0x1b8   : > { %v6845_v23 = vadd.f32 %v2925_v50, %v2329_v19  ;;  %v3790_v19 = vshll.u32 %v5619_v11, 16  ;;  %v3183_v26 = vunpack.c.l.b16 %v3086_v25  ;;  %v5679_v50 = vld [vmem:[#allocation2 + $0x24] sm:$0xe]  ;;  %v3789_v1 = vrot.slane %v3787_v5, 4  ;;  %v6867_v11 = vld [vmem:[#allocation2 + $0x38] sm:$0x1] }
 0x1b9   : > { %v3802_v38 = vrot.slane %v3800_v59, 4  ;;  %v4419_v13 = vrot.slane %v4417_v46, 4 }
 0x1ba   : > { %5662 = vmatmul.msk.bf16.vlgmr.msra.gmra.mxu3 %vm1309_vm12, %v4154_v0  ;;  %v4552_v0 = vpack.c.b16 %v4521_v27, %v4520_v47  ;;  %v4125_v47 = vunpack.c.l.b16 %v3785_v36  ;;  %v3798_v27 = vrot.slane %v3796_v18, 5  ;;  %v3212_v7 = vpack.c.b16 %v3183_v26, %v3182_v42  ;;  %v5968_v18 = vld [vmem:[#allocation2 + $0x34] sm:$0xf]  ;;  %v5454_v36 = vld [vmem:[#allocation2 + $0x30] sm:$0xe] }
 0x1bb   : > { %v4421_v62 = vsel %vm6443_vm1, %v4419_v13, %v4420_v37  ;;  %v3089_v59 = vrot.slane %v5968_v18, 5 }
 0x1bc   : > { %v1986_v4 = vpop.f32.mrf.mxu2  ;;  %v1638_v41 = vpop.f32.mrf.mxu1  ;;  %v3803_v5 = vor.u32 %v3802_v38, %v3798_v27 }
 0x1bd   : > { %v2274_v9 = vpop.f32.mrf.mxu3  ;;  %v2041_v40 = vadd.f32 %v1986_v4, %v1634_v8  ;;  %v5696_v8 = vrot.slane %v5679_v50, 9  ;;  %v3091_v50 = vrot.slane %v3089_v59, 4 }
 0x1be   : > { %v2330_v14 = vadd.f32 %v2274_v9, %v2040_v28  ;;  %v2928_v10 = vpop.f32.mrf.mxu0  ;;  %v3792_v28 = vrot.slane %v3790_v19, 5  ;;  %v3806_v19 = vshll.u32 %v6867_v11, 16  ;;  %v3804_v42 = vrot.slane %v3803_v5, 4 }
 0x1bf   : > { %v3093_v13 = vsel %vm6443_vm1, %v3091_v50, %v3092_v63 }
 0x1c0   : > { %v6863_v45 = vadd.f32 %v2928_v10, %v2330_v14  ;;  %v3793_v25 = vor.u32 %v3792_v28, %v3789_v1  ;;  %v4418_v14 = vsel %vm6443_vm1, %v5696_v8, %v4417_v46  ;;  %v3808_v26 = vrot.slane %v3806_v19, 5  ;;  %v5622_v1 = vld [vmem:[#allocation2 + $0x3c] sm:$0xf] }
 0x1c1   : > { %5598 = vmatmul.msk.bf16.gmra.mxu2 %vm1309_vm12, %v5764_v21  ;;  %5711 = vmatmul.msk.bf16.vlgmr.msra.gmra.mxu0 %vm1309_vm12, %v4552_v0  ;;  %v4155_v21 = vpack.c.b16 %v4125_v47, %v4124_v43  ;;  %v5471_v10 = vrot.slane %v5454_v36, 9  ;;  %v4522_v28 = vunpack.c.l.b16 %v4418_v14  ;;  %v4523_v43 = vunpack.c.l.b16 %v4421_v62  ;;  %v6880_v47 = vld [vmem:[#allocation2 + $0x40] sm:$0xf] }
 0x1c2   : > { %v3794_v20 = vrot.slane %v3793_v25, 4  ;;  %v1639_v46 = vadd.f32 %v1638_v41, %v6578_v22  ;;  %v3811_v22 = vshrl.u32 %v5622_v1, 16  ;;  %v3814_v41 = vshll.u32 %v5622_v1, 16 }
 0x1c3   : > { %v3090_v8 = vsel %vm6443_vm1, %v5471_v10, %v3089_v59  ;;  %v3820_v5 = vshll.u32 %v6880_v47, 16  ;;  %v3824_v19 = vshrl.u32 %v6880_v47, 16  ;;  %v4553_v56 = vpack.c.b16 %v4523_v43, %v4522_v28  ;;  %v6899_v28 = vld [vmem:[#allocation2 + $0x44] sm:$0x1] }
 0x1c4   : > { %v1989_v30 = vpop.f32.mrf.mxu2  ;;  %v1641_v57 = vpop.f32.mrf.mxu1  ;;  %v3799_v25 = vsel %vm6152_vm13, %v3794_v20, %v3798_v27  ;;  %v3185_v63 = vunpack.c.l.b16 %v3093_v13  ;;  %v3813_v59 = vrot.slane %v3811_v22, 4  ;;  %v3816_v20 = vrot.slane %v3814_v41, 5 }
 0x1c5   : > { %v2276_v4 = vpop.f32.mrf.mxu3  ;;  %v2042_v58 = vadd.f32 %v1989_v30, %v1637_v53  ;;  %v4424_v53 = vrot.slane %v6849_v61, 5  ;;  %v3809_v61 = vsel %vm6152_vm13, %v3804_v42, %v3808_v26  ;;  %v4126_v62 = vunpack.c.l.b16 %v3799_v25 }
 0x1c6   : > { %v2331_v9 = vadd.f32 %v2276_v4, %v2041_v40  ;;  %v2930_v0 = vpop.f32.mrf.mxu0  ;;  %v5765_v4 = vld [vmem:[#allocation2 + $0x30] sm:$0xff]  ;;  %v4127_v27 = vunpack.c.l.b16 %v3809_v61  ;;  %v4427_v42 = vrot.slane %v6867_v11, 5  ;;  %v3822_v26 = vrot.slane %v3820_v5, 5 }
 0x1c7   : > { %5486 = vmatmul.msk.bf16.gmra.mxu1 %vm1309_vm12, %v3212_v7  ;;  %v3826_v10 = vrot.slane %v3824_v19, 4  ;;  %v1642_v50 = vadd.f32 %v1641_v57, %v6593_v48  ;;  %v3830_v22 = vshll.u32 %v6899_v28, 16  ;;  %v5969_v48 = vld [vmem:[#allocation2 + $0x44] sm:$0x1] }
 0x1c8   : > { %v6876_v40 = vadd.f32 %v2930_v0, %v2331_v9  ;;  %v5680_v9 = vld [vmem:[#allocation2 + $0x30] sm:$0xe]  ;;  %v3184_v0 = vunpack.c.l.b16 %v3090_v8  ;;  %v4156_v8 = vpack.c.b16 %v4127_v27, %v4126_v62  ;;  %v3099_v57 = vrot.slane %v5969_v48, 5  ;;  %v5625_v27 = vld [vmem:[#allocation2 + $0x48] sm:$0xf] }
 0x1c9   : > { %v5697_v18 = vrot.slane %v5680_v9, 9  ;;  %v3827_v9 = vor.u32 %v3826_v10, %v3822_v26  ;;  %v6915_v10 = vld [vmem:[#allocation2 + $0x4c] sm:$0xf] }
 0x1ca   : > { %5663 = vmatmul.msk.bf16.gmra.mxu3 %vm1309_vm12, %v4155_v21  ;;  %v3213_v1 = vpack.c.b16 %v3185_v63, %v3184_v0  ;;  %v3832_v63 = vrot.slane %v3830_v22, 5  ;;  %v3844_v48 = vshll.u32 %v6915_v10, 16 }
 0x1cb   : > { %v4425_v13 = vsel %vm6443_vm1, %v5697_v18, %v4424_v53 }
 0x1cc   : > { %v1991_v38 = vpop.f32.mrf.mxu2  ;;  %v1643_v7 = vpop.f32.mrf.mxu1  ;;  %v4524_v5 = vunpack.c.l.b16 %v4425_v13 }
 0x1cd   : > { %v2279_v37 = vpop.f32.mrf.mxu3  ;;  %v2043_v30 = vadd.f32 %v1991_v38, %v1639_v46  ;;  %v1644_v18 = vadd.f32 %v1643_v7, %v6614_v31  ;;  %v4431_v31 = vrot.slane %v6880_v47, 5 }
 0x1ce   : > { %v2332_v21 = vadd.f32 %v2279_v37, %v2042_v58  ;;  %v2933_v14 = vpop.f32.mrf.mxu0  ;;  %v4426_v58 = vrot.slane %v4424_v53, 4  ;;  %v5455_v53 = vld [vmem:[#allocation2 + $0x3c] sm:$0xe] }
 0x1d0   : > { %v6894_v36 = vadd.f32 %v2933_v14, %v2332_v21  ;;  %v4428_v11 = vsel %vm6443_vm1, %v4426_v58, %v4427_v42  ;;  %v5970_v21 = vld [vmem:[#allocation2 + $0x40] sm:$0xf]  ;;  %v5472_v14 = vrot.slane %v5455_v53, 9 }
 0x1d1   : > { %5599 = vmatmul.msk.bf16.gmra.mxu2 %vm1309_vm12, %v5765_v4  ;;  %5712 = vmatmul.msk.bf16.gmra.mxu0 %vm1309_vm12, %v4553_v56  ;;  %v3817_v4 = vor.u32 %v3816_v20, %v3813_v59  ;;  %v3096_v61 = vrot.slane %v5970_v21, 5  ;;  %v4525_v19 = vunpack.c.l.b16 %v4428_v11  ;;  %v3838_v11 = vshll.u32 %v5625_v27, 16 }
 0x1d3   : > { %v3818_v56 = vrot.slane %v3817_v4, 4  ;;  %v3098_v62 = vrot.slane %v3096_v61, 4  ;;  %v3097_v58 = vsel %vm6443_vm1, %v5472_v14, %v3096_v61  ;;  %v5681_v4 = vld [vmem:[#allocation2 + $0x3c] sm:$0xe] }
 0x1d4   : > { %v1994_v43 = vpop.f32.mrf.mxu2  ;;  %v1646_v46 = vpop.f32.mrf.mxu1  ;;  %v5698_v61 = vrot.slane %v5681_v4, 9  ;;  %v5972_v4 = vld [vmem:[#allocation2 + $0x4c] sm:$0xf] }
 0x1d5   : > { %v2281_v38 = vpop.f32.mrf.mxu3  ;;  %v2044_v37 = vadd.f32 %v1994_v43, %v1642_v50  ;;  %v3100_v42 = vsel %vm6443_vm1, %v3098_v62, %v3099_v57  ;;  %v4554_v50 = vpack.c.b16 %v4525_v19, %v4524_v5  ;;  %v3848_v57 = vshrl.u32 %v6915_v10, 16 }
 0x1d6   : > { %v2333_v25 = vadd.f32 %v2281_v38, %v2043_v30  ;;  %v2935_v41 = vpop.f32.mrf.mxu0  ;;  %v3828_v30 = vrot.slane %v3827_v9, 4  ;;  %v5766_v38 = vld [vmem:[#allocation2 + $0x3c] sm:$0xff]  ;;  %v3186_v9 = vunpack.c.l.b16 %v3097_v58  ;;  %v3187_v22 = vunpack.c.l.b16 %v3100_v42 }
 0x1d7   : > { %5487 = vmatmul.msk.bf16.gmra.mxu1 %vm1309_vm12, %v3213_v1  ;;  %v4433_v5 = vrot.slane %v4431_v31, 4  ;;  %v4434_v19 = vrot.slane %v6899_v28, 5  ;;  %v3850_v14 = vrot.slane %v3848_v57, 4  ;;  %v5628_v57 = vld [vmem:[#allocation2 + $0x54] sm:$0xf] }
 0x1d8   : > { %v6907_v0 = vadd.f32 %v2935_v41, %v2333_v25  ;;  %v3833_v13 = vsel %vm6152_vm13, %v3828_v30, %v3832_v63  ;;  %v3835_v25 = vshrl.u32 %v5625_v27, 16  ;;  %v3214_v53 = vpack.c.b16 %v3187_v22, %v3186_v9  ;;  %v6930_v27 = vld [vmem:[#allocation2 + $0x50] sm:$0x1] }
 0x1d9   : > { %v3840_v30 = vrot.slane %v3838_v11, 5  ;;  %v3846_v63 = vrot.slane %v3844_v48, 5  ;;  %v4435_v28 = vsel %vm6443_vm1, %v4433_v5, %v4434_v19  ;;  %v5456_v11 = vld [vmem:[#allocation2 + $0x48] sm:$0xe] }
 0x1da   : > { %5664 = vmatmul.msk.bf16.gmra.mxu3 %vm1309_vm12, %v4156_v8  ;;  %v3823_v8 = vsel %vm6152_vm13, %v3818_v56, %v3822_v26  ;;  %v4129_v26 = vunpack.c.l.b16 %v3833_v13  ;;  %v3837_v56 = vrot.slane %v3835_v25, 4  ;;  %v3103_v25 = vrot.slane %v5972_v4, 5 }
 0x1db   : > { %v4128_v21 = vunpack.c.l.b16 %v3823_v8  ;;  %v5971_v8 = vld [vmem:[#allocation2 + $0x50] sm:$0x1]  ;;  %v4527_v9 = vunpack.c.l.b16 %v4435_v28  ;;  %v5473_v22 = vrot.slane %v5456_v11, 9 }
 0x1dc   : > { %v1996_v59 = vpop.f32.mrf.mxu2  ;;  %v1648_v20 = vpop.f32.mrf.mxu1  ;;  %v3105_v48 = vrot.slane %v3103_v25, 4 }
 0x1dd   : > { %v2284_v1 = vpop.f32.mrf.mxu3  ;;  %v2045_v43 = vadd.f32 %v1996_v59, %v1644_v18 }
 0x1de   : > { %v2334_v7 = vadd.f32 %v2284_v1, %v2044_v37  ;;  %v2938_v41 = vpop.f32.mrf.mxu0  ;;  %v1647_v37 = vadd.f32 %v1646_v46, %v6624_v15  ;;  %v4157_v1 = vpack.c.b16 %v4129_v26, %v4128_v21  ;;  %v4432_v15 = vsel %vm6443_vm1, %v5698_v61, %v4431_v31 }
 0x1df   : > { %v3841_v46 = vor.u32 %v3840_v30, %v3837_v56  ;;  %v4526_v31 = vunpack.c.l.b16 %v4432_v15  ;;  %v3104_v56 = vsel %vm6443_vm1, %v5473_v22, %v3103_v25 }
 0x1e0   : > { %v6925_v47 = vadd.f32 %v2938_v41, %v2334_v7  ;;  %v3106_v7 = vrot.slane %v5971_v8, 5  ;;  %v1649_v41 = vadd.f32 %v1648_v20, %v6638_v60 }
 0x1e1   : > { %5600 = vmatmul.msk.bf16.gmra.mxu2 %vm1309_vm12, %v5766_v38  ;;  %5713 = vmatmul.msk.bf16.gmra.mxu0 %vm1309_vm12, %v4554_v50  ;;  %v3851_v50 = vor.u32 %v3850_v14, %v3846_v63  ;;  %v3854_v38 = vshll.u32 %v6930_v27, 16  ;;  %v3842_v21 = vrot.slane %v3841_v46, 4 }
 0x1e3   : > { %v3852_v26 = vrot.slane %v3851_v50, 4  ;;  %v3856_v61 = vrot.slane %v3854_v38, 5  ;;  %v3847_v28 = vsel %vm6152_vm13, %v3842_v21, %v3846_v63  ;;  %v3188_v50 = vunpack.c.l.b16 %v3104_v56 }
 0x1e4   : > { %v1999_v62 = vpop.f32.mrf.mxu2  ;;  %v1651_v18 = vpop.f32.mrf.mxu1  ;;  %v4130_v11 = vunpack.c.l.b16 %v3847_v28  ;;  %v4441_v21 = vrot.slane %v6930_v27, 5 }
 0x1e5   : > { %v2286_v59 = vpop.f32.mrf.mxu3  ;;  %v2046_v58 = vadd.f32 %v1999_v62, %v1647_v37  ;;  %v6942_v37 = vld [vmem:[#allocation2 + $0x58] sm:$0xf]  ;;  %v5767_v62 = vld [vmem:[#allocation2 + $0x48] sm:$0xff]  ;;  %v3857_v46 = vsel %vm6152_vm13, %v3852_v26, %v3856_v61  ;;  %v1652_v63 = vadd.f32 %v1651_v18, %v6543_v12  ;;  %v5973_v12 = vld [vmem:[#allocation2 + $0x5c] sm:$0x1] }
 0x1e6   : > { %v2335_v42 = vadd.f32 %v2286_v59, %v2045_v43  ;;  %v2940_v13 = vpop.f32.mrf.mxu0  ;;  %v3859_v59 = vshrl.u32 %v5628_v57, 16  ;;  %v3868_v20 = vshll.u32 %v6942_v37, 16  ;;  %v3872_v15 = vshrl.u32 %v6942_v37, 16 }
 0x1e7   : > { %5488 = vmatmul.msk.bf16.gmra.mxu1 %vm1309_vm12, %v3214_v53  ;;  %v3107_v53 = vsel %vm6443_vm1, %v3105_v48, %v3106_v7  ;;  %v4438_v7 = vrot.slane %v6915_v10, 5  ;;  %v3113_v18 = vrot.slane %v5973_v12, 5 }
 0x1e8   : > { %v6938_v43 = vadd.f32 %v2940_v13, %v2335_v42  ;;  %v3862_v42 = vshll.u32 %v5628_v57, 16  ;;  %v3189_v38 = vunpack.c.l.b16 %v3107_v53  ;;  %v5682_v13 = vld [vmem:[#allocation2 + $0x48] sm:$0xe]  ;;  %v3861_v4 = vrot.slane %v3859_v59, 4  ;;  %v6960_v57 = vld [vmem:[#allocation2 + $0x5c] sm:$0x1] }
 0x1e9   : > { %v3874_v22 = vrot.slane %v3872_v15, 4  ;;  %v4440_v10 = vrot.slane %v4438_v7, 4 }
 0x1ea   : > { %5665 = vmatmul.msk.bf16.gmra.mxu3 %vm1309_vm12, %v4157_v1  ;;  %v4555_v1 = vpack.c.b16 %v4527_v9, %v4526_v31  ;;  %v4131_v31 = vunpack.c.l.b16 %v3857_v46  ;;  %v3870_v9 = vrot.slane %v3868_v20, 5  ;;  %v3215_v48 = vpack.c.b16 %v3189_v38, %v3188_v50  ;;  %v5974_v20 = vld [vmem:[#allocation2 + $0x58] sm:$0xf]  ;;  %v5457_v46 = vld [vmem:[#allocation2 + $0x54] sm:$0xe] }
 0x1eb   : > { %v4442_v27 = vsel %vm6443_vm1, %v4440_v10, %v4441_v21  ;;  %v3110_v15 = vrot.slane %v5974_v20, 5 }
 0x1ec   : > { %v2001_v5 = vpop.f32.mrf.mxu2  ;;  %v1653_v19 = vpop.f32.mrf.mxu1  ;;  %v3875_v59 = vor.u32 %v3874_v22, %v3870_v9 }
 0x1ed   : > { %v2289_v30 = vpop.f32.mrf.mxu3  ;;  %v2047_v14 = vadd.f32 %v2001_v5, %v1649_v41  ;;  %v5699_v41 = vrot.slane %v5682_v13, 9  ;;  %v3112_v13 = vrot.slane %v3110_v15, 4 }
 0x1ee   : > { %v2336_v60 = vadd.f32 %v2289_v30, %v2046_v58  ;;  %v2943_v8 = vpop.f32.mrf.mxu0  ;;  %v3864_v58 = vrot.slane %v3862_v42, 5  ;;  %v3878_v42 = vshll.u32 %v6960_v57, 16  ;;  %v3876_v50 = vrot.slane %v3875_v59, 4 }
 0x1ef   : > { %v3114_v10 = vsel %vm6443_vm1, %v3112_v13, %v3113_v18 }
 0x1f0   : > { %v6956_v25 = vadd.f32 %v2943_v8, %v2336_v60  ;;  %v3865_v53 = vor.u32 %v3864_v58, %v3861_v4  ;;  %v4439_v60 = vsel %vm6443_vm1, %v5699_v41, %v4438_v7  ;;  %v3880_v38 = vrot.slane %v3878_v42, 5  ;;  %v5631_v4 = vld [vmem:[#allocation2 + $0x60] sm:$0xf] }
 0x1f1   : > { %5601 = vmatmul.msk.bf16.gmra.mxu2 %vm1309_vm12, %v5767_v62  ;;  %5714 = vmatmul.msk.bf16.gmra.mxu0 %vm1309_vm12, %v4555_v1  ;;  %v4158_v62 = vpack.c.b16 %v4131_v31, %v4130_v11  ;;  %v5474_v8 = vrot.slane %v5457_v46, 9  ;;  %v4528_v58 = vunpack.c.l.b16 %v4439_v60  ;;  %v4529_v11 = vunpack.c.l.b16 %v4442_v27  ;;  %v6973_v31 = vld [vmem:[#allocation2 + $0x64] sm:$0xf] }
 0x1f2   : > { %v3866_v28 = vrot.slane %v3865_v53, 4  ;;  %v1654_v7 = vadd.f32 %v1653_v19, %v6562_v55  ;;  %v3883_v55 = vshrl.u32 %v5631_v4, 16  ;;  %v3886_v19 = vshll.u32 %v5631_v4, 16 }
 0x1f3   : > { %v3111_v41 = vsel %vm6443_vm1, %v5474_v8, %v3110_v15  ;;  %v3892_v59 = vshll.u32 %v6973_v31, 16  ;;  %v3896_v42 = vshrl.u32 %v6973_v31, 16  ;;  %v4556_v12 = vpack.c.b16 %v4529_v11, %v4528_v58  ;;  %v6992_v58 = vld [vmem:[#allocation2 + $0x68] sm:$0x1] }
 0x1f4   : > { %v2004_v26 = vpop.f32.mrf.mxu2  ;;  %v1656_v61 = vpop.f32.mrf.mxu1  ;;  %v3871_v53 = vsel %vm6152_vm13, %v3866_v28, %v3870_v9  ;;  %v3191_v18 = vunpack.c.l.b16 %v3114_v10  ;;  %v3885_v15 = vrot.slane %v3883_v55, 4  ;;  %v3888_v28 = vrot.slane %v3886_v19, 5 }
 0x1f5   : > { %v2291_v5 = vpop.f32.mrf.mxu3  ;;  %v2048_v56 = vadd.f32 %v2004_v26, %v1652_v63  ;;  %v4445_v63 = vrot.slane %v6942_v37, 5  ;;  %v3881_v37 = vsel %vm6152_vm13, %v3876_v50, %v3880_v38  ;;  %v4132_v27 = vunpack.c.l.b16 %v3871_v53 }
 0x1f6   : > { %v2337_v30 = vadd.f32 %v2291_v5, %v2047_v14  ;;  %v2945_v1 = vpop.f32.mrf.mxu0  ;;  %v5768_v5 = vld [vmem:[#allocation2 + $0x54] sm:$0xff]  ;;  %v4133_v9 = vunpack.c.l.b16 %v3881_v37  ;;  %v4448_v50 = vrot.slane %v6960_v57, 5  ;;  %v3894_v38 = vrot.slane %v3892_v59, 5 }
 0x1f7   : > { %5489 = vmatmul.msk.bf16.gmra.mxu1 %vm1309_vm12, %v3215_v48  ;;  %v3898_v8 = vrot.slane %v3896_v42, 4  ;;  %v1657_v13 = vadd.f32 %v1656_v61, %v6572_v17  ;;  %v3902_v55 = vshll.u32 %v6992_v58, 16  ;;  %v5975_v17 = vld [vmem:[#allocation2 + $0x68] sm:$0x1] }
 0x1f8   : > { %v6969_v14 = vadd.f32 %v2945_v1, %v2337_v30  ;;  %v5683_v30 = vld [vmem:[#allocation2 + $0x54] sm:$0xe]  ;;  %v3190_v1 = vunpack.c.l.b16 %v3111_v41  ;;  %v4159_v41 = vpack.c.b16 %v4133_v9, %v4132_v27  ;;  %v3120_v61 = vrot.slane %v5975_v17, 5  ;;  %v5634_v9 = vld [vmem:[#allocation2 + $0x6c] sm:$0xf] }
 0x1f9   : > { %v5700_v20 = vrot.slane %v5683_v30, 9  ;;  %v3899_v30 = vor.u32 %v3898_v8, %v3894_v38  ;;  %v7008_v8 = vld [vmem:[#allocation2 + $0x70] sm:$0xf] }
 0x1fa   : > { %5666 = vmatmul.msk.bf16.gmra.mxu3 %vm1309_vm12, %v4158_v62  ;;  %v3216_v4 = vpack.c.b16 %v3191_v18, %v3190_v1  ;;  %v3904_v18 = vrot.slane %v3902_v55, 5  ;;  %v3916_v17 = vshll.u32 %v7008_v8, 16 }
 0x1fb   : > { %v4446_v10 = vsel %vm6443_vm1, %v5700_v20, %v4445_v63 }
 0x1fc   : > { %v2006_v22 = vpop.f32.mrf.mxu2  ;;  %v1658_v48 = vpop.f32.mrf.mxu1  ;;  %v4530_v59 = vunpack.c.l.b16 %v4446_v10 }
 0x1fd   : > { %v2294_v21 = vpop.f32.mrf.mxu3  ;;  %v2049_v26 = vadd.f32 %v2006_v22, %v1654_v7  ;;  %v1659_v20 = vadd.f32 %v1658_v48, %v6591_v52  ;;  %v4452_v52 = vrot.slane %v6973_v31, 5 }
 0x1fe   : > { %v2338_v62 = vadd.f32 %v2294_v21, %v2048_v56  ;;  %v2948_v60 = vpop.f32.mrf.mxu0  ;;  %v4447_v56 = vrot.slane %v4445_v63, 4  ;;  %v5458_v63 = vld [vmem:[#allocation2 + $0x60] sm:$0xe] }
 0x200   : > { %v6987_v46 = vadd.f32 %v2948_v60, %v2338_v62  ;;  %v4449_v57 = vsel %vm6443_vm1, %v4447_v56, %v4448_v50  ;;  %v5976_v62 = vld [vmem:[#allocation2 + $0x64] sm:$0xf]  ;;  %v5475_v60 = vrot.slane %v5458_v63, 9 }
 0x201   : > { %5602 = vmatmul.msk.bf16.gmra.mxu2 %vm1309_vm12, %v5768_v5  ;;  %5715 = vmatmul.msk.bf16.gmra.mxu0 %vm1309_vm12, %v4556_v12  ;;  %v3889_v5 = vor.u32 %v3888_v28, %v3885_v15  ;;  %v3117_v37 = vrot.slane %v5976_v62, 5  ;;  %v4531_v42 = vunpack.c.l.b16 %v4449_v57  ;;  %v3910_v57 = vshll.u32 %v5634_v9, 16 }
 0x203   : > { %v3890_v12 = vrot.slane %v3889_v5, 4  ;;  %v3119_v27 = vrot.slane %v3117_v37, 4  ;;  %v3118_v56 = vsel %vm6443_vm1, %v5475_v60, %v3117_v37  ;;  %v5684_v5 = vld [vmem:[#allocation2 + $0x60] sm:$0xe]  ;;  %v3918_v60 = vrot.slane %v3916_v17, 5 }
 0x204   : > { %v2009_v11 = vpop.f32.mrf.mxu2  ;;  %v1661_v7 = vpop.f32.mrf.mxu1  ;;  %v5701_v37 = vrot.slane %v5684_v5, 9  ;;  %v5977_v5 = vld [vmem:[#allocation2 + $0x70] sm:$0xf] }
 0x205   : > { %v2296_v22 = vpop.f32.mrf.mxu3  ;;  %v2050_v21 = vadd.f32 %v2009_v11, %v1657_v13  ;;  %v3121_v50 = vsel %vm6443_vm1, %v3119_v27, %v3120_v61  ;;  %v4557_v13 = vpack.c.b16 %v4531_v42, %v4530_v59  ;;  %v3920_v61 = vshrl.u32 %v7008_v8, 16 }
 0x206   : > { %v2339_v53 = vadd.f32 %v2296_v22, %v2049_v26  ;;  %v2950_v19 = vpop.f32.mrf.mxu0  ;;  %v3900_v26 = vrot.slane %v3899_v30, 4  ;;  %v5769_v22 = vld [vmem:[#allocation2 + $0x60] sm:$0xff]  ;;  %v3192_v30 = vunpack.c.l.b16 %v3118_v56  ;;  %v3193_v55 = vunpack.c.l.b16 %v3121_v50 }
 0x207   : > { %5490 = vmatmul.msk.bf16.gmra.mxu1 %vm1309_vm12, %v3216_v4  ;;  %v4454_v42 = vrot.slane %v4452_v52, 4  ;;  %v3922_v27 = vrot.slane %v3920_v61, 4 }
 0x208   : > { %v7000_v1 = vadd.f32 %v2950_v19, %v2339_v53  ;;  %v3905_v10 = vsel %vm6152_vm13, %v3900_v26, %v3904_v18  ;;  %v3907_v53 = vshrl.u32 %v5634_v9, 16  ;;  %v3217_v26 = vpack.c.b16 %v3193_v55, %v3192_v30  ;;  %v5459_v30 = vld [vmem:[#allocation2 + $0x6c] sm:$0xe]  ;;  %v5637_v55 = vld [vmem:[#allocation2 + $0x78] sm:$0xf] }
 0x209   : > { %v3912_v18 = vrot.slane %v3910_v57, 5  ;;  %v5476_v17 = vrot.slane %v5459_v30, 9 }
 0x20a   : > { %7638 = vst [vmem:[#allocation11_spill] sm:$0xff] %v7000_v1  ;;  %5667 = vmatmul.msk.bf16.gmra.mxu3 %vm1309_vm12, %v4159_v41  ;;  %v3895_v41 = vsel %vm6152_vm13, %v3890_v12, %v3894_v38  ;;  %v4135_v38 = vunpack.c.l.b16 %v3905_v10  ;;  %v4455_v12 = vrot.slane %v6992_v58, 5  ;;  %v3909_v63 = vrot.slane %v3907_v53, 4 }
 0x20b   : > { %v4134_v62 = vunpack.c.l.b16 %v3895_v41  ;;  %v3923_v41 = vor.u32 %v3922_v27, %v3918_v60  ;;  %v3124_v53 = vrot.slane %v5977_v5, 5 }
 0x20c   : > { %v2011_v15 = vpop.f32.mrf.mxu2  ;;  %v1663_v28 = vpop.f32.mrf.mxu1  ;;  %v4456_v58 = vsel %vm6443_vm1, %v4454_v42, %v4455_v12 }
 0x20d   : > { %v2299_v4 = vpop.f32.mrf.mxu3  ;;  %v2051_v11 = vadd.f32 %v2011_v15, %v1659_v20  ;;  %v7023_v15 = vld [vmem:[#allocation2 + $0x74] sm:$0x1]  ;;  %v3126_v61 = vrot.slane %v3124_v53, 4  ;;  %v3924_v42 = vrot.slane %v3923_v41, 4 }
 0x20e   : > { %v2340_v48 = vadd.f32 %v2299_v4, %v2050_v21  ;;  %v2953_v19 = vpop.f32.mrf.mxu0  ;;  %v7640_v21 = vld [vmem:[#allocation3_spill] sm:$0xff] }
 0x20f   : > { %v1662_v59 = vadd.f32 %v1661_v7, %v7640_v21  ;;  %v4453_v7 = vsel %vm6443_vm1, %v5701_v37, %v4452_v52  ;;  %v4533_v52 = vunpack.c.l.b16 %v4456_v58  ;;  %v7642_v37 = vld [vmem:[#allocation4_spill] sm:$0xff]  ;;  %v3934_v58 = vshll.u32 %v5637_v55, 16 }
 0x210   : > { %v7018_v31 = vadd.f32 %v2953_v19, %v2340_v48  ;;  %v3926_v48 = vshll.u32 %v7023_v15, 16  ;;  %v4532_v57 = vunpack.c.l.b16 %v4453_v7  ;;  %v5978_v19 = vld [vmem:[#allocation2 + $0x74] sm:$0x1]  ;;  %v1664_v21 = vadd.f32 %v1663_v28, %v7642_v37  ;;  %v5685_v7 = vld [vmem:[#allocation2 + $0x6c] sm:$0xe] }
 0x211   : > { %5603 = vmatmul.msk.bf16.gmra.mxu2 %vm1309_vm12, %v5769_v22  ;;  %5716 = vmatmul.msk.bf16.gmra.mxu0 %vm1309_vm12, %v4557_v13  ;;  %v4160_v22 = vpack.c.b16 %v4135_v38, %v4134_v62  ;;  %v3913_v13 = vor.u32 %v3912_v18, %v3909_v63  ;;  %v3127_v62 = vrot.slane %v5978_v19, 5  ;;  %v7034_v38 = vld [vmem:[#allocation2 + $0x7c] sm:$0xf]  ;;  %v3125_v18 = vsel %vm6443_vm1, %v5476_v17, %v3124_v53 }
 0x212   : > { %7639 = vst [vmem:[#allocation12_spill] sm:$0xff] %v7018_v31  ;;  %v3928_v12 = vrot.slane %v3926_v48, 5  ;;  %v3940_v28 = vshll.u32 %v7034_v38, 16  ;;  %v4558_v41 = vpack.c.b16 %v4533_v52, %v4532_v57  ;;  %v3194_v30 = vunpack.c.l.b16 %v3125_v18 }
 0x213   : > { %v3128_v27 = vsel %vm6443_vm1, %v3126_v61, %v3127_v62  ;;  %v5702_v19 = vrot.slane %v5685_v7, 9 }
 0x214   : > { %v2014_v20 = vpop.f32.mrf.mxu2  ;;  %v1666_v9 = vpop.f32.mrf.mxu1  ;;  %v3929_v53 = vsel %vm6152_vm13, %v3924_v42, %v3928_v12  ;;  %v3195_v17 = vunpack.c.l.b16 %v3128_v27  ;;  %v7051_v37 = vrot.slane %v3940_v28, 5 }
 0x215   : > { %v2301_v56 = vpop.f32.mrf.mxu3  ;;  %v2052_v50 = vadd.f32 %v2014_v20, %v1662_v59  ;;  %v3914_v59 = vrot.slane %v3913_v13, 4  ;;  %v3931_v20 = vshrl.u32 %v5637_v55, 16  ;;  %v3944_v13 = vshrl.u32 %v7034_v38, 16 }
 0x216   : > { %v2341_v4 = vadd.f32 %v2301_v56, %v2051_v11  ;;  %v2955_v10 = vpop.f32.mrf.mxu0  ;;  %v3936_v55 = vrot.slane %v3934_v58, 5  ;;  %v4137_v52 = vunpack.c.l.b16 %v3929_v53  ;;  %v3218_v12 = vpack.c.b16 %v3195_v17, %v3194_v30  ;;  %v5640_v30 = vld [vmem:[#allocation2 + $0x84] sm:$0xf] }
 0x217   : > { %5491 = vmatmul.msk.bf16.gmra.mxu1 %vm1309_vm12, %v3217_v26  ;;  %v3919_v5 = vsel %vm6152_vm13, %v3914_v59, %v3918_v60  ;;  %v3933_v62 = vrot.slane %v3931_v20, 4  ;;  %v3946_v57 = vrot.slane %v3944_v13, 4  ;;  %v4462_v60 = vrot.slane %v7023_v15, 5  ;;  %v7644_v59 = vld [vmem:[#allocation5_spill] sm:$0xff] }
 0x218   : > { %v7031_v11 = vadd.f32 %v2955_v10, %v2341_v4  ;;  %v4459_v10 = vrot.slane %v7008_v8, 5  ;;  %v4136_v8 = vunpack.c.l.b16 %v3919_v5  ;;  %v1667_v42 = vadd.f32 %v1666_v9, %v7644_v59  ;;  %v5979_v5 = vld [vmem:[#allocation2 + $0x7c] sm:$0xf] }
 0x219   : > { %v3937_v7 = vor.u32 %v3936_v55, %v3933_v62  ;;  %v3947_v58 = vor.u32 %v3946_v57, %v7051_v37  ;;  %v3131_v53 = vrot.slane %v5979_v5, 5  ;;  %v7069_v62 = vld [vmem:[#allocation2 + $0x88] sm:$0xf]  ;;  %v5771_v5 = vld [vmem:[#allocation2 + $0x78] sm:$0xff] }
 0x21a   : > { %7641 = vst [vmem:[#allocation3_spill] sm:$0xff] %v7031_v11  ;;  %5668 = vmatmul.msk.bf16.gmra.mxu3 %vm1309_vm12, %v4160_v22  ;;  %v5770_v22 = vld [vmem:[#allocation2 + $0x6c] sm:$0xff]  ;;  %v4161_v15 = vpack.c.b16 %v4137_v52, %v4136_v8  ;;  %v5980_v52 = vld [vmem:[#allocation2 + $0x80] sm:$0x1] }
 0x21b   : > { %v3133_v8 = vrot.slane %v3131_v53, 4  ;;  %v7650_v11 = vld [vmem:[#allocation8_spill] sm:$0xff] }
 0x21c   : > { %v2016_v63 = vpop.f32.mrf.mxu2  ;;  %v7037_v26 = vpop.f32.mrf.mxu1 }
 0x21d   : > { %v2304_v56 = vpop.f32.mrf.mxu3  ;;  %v2053_v4 = vadd.f32 %v2016_v63, %v1664_v21  ;;  %v4461_v21 = vrot.slane %v4459_v10, 4  ;;  %v7058_v63 = vld [vmem:[#allocation2 + $0x80] sm:$0x1] }
 0x21e   : > { %v2342_v48 = vadd.f32 %v2304_v56, %v2052_v50  ;;  %v2958_v61 = vpop.f32.mrf.mxu0  ;;  %v4460_v56 = vsel %vm6443_vm1, %v5702_v19, %v4459_v10  ;;  %v3950_v9 = vshll.u32 %v7058_v63, 16  ;;  %v3938_v10 = vrot.slane %v3937_v7, 4  ;;  %v5460_v19 = vld [vmem:[#allocation2 + $0x78] sm:$0xe] }
 0x21f   : > { %v4463_v13 = vsel %vm6443_vm1, %v4461_v21, %v4462_v60  ;;  %v5477_v57 = vrot.slane %v5460_v19, 9  ;;  %v3134_v21 = vrot.slane %v5980_v52, 5  ;;  %v7646_v60 = vld [vmem:[#allocation6_spill] sm:$0xff] }
 0x220   : > { %v7053_v50 = vadd.f32 %v2958_v61, %v2342_v48  ;;  %v4534_v48 = vunpack.c.l.b16 %v4460_v56  ;;  %v4535_v17 = vunpack.c.l.b16 %v4463_v13  ;;  %v3948_v61 = vrot.slane %v3947_v58, 4 }
 0x221   : > { %5604 = vmatmul.msk.bf16.gmra.mxu2 %vm1309_vm12, %v5770_v22  ;;  %5717 = vmatmul.msk.bf16.gmra.mxu0 %vm1309_vm12, %v4558_v41  ;;  %v3952_v55 = vrot.slane %v3950_v9, 5  ;;  %v1669_v59 = vadd.f32 %v7037_v26, %v7646_v60  ;;  %v3132_v58 = vsel %vm6443_vm1, %v5477_v57, %v3131_v53  ;;  %v3968_v13 = vshrl.u32 %v7069_v62, 16 }
 0x222   : > { %7643 = vst [vmem:[#allocation4_spill] sm:$0xff] %v7053_v50  ;;  %v4559_v9 = vpack.c.b16 %v4535_v17, %v4534_v48  ;;  %v3196_v52 = vunpack.c.l.b16 %v3132_v58 }
 0x223   : > { %v3953_v19 = vsel %vm6152_vm13, %v3948_v61, %v3952_v55 }
 0x224   : > { %v2019_v18 = vpop.f32.mrf.mxu2  ;;  %v7060_v27 = vpop.f32.mrf.mxu1  ;;  %v4139_v61 = vunpack.c.l.b16 %v3953_v19 }
 0x225   : > { %v2306_v20 = vpop.f32.mrf.mxu3  ;;  %v2054_v22 = vadd.f32 %v2019_v18, %v1667_v42  ;;  %v5686_v42 = vld [vmem:[#allocation2 + $0x78] sm:$0xe]  ;;  %v3955_v18 = vshrl.u32 %v5640_v30, 16 }
 0x226   : > { %v2343_v28 = vadd.f32 %v2306_v20, %v2053_v4  ;;  %v2960_v41 = vpop.f32.mrf.mxu0  ;;  %v3958_v20 = vshll.u32 %v5640_v30, 16  ;;  %v3943_v30 = vsel %vm6152_vm13, %v3938_v10, %v7051_v37  ;;  %v5703_v53 = vrot.slane %v5686_v42, 9 }
 0x227   : > { %5492 = vmatmul.msk.bf16.gmra.mxu1 %vm1309_vm12, %v3218_v12  ;;  %v4466_v12 = vrot.slane %v7034_v38, 5  ;;  %v4138_v10 = vunpack.c.l.b16 %v3943_v30 }
 0x228   : > { %v7071_v4 = vadd.f32 %v2960_v41, %v2343_v28  ;;  %v3135_v28 = vsel %vm6443_vm1, %v3133_v8, %v3134_v21  ;;  %v4469_v8 = vrot.slane %v7058_v63, 5  ;;  %v3960_v48 = vrot.slane %v3958_v20, 5 }
 0x229   : > { %v4468_v57 = vrot.slane %v4466_v12, 4  ;;  %v3197_v21 = vunpack.c.l.b16 %v3135_v28  ;;  %v4467_v63 = vsel %vm6443_vm1, %v5703_v53, %v4466_v12 }
 0x22a   : > { %7645 = vst [vmem:[#allocation5_spill] sm:$0xff] %v7071_v4  ;;  %5669 = vmatmul.msk.bf16.gmra.mxu3 %vm1309_vm12, %v4161_v15  ;;  %v3964_v15 = vshll.u32 %v7069_v62, 16  ;;  %v3957_v4 = vrot.slane %v3955_v18, 4  ;;  %v4536_v12 = vunpack.c.l.b16 %v4467_v63  ;;  %v5982_v63 = vld [vmem:[#allocation2 + $0x8c] sm:$0x1] }
 0x22b   : > { %v3219_v55 = vpack.c.b16 %v3197_v21, %v3196_v52  ;;  %v4470_v42 = vsel %vm6443_vm1, %v4468_v57, %v4469_v8  ;;  %v7110_v52 = vld [vmem:[#allocation2 + $0x94] sm:$0xf]  ;;  %v4473_v21 = vrot.slane %v7069_v62, 5 }
 0x22c   : > { %v2021_v56 = vpop.f32.mrf.mxu2  ;;  %v7077_v7 = vpop.f32.mrf.mxu1  ;;  %v7091_v17 = vrot.slane %v3964_v15, 5 }
 0x22d   : > { %v2309_v26 = vpop.f32.mrf.mxu3  ;;  %v2055_v41 = vadd.f32 %v2021_v56, %v1669_v59  ;;  %v3970_v59 = vrot.slane %v3968_v13, 4  ;;  %v3961_v56 = vor.u32 %v3960_v48, %v3957_v4  ;;  %v5981_v4 = vld [vmem:[#allocation2 + $0x88] sm:$0xf] }
 0x22e   : > { %v2344_v38 = vadd.f32 %v2309_v26, %v2054_v22  ;;  %v2963_v60 = vpop.f32.mrf.mxu0  ;;  %v7094_v22 = vld [vmem:[#allocation2 + $0x8c] sm:$0x1]  ;;  %v4162_v26 = vpack.c.b16 %v4139_v61, %v4138_v10  ;;  %v3138_v8 = vrot.slane %v5981_v4, 5 }
 0x22f   : > { %v3971_v58 = vor.u32 %v3970_v59, %v7091_v17  ;;  %v3974_v28 = vshll.u32 %v7094_v22, 16  ;;  %v3962_v19 = vrot.slane %v3961_v56, 4  ;;  %v3992_v56 = vshrl.u32 %v7110_v52, 16 }
 0x230   : > { %v7096_v37 = vadd.f32 %v2963_v60, %v2344_v38  ;;  %v4537_v38 = vunpack.c.l.b16 %v4470_v42  ;;  %v3140_v61 = vrot.slane %v3138_v8, 4  ;;  %v3988_v42 = vshll.u32 %v7110_v52, 16 }
 0x231   : > { %5605 = vmatmul.msk.bf16.gmra.mxu2 %vm1309_vm12, %v5771_v5  ;;  %5718 = vmatmul.msk.bf16.gmra.mxu0 %vm1309_vm12, %v4559_v9  ;;  %v5643_v5 = vld [vmem:[#allocation2 + $0x90] sm:$0xf]  ;;  %v3366_v9 = vadd.f32 %v7060_v27, %v6663_v54  ;;  %v3972_v53 = vrot.slane %v3971_v58, 4  ;;  %v3976_v57 = vrot.slane %v3974_v28, 5  ;;  %v5687_v27 = vld [vmem:[#allocation2 + $0x84] sm:$0xe] }
 0x232   : > { %7647 = vst [vmem:[#allocation6_spill] sm:$0xff] %v7096_v37  ;;  %v3979_v60 = vshrl.u32 %v5643_v5, 16  ;;  %v3982_v48 = vshll.u32 %v5643_v5, 16  ;;  %v4560_v58 = vpack.c.b16 %v4537_v38, %v4536_v12  ;;  %v3967_v5 = vsel %vm6152_vm13, %v3962_v19, %v7091_v17 }
 0x233   : > { %v4475_v12 = vrot.slane %v4473_v21, 4  ;;  %v4476_v4 = vrot.slane %v7094_v22, 5  ;;  %v3994_v17 = vrot.slane %v3992_v56, 4  ;;  %v7142_v22 = vld [vmem:[%s7616_s3] ss:$0 sm:$0xff] }
 0x234   : > { %v3576_v18 = vpop.f32.mrf.mxu2  ;;  %v7103_v20 = vpop.f32.mrf.mxu1 }
 0x235   : > { %v2311_v15 = vpop.f32.mrf.mxu3  ;;  %v3656_v54 = vadd.f32 %v3576_v18, %v3366_v9  ;;  %v3977_v9 = vsel %vm6152_vm13, %v3972_v53, %v3976_v57  ;;  %v3367_v53 = vadd.f32 %v7077_v7, %v6677_v51  ;;  %v4477_v56 = vsel %vm6443_vm1, %v4475_v12, %v4476_v4  ;;  %v7160_v4 = vld [vmem:[#allocation2 + $0xa0] sm:$0xf] }
 0x236   : > { %v2345_v13 = vadd.f32 %v2311_v15, %v2055_v41  ;;  %v2965_v30 = vpop.f32.mrf.mxu0  ;;  %v5461_v41 = vld [vmem:[#allocation2 + $0x84] sm:$0xe] }
 0x237   : > { %5493 = vmatmul.msk.bf16.gmra.mxu1 %vm1309_vm12, %v3219_v55  ;;  %v5478_v10 = vrot.slane %v5461_v41, 9  ;;  %v3141_v55 = vrot.slane %v5982_v63, 5  ;;  %v3981_v41 = vrot.slane %v3979_v60, 4  ;;  %v3984_v63 = vrot.slane %v3982_v48, 5  ;;  %v7145_v48 = vld [vmem:[#allocation2 + $0x98] sm:$0x1] }
 0x238   : > { %v7113_v59 = vadd.f32 %v2965_v30, %v2345_v13  ;;  %v5704_v30 = vrot.slane %v5687_v27, 9  ;;  %v4140_v60 = vunpack.c.l.b16 %v3967_v5  ;;  %v4141_v27 = vunpack.c.l.b16 %v3977_v9  ;;  %v5646_v9 = vld [vmem:[#allocation2 + $0x9c] sm:$0xf] }
 0x239   : > { %v3139_v15 = vsel %vm6443_vm1, %v5478_v10, %v3138_v8  ;;  %v3142_v13 = vsel %vm6443_vm1, %v3140_v61, %v3141_v55  ;;  %v7133_v8 = vld [vmem:[%s7615_s2] ss:$0 sm:$0xff]  ;;  %v7135_v55 = vrot.slane %v3988_v42, 5 }
 0x23a   : > { %7648 = vst [vmem:[#allocation13_spill] sm:$0xff] %v7113_v59  ;;  %5670 = vmatmul.msk.bf16.gmra.mxu3 %vm1309_vm12, %v4162_v26  ;;  %v5772_v26 = vld [vmem:[#allocation2 + $0x84] sm:$0xff]  ;;  %v3198_v10 = vunpack.c.l.b16 %v3139_v15  ;;  %v3199_v61 = vunpack.c.l.b16 %v3142_v13  ;;  %v4474_v42 = vsel %vm6443_vm1, %v5704_v30, %v4473_v21  ;;  %v3985_v15 = vor.u32 %v3984_v63, %v3981_v41 }
 0x23b   : > { %v3995_v13 = vor.u32 %v3994_v17, %v7135_v55  ;;  %v4163_v12 = vpack.c.b16 %v4141_v27, %v4140_v60  ;;  %v3368_v63 = vadd.f32 %v7103_v20, %v6683_v49  ;;  %v4003_v27 = vshrl.u32 %v5646_v9, 16 }
 0x23c   : > { %v3578_v28 = vpop.f32.mrf.mxu2  ;;  %v7118_v62 = vpop.f32.mrf.mxu1  ;;  %v3220_v7 = vpack.c.b16 %v3199_v61, %v3198_v10  ;;  %v3986_v10 = vrot.slane %v3985_v15, 4  ;;  %v4012_v59 = vshll.u32 %v7160_v4, 16  ;;  %v5984_v15 = vld [vmem:[#allocation2 + $0x98] sm:$0x1] }
 0x23d   : > { %v4230_v18 = vpop.f32.mrf.mxu3  ;;  %v3996_v61 = vrot.slane %v3995_v13, 4  ;;  %v3148_v13 = vrot.slane %v5984_v15, 5  ;;  %v7189_v15 = vld [vmem:[#allocation2 + $0xa4] sm:$0x1]  ;;  %v3369_v50 = vadd.f32 %v7118_v62, %v6696_v32 }
 0x23e   : > { %v4310_v38 = vadd.f32 %v4230_v18, %v3656_v54  ;;  %v4628_v19 = vpop.f32.mrf.mxu0  ;;  %v3657_v54 = vadd.f32 %v3578_v28, %v3367_v53  ;;  %v3998_v28 = vshll.u32 %v7145_v48, 16  ;;  %v5688_v53 = vld [vmem:[#allocation2 + $0x90] sm:$0xe]  ;;  %v4022_v32 = vshll.u32 %v7189_v15, 16 }
 0x240   : > { %v4708_v57 = vadd.f32 %v4628_v19, %v4310_v38  ;;  %v4538_v38 = vunpack.c.l.b16 %v4474_v42  ;;  %v4000_v19 = vrot.slane %v3998_v28, 5 }
 0x241   : > { %5606 = vmatmul.msk.bf16.gmra.mxu2 %vm1309_vm12, %v5772_v26  ;;  %5719 = vmatmul.msk.bf16.gmra.mxu0 %vm1309_vm12, %v4560_v58  ;;  %v4539_v58 = vunpack.c.l.b16 %v4477_v56 }
 0x242   : > { %v4744_v51 = vmul.f32 %v7133_v8, %v4708_v57  ;;  %v4480_v57 = vrot.slane %v7110_v52, 5 }
 0x243   : > { %v4561_v52 = vpack.c.b16 %v4539_v58, %v4538_v38  ;;  %v5773_v58 = vld [vmem:[#allocation2 + $0x90] sm:$0xff] }
 0x244   : > { %v3581_v18 = vpop.f32.mrf.mxu2  ;;  %v7154_v26 = vpop.f32.mrf.mxu1  ;;  %v7158_v5 = vadd.f32 %v7142_v22, %v4744_v51  ;;  %v5462_v51 = vld [vmem:[#allocation2 + $0x90] sm:$0xe] }
 0x245   : > { %v4232_v21 = vpop.f32.mrf.mxu3  ;;  %v3658_v49 = vadd.f32 %v3581_v18, %v3368_v63  ;;  %v5479_v20 = vrot.slane %v5462_v51, 9  ;;  %v7186_v51 = vrot.slane %v4012_v59, 5 }
 0x246   : > { %v4311_v30 = vadd.f32 %v4232_v21, %v3657_v54  ;;  %v4812_v41 = vsub.f32 0.0, %v7158_v5  ;;  %v4630_v17 = vpop.f32.mrf.mxu0  ;;  %v5983_v54 = vld [vmem:[#allocation2 + $0x94] sm:$0xf]  ;;  %v4006_v21 = vshll.u32 %v5646_v9, 16  ;;  %v3991_v9 = vsel %vm6152_vm13, %v3986_v10, %v7135_v55 }
 0x247   : > { %5494 = vmatmul.msk.bf16.gmra.mxu1 %vm1309_vm12, %v3220_v7  ;;  %v3145_v60 = vrot.slane %v5983_v54, 5  ;;  %v4016_v54 = vshrl.u32 %v7160_v4, 16  ;;  %v4483_v55 = vrot.slane %v7145_v48, 5 }
 0x248   : > { %v4844_v42 = vmul.f32 1.442695, %v4812_v41  ;;  %v4709_v56 = vadd.f32 %v4630_v17, %v4311_v30  ;;  %v5705_v30 = vrot.slane %v5688_v53, 9  ;;  %v4001_v17 = vsel %vm6152_vm13, %v3996_v61, %v4000_v19 }
 0x249   : > { %v3147_v7 = vrot.slane %v3145_v60, 4  ;;  %v3146_v18 = vsel %vm6443_vm1, %v5479_v20, %v3145_v60  ;;  %v4005_v53 = vrot.slane %v4003_v27, 4  ;;  %v4142_v61 = vunpack.c.l.b16 %v3991_v9 }
 0x24a   : > { %5671 = vmatmul.msk.bf16.gmra.mxu3 %vm1309_vm12, %v4163_v12  ;;  %5809 = vpow2.f32 %v4844_v42  ;;  %v4745_v28 = vmul.f32 %v7133_v8, %v4709_v56  ;;  %v4482_v42 = vrot.slane %v4480_v57, 4  ;;  %v4008_v56 = vrot.slane %v4006_v21, 5 }
 0x24b   : > { %v3149_v12 = vsel %vm6443_vm1, %v3147_v7, %v3148_v13  ;;  %v3200_v20 = vunpack.c.l.b16 %v3146_v18  ;;  %v4018_v13 = vrot.slane %v4016_v54, 4  ;;  %v7195_v48 = vsel %vm6443_vm1, %v5705_v30, %v4480_v57  ;;  %v5649_v30 = vld [vmem:[#allocation2 + $0xa8] sm:$0xf] }
 0x24c   : > { %v3583_v37 = vpop.f32.mrf.mxu2  ;;  %v7174_v41 = vpop.f32.mrf.mxu1  ;;  %v7181_v63 = vadd.f32 %v7142_v22, %v4745_v28  ;;  %v3201_v7 = vunpack.c.l.b16 %v3149_v12  ;;  %v4143_v21 = vunpack.c.l.b16 %v4001_v17  ;;  %v4009_v12 = vor.u32 %v4008_v56, %v4005_v53  ;;  %v7649_v53 = vld [vmem:[#allocation7_spill] sm:$0xff] }
 0x24d   : > { %v4235_v38 = vpop.f32.mrf.mxu3  ;;  %v3659_v18 = vadd.f32 %v3583_v37, %v3369_v50  ;;  %v4019_v9 = vor.u32 %v4018_v13, %v7186_v51  ;;  %v4027_v17 = vshrl.u32 %v5649_v30, 16  ;;  %v3370_v56 = vadd.f32 %v7154_v26, %v7649_v53 }
 0x24e   : > { %v4312_v10 = vadd.f32 %v4235_v38, %v3658_v49  ;;  %v4813_v60 = vsub.f32 0.0, %v7181_v63  ;;  %v4633_v28 = vpop.f32.mrf.mxu0  ;;  %v7200_v49 = vsel %vm6443_vm1, %v4482_v42, %v4483_v55  ;;  %v3221_v57 = vpack.c.b16 %v3201_v7, %v3200_v20  ;;  %v7215_v7 = vld [vmem:[#allocation2 + $0xac] sm:$0xf] }
 0x24f   : > { %v4030_v42 = vshll.u32 %v5649_v30, 16  ;;  %v4164_v55 = vpack.c.b16 %v4143_v21, %v4142_v61  ;;  %v4010_v20 = vrot.slane %v4009_v12, 4  ;;  %v4487_v61 = vrot.slane %v7160_v4, 5  ;;  %v5985_v21 = vld [vmem:[#allocation2 + $0xa0] sm:$0xf] }
 0x250   : > { %v5810_v19 = vpop.eup %5809  ;;  %v4846_v27 = vmul.f32 1.442695, %v4813_v60  ;;  %v4710_v59 = vadd.f32 %v4633_v28, %v4312_v10  ;;  %v4541_v60 = vunpack.c.l.b16 %v7200_v49  ;;  %v4020_v28 = vrot.slane %v4019_v9, 4  ;;  %v5463_v30 = vld [vmem:[#allocation2 + $0x9c] sm:$0xe] }
 0x251   : > { %5607 = vmatmul.msk.bf16.gmra.mxu2 %vm1309_vm12, %v5773_v58  ;;  %v4908_v54 = vadd.f32 1.0, %v5810_v19  ;;  %5720 = vmatmul.msk.bf16.gmra.mxu0 %vm1309_vm12, %v4561_v52  ;;  %v4540_v52 = vunpack.c.l.b16 %v7195_v48  ;;  %v4024_v19 = vrot.slane %v4022_v32, 5  ;;  %v4029_v26 = vrot.slane %v4027_v17, 4 }
 0x252   : > { %5811 = vpow2.f32 %v4846_v27  ;;  %v4746_v62 = vmul.f32 %v7133_v8, %v4710_v59  ;;  %v5689_v59 = vld [vmem:[#allocation2 + $0x9c] sm:$0xe]  ;;  %v4040_v53 = vshrl.u32 %v7215_v7, 16  ;;  %v5480_v32 = vrot.slane %v5463_v30, 9 }
 0x253   : > { %5813 = vrcp.f32 %v4908_v54  ;;  %v3152_v54 = vrot.slane %v5985_v21, 5  ;;  %v3371_v31 = vadd.f32 %v7174_v41, %v7650_v11 }
 0x254   : > { %v3586_v38 = vpop.f32.mrf.mxu2  ;;  %v7206_v58 = vpop.f32.mrf.mxu1  ;;  %v7209_v50 = vadd.f32 %v7142_v22, %v4746_v62 }
 0x255   : > { %v4237_v37 = vpop.f32.mrf.mxu3  ;;  %v3660_v48 = vadd.f32 %v3586_v38, %v3370_v56  ;;  %v3154_v9 = vrot.slane %v3152_v54, 4  ;;  %v5986_v38 = vld [vmem:[#allocation2 + $0xa4] sm:$0x1]  ;;  %v4015_v56 = vsel %vm6152_vm13, %v4010_v20, %v7186_v51  ;;  %v4025_v51 = vsel %vm6152_vm13, %v4020_v28, %v4024_v19 }
 0x256   : > { %v4313_v10 = vadd.f32 %v4237_v37, %v3659_v18  ;;  %v4814_v13 = vsub.f32 0.0, %v7209_v50  ;;  %v4635_v27 = vpop.f32.mrf.mxu0  ;;  %v4032_v18 = vrot.slane %v4030_v42, 5  ;;  %v4036_v37 = vshll.u32 %v7215_v7, 16 }
 0x257   : > { %5495 = vmatmul.msk.bf16.gmra.mxu1 %vm1309_vm12, %v3221_v57  ;;  %v3155_v17 = vrot.slane %v5986_v38, 5  ;;  %v4489_v20 = vrot.slane %v4487_v61, 4  ;;  %v4562_v38 = vpack.c.b16 %v4541_v60, %v4540_v52  ;;  %v4144_v28 = vunpack.c.l.b16 %v4015_v56 }
 0x258   : > { %v5812_v49 = vpop.eup %5811  ;;  %v4848_v12 = vmul.f32 1.442695, %v4814_v13  ;;  %v4711_v62 = vadd.f32 %v4635_v27, %v4313_v10  ;;  %v5706_v27 = vrot.slane %v5689_v59, 9  ;;  %v4490_v59 = vrot.slane %v7189_v15, 5 }
 0x259   : > { %v5814_v57 = vpop.eup %5813  ;;  %v4909_v4 = vadd.f32 1.0, %v5812_v49  ;;  %v3156_v49 = vsel %vm6443_vm1, %v3154_v9, %v3155_v17  ;;  %v4145_v19 = vunpack.c.l.b16 %v4025_v51 }
 0x25a   : > { %5672 = vmatmul.msk.bf16.gmra.mxu3 %vm1309_vm12, %v4164_v55  ;;  %v4972_v42 = vmul.f32 %v5814_v57, %v7158_v5  ;;  %5815 = vpow2.f32 %v4848_v12  ;;  %v4747_v10 = vmul.f32 %v7133_v8, %v4711_v62  ;;  %v3153_v55 = vsel %vm6443_vm1, %v5480_v32, %v3152_v54  ;;  %v5774_v62 = vld [vmem:[#allocation2 + $0x9c] sm:$0xff]  ;;  %v7248_v57 = vld [vmem:[#allocation2 + $0xb0] sm:$0x1] }
 0x25b   : > { %5817 = vrcp.f32 %v4909_v4  ;;  %v4033_v54 = vor.u32 %v4032_v18, %v4029_v26  ;;  %v7250_v4 = vrot.slane %v4036_v37, 5  ;;  %v4042_v32 = vrot.slane %v4040_v53, 4 }
 0x25c   : > { %v3588_v13 = vpop.f32.mrf.mxu2  ;;  %v7234_v21 = vpop.f32.mrf.mxu1  ;;  %5005 = vst.msk [vmem:[%s7226_s25] sm:$0xff] %vm5004_vm0, %v4972_v42  ;;  %v7243_v5 = vadd.f32 %v7142_v22, %v4747_v10  ;;  %v3202_v17 = vunpack.c.l.b16 %v3153_v55  ;;  %v3203_v42 = vunpack.c.l.b16 %v3156_v49  ;;  %v7257_v15 = vsel %vm6443_vm1, %v5706_v27, %v4487_v61 }
 0x25d   : > { %v4240_v12 = vpop.f32.mrf.mxu3  ;;  %v7262_v52 = vsel %vm6443_vm1, %v4489_v20, %v4490_v59  ;;  %v4046_v60 = vshll.u32 %v7248_v57, 16  ;;  %v3661_v41 = vadd.f32 %v3588_v13, %v3371_v31  ;;  %v7265_v53 = vrot.slane %v4033_v54, 4  ;;  %v7651_v59 = vld [vmem:[#allocation9_spill] sm:$0xff] }
 0x25e   : > { %v4314_v30 = vadd.f32 %v4240_v12, %v3660_v48  ;;  %v4815_v9 = vsub.f32 0.0, %v7243_v5  ;;  %v4638_v10 = vpop.f32.mrf.mxu0  ;;  %v4043_v61 = vor.u32 %v4042_v32, %v7250_v4  ;;  %v3222_v55 = vpack.c.b16 %v3203_v42, %v3202_v17 }
 0x25f   : > { %v4542_v51 = vunpack.c.l.b16 %v7257_v15  ;;  %v4543_v54 = vunpack.c.l.b16 %v7262_v52  ;;  %v4039_v32 = vsel %vm6152_vm13, %v7265_v53, %v7250_v4  ;;  %v4048_v42 = vrot.slane %v4046_v60, 5  ;;  %v5987_v15 = vld [vmem:[#allocation2 + $0xac] sm:$0xf] }
 0x260   : > { %v5816_v48 = vpop.eup %5815  ;;  %v4850_v26 = vmul.f32 1.442695, %v4815_v9  ;;  %v4712_v18 = vadd.f32 %v4638_v10, %v4314_v30  ;;  %v3372_v30 = vadd.f32 %v7206_v58, %v7651_v59  ;;  %v7286_v9 = vld [vmem:[#allocation2 + $0xb8] sm:$0xf]  ;;  %v4044_v17 = vrot.slane %v4043_v61, 4 }
 0x261   : > { %5608 = vmatmul.msk.bf16.gmra.mxu2 %vm1309_vm12, %v5774_v62  ;;  %v5818_v37 = vpop.eup %5817  ;;  %v4910_v11 = vadd.f32 1.0, %v5816_v48  ;;  %5721 = vmatmul.msk.bf16.gmra.mxu0 %vm1309_vm12, %v4562_v38  ;;  %v4165_v62 = vpack.c.b16 %v4145_v19, %v4144_v28  ;;  %v4494_v10 = vrot.slane %v7215_v7, 5  ;;  %v5690_v58 = vld [vmem:[#allocation2 + $0xa8] sm:$0xe]  ;;  %v3159_v48 = vrot.slane %v5987_v15, 5 }
 0x262   : > { %v4973_v56 = vmul.f32 %v5818_v37, %v7181_v63  ;;  %5819 = vpow2.f32 %v4850_v26  ;;  %v4748_v27 = vmul.f32 %v7133_v8, %v4712_v18  ;;  %v5652_v63 = vld [vmem:[#allocation2 + $0xb4] sm:$0xf]  ;;  %v4064_v53 = vshrl.u32 %v7286_v9, 16  ;;  %v5775_v15 = vld [vmem:[#allocation2 + $0xa8] sm:$0xff] }
 0x263   : > { %5821 = vrcp.f32 %v4910_v11  ;;  %v4051_v26 = vshrl.u32 %v5652_v63, 16  ;;  %v4054_v18 = vshll.u32 %v5652_v63, 16  ;;  %v5464_v11 = vld [vmem:[#allocation2 + $0xa8] sm:$0xe]  ;;  %v3161_v60 = vrot.slane %v3159_v48, 4 }
 0x264   : > { %v3591_v49 = vpop.f32.mrf.mxu2  ;;  %v7271_v12 = vpop.f32.mrf.mxu1  ;;  %5006 = vst.msk [vmem:[%s7226_s25 + $0x8] sm:$0xff] %vm5004_vm0, %v4973_v56  ;;  %v7276_v31 = vadd.f32 %v7142_v22, %v4748_v27  ;;  %v5481_v7 = vrot.slane %v5464_v11, 9  ;;  %v5988_v27 = vld [vmem:[#allocation2 + $0xb0] sm:$0x1]  ;;  %v5707_v63 = vrot.slane %v5690_v58, 9  ;;  %v4497_v59 = vrot.slane %v7248_v57, 5 }
 0x265   : > { %v4242_v13 = vpop.f32.mrf.mxu3  ;;  %v3662_v19 = vadd.f32 %v3591_v49, %v3372_v30  ;;  %v4049_v58 = vsel %vm6152_vm13, %v4044_v17, %v4048_v42  ;;  %v4053_v57 = vrot.slane %v4051_v26, 4  ;;  %v4056_v11 = vrot.slane %v4054_v18, 5 }
 0x266   : > { %v4315_v20 = vadd.f32 %v4242_v13, %v3661_v41  ;;  %v4816_v38 = vsub.f32 0.0, %v7276_v31  ;;  %v4640_v28 = vpop.f32.mrf.mxu0  ;;  %v4060_v41 = vshll.u32 %v7286_v9, 16  ;;  %v4146_v1 = vunpack.c.l.b16 %v4039_v32 }
 0x267   : > { %5496 = vmatmul.msk.bf16.gmra.mxu1 %vm1309_vm12, %v3222_v55  ;;  %v3162_v55 = vrot.slane %v5988_v27, 5  ;;  %v4147_v17 = vunpack.c.l.b16 %v4049_v58  ;;  %v7319_v42 = vsel %vm6443_vm1, %v5707_v63, %v4494_v10  ;;  %v4501_v58 = vrot.slane %v7286_v9, 5 }
 0x268   : > { %v5820_v52 = vpop.eup %5819  ;;  %v4852_v37 = vmul.f32 1.442695, %v4816_v38  ;;  %v4713_v4 = vadd.f32 %v4640_v28, %v4315_v20  ;;  %v3160_v38 = vsel %vm6443_vm1, %v5481_v7, %v3159_v48  ;;  %v7312_v48 = vrot.slane %v4060_v41, 5 }
 0x269   : > { %v5822_v56 = vpop.eup %5821  ;;  %v4911_v61 = vadd.f32 1.0, %v5820_v52  ;;  %v4496_v52 = vrot.slane %v4494_v10, 4  ;;  %v4563_v7 = vpack.c.b16 %v4543_v54, %v4542_v51 }
 0x26a   : > { %5673 = vmatmul.msk.bf16.gmra.mxu3 %vm1309_vm12, %v4165_v62  ;;  %v4974_v49 = vmul.f32 %v5822_v56, %v7209_v50  ;;  %5823 = vpow2.f32 %v4852_v37  ;;  %v4749_v13 = vmul.f32 %v7133_v8, %v4713_v4  ;;  %v3163_v62 = vsel %vm6443_vm1, %v3161_v60, %v3162_v55  ;;  %v7310_v4 = vld [vmem:[#allocation2 + $0xbc] sm:$0x1] }
 0x26b   : > { %5825 = vrcp.f32 %v4911_v61  ;;  %v4066_v56 = vrot.slane %v4064_v53, 4  ;;  %v3204_v60 = vunpack.c.l.b16 %v3160_v38  ;;  %v3205_v27 = vunpack.c.l.b16 %v3163_v62 }
 0x26c   : > { %v3593_v20 = vpop.f32.mrf.mxu2  ;;  %v7297_v30 = vpop.f32.mrf.mxu1  ;;  %5007 = vst.msk [vmem:[%s7226_s25 + $0x10] sm:$0xff] %vm5004_vm0, %v4974_v49  ;;  %v7306_v50 = vadd.f32 %v7142_v22, %v4749_v13  ;;  %v7652_v49 = vld [vmem:[#allocation10_spill] sm:$0xff]  ;;  %v7324_v51 = vsel %vm6443_vm1, %v4496_v52, %v4497_v59  ;;  %v4070_v54 = vshll.u32 %v7310_v4, 16  ;;  %v4057_v53 = vor.u32 %v4056_v11, %v4053_v57 }
 0x26d   : > { %v4245_v28 = vpop.f32.mrf.mxu3  ;;  %v3373_v13 = vadd.f32 %v7234_v21, %v7652_v49  ;;  %v4067_v38 = vor.u32 %v4066_v56, %v7312_v48  ;;  %v3223_v62 = vpack.c.b16 %v3205_v27, %v3204_v60  ;;  %v4544_v57 = vunpack.c.l.b16 %v7319_v42 }
 0x26e   : > { %v4316_v37 = vadd.f32 %v4245_v28, %v3662_v19  ;;  %v4817_v61 = vsub.f32 0.0, %v7306_v50  ;;  %v4643_v55 = vpop.f32.mrf.mxu0  ;;  %v3374_v56 = vadd.f32 %v7271_v12, %v6750_v24  ;;  %v4072_v27 = vrot.slane %v4070_v54, 5 }
 0x26f   : > { %v3663_v32 = vadd.f32 %v3593_v20, %v3373_v13  ;;  %v4068_v9 = vrot.slane %v4067_v38, 4  ;;  %v4503_v13 = vrot.slane %v4501_v58, 4 }
 0x270   : > { %v5824_v19 = vpop.eup %5823  ;;  %v4854_v26 = vmul.f32 1.442695, %v4817_v61  ;;  %v4714_v18 = vadd.f32 %v4643_v55, %v4316_v37  ;;  %v5655_v37 = vld [vmem:[#allocation2 + $0xc0] sm:$0xf]  ;;  %v4545_v61 = vunpack.c.l.b16 %v7324_v51 }
 0x271   : > { %5609 = vmatmul.msk.bf16.gmra.mxu2 %vm1309_vm12, %v5775_v15  ;;  %v5826_v41 = vpop.eup %5825  ;;  %v4912_v21 = vadd.f32 1.0, %v5824_v19  ;;  %5722 = vmatmul.msk.bf16.gmra.mxu0 %vm1309_vm12, %v4563_v7  ;;  %v5691_v15 = vld [vmem:[#allocation2 + $0xb4] sm:$0xe]  ;;  %v4058_v7 = vrot.slane %v4057_v53, 4  ;;  %v7346_v19 = vld [vmem:[#allocation2 + $0xc4] sm:$0xf] }
 0x272   : > { %v4975_v10 = vmul.f32 %v5826_v41, %v7243_v5  ;;  %5827 = vpow2.f32 %v4854_v26  ;;  %v4750_v63 = vmul.f32 %v7133_v8, %v4714_v18  ;;  %v4166_v5 = vpack.c.b16 %v4147_v17, %v4146_v1  ;;  %v5989_v17 = vld [vmem:[#allocation2 + $0xb8] sm:$0xf]  ;;  %v5465_v41 = vld [vmem:[#allocation2 + $0xb4] sm:$0xe] }
 0x273   : > { %5829 = vrcp.f32 %v4912_v21  ;;  %v5708_v55 = vrot.slane %v5691_v15, 9  ;;  %v4504_v1 = vrot.slane %v7310_v4, 5  ;;  %v3166_v42 = vrot.slane %v5989_v17, 5  ;;  %v5776_v17 = vld [vmem:[#allocation2 + $0xb4] sm:$0xff] }
 0x274   : > { %v3596_v59 = vpop.f32.mrf.mxu2  ;;  %v7331_v28 = vpop.f32.mrf.mxu1  ;;  %5008 = vst.msk [vmem:[%s7226_s25 + $0x18] sm:$0xff] %vm5004_vm0, %v4975_v10  ;;  %v7337_v20 = vadd.f32 %v7142_v22, %v4750_v63  ;;  %v4075_v26 = vshrl.u32 %v5655_v37, 16  ;;  %v4078_v21 = vshll.u32 %v5655_v37, 16  ;;  %v5482_v54 = vrot.slane %v5465_v41, 9  ;;  %v5990_v10 = vld [vmem:[#allocation2 + $0xbc] sm:$0x1] }
 0x275   : > { %v4247_v52 = vpop.f32.mrf.mxu3  ;;  %v3664_v51 = vadd.f32 %v3596_v59, %v3374_v56  ;;  %v3168_v38 = vrot.slane %v3166_v42, 4  ;;  %v3169_v4 = vrot.slane %v5990_v10, 5  ;;  %v4084_v15 = vshll.u32 %v7346_v19, 16 }
 0x276   : > { %v4317_v11 = vadd.f32 %v4247_v52, %v3663_v32  ;;  %v4818_v60 = vsub.f32 0.0, %v7337_v20  ;;  %v4645_v49 = vpop.f32.mrf.mxu0  ;;  %v3167_v37 = vsel %vm6443_vm1, %v5482_v54, %v3166_v42  ;;  %v4564_v56 = vpack.c.b16 %v4545_v61, %v4544_v57 }
 0x277   : > { %5497 = vmatmul.msk.bf16.gmra.mxu1 %vm1309_vm12, %v3223_v62  ;;  %v4063_v42 = vsel %vm6152_vm13, %v4058_v7, %v7312_v48  ;;  %v4502_v41 = vsel %vm6443_vm1, %v5708_v55, %v4501_v58  ;;  %v4505_v57 = vsel %vm6443_vm1, %v4503_v13, %v4504_v1  ;;  %v4080_v54 = vrot.slane %v4078_v21, 5  ;;  %v347_v13 = vld [vmem:[#allocation2 + $0xd4] sm:$0x1] }
 0x278   : > { %v5828_v24 = vpop.eup %5827  ;;  %v4856_v12 = vmul.f32 1.442695, %v4818_v60  ;;  %v4715_v18 = vadd.f32 %v4645_v49, %v4317_v11  ;;  %v4088_v11 = vshrl.u32 %v7346_v19, 16  ;;  %v3375_v49 = vadd.f32 %v7297_v30, %v6768_v29 }
 0x279   : > { %v5830_v32 = vpop.eup %5829  ;;  %v4913_v53 = vadd.f32 1.0, %v5828_v24  ;;  %v291_v24 = vld [vmem:[#allocation2 + $0xcc] sm:$0x1]  ;;  %v4077_v30 = vrot.slane %v4075_v26, 4  ;;  %v4148_v58 = vunpack.c.l.b16 %v4063_v42  ;;  %v4546_v21 = vunpack.c.l.b16 %v4502_v41 }
 0x27a   : > { %5674 = vmatmul.msk.bf16.gmra.mxu3 %vm1309_vm12, %v4166_v5  ;;  %v4976_v63 = vmul.f32 %v5830_v32, %v7276_v31  ;;  %5831 = vpow2.f32 %v4856_v12  ;;  %v4751_v62 = vmul.f32 %v7133_v8, %v4715_v18  ;;  %v3170_v5 = vsel %vm6443_vm1, %v3168_v38, %v3169_v4 }
 0x27b   : > { %5833 = vrcp.f32 %v4913_v53  ;;  %v4073_v18 = vsel %vm6152_vm13, %v4068_v9, %v4072_v27  ;;  %v3206_v32 = vunpack.c.l.b16 %v3167_v37  ;;  %v3207_v29 = vunpack.c.l.b16 %v3170_v5 }
 0x27c   : > { %v3598_v59 = vpop.f32.mrf.mxu2  ;;  %v7352_v52 = vpop.f32.mrf.mxu1  ;;  %5009 = vst.msk [vmem:[%s7226_s25 + $0x20] sm:$0xff] %vm5004_vm0, %v4976_v63  ;;  %v7362_v31 = vadd.f32 %v7142_v22, %v4751_v62  ;;  %v7376_v38 = vrot.slane %v4084_v15, 5  ;;  %v4090_v48 = vrot.slane %v4088_v11, 4  ;;  %v292_v7 = vsel %vm6071_vm3, 0, %v291_v24  ;;  %v7381_v63 = vld [vmem:[#allocation2 + $0xc8] sm:$0x1] }
 0x27d   : > { %v4250_v60 = vpop.f32.mrf.mxu3  ;;  %v4149_v55 = vunpack.c.l.b16 %v4073_v18  ;;  %293 = vst [vmem:[#allocation2 + $0xcc] sm:$0x1] %v292_v7  ;;  %v3665_v26 = vadd.f32 %v3598_v59, %v3375_v49  ;;  %v4547_v4 = vunpack.c.l.b16 %v4505_v57  ;;  %v3224_v15 = vpack.c.b16 %v3207_v29, %v3206_v32  ;;  %v5466_v7 = vld [vmem:[#allocation2 + $0xc0] sm:$0xe] }
 0x27e   : > { %v4318_v12 = vadd.f32 %v4250_v60, %v3664_v51  ;;  %v4819_v61 = vsub.f32 0.0, %v7362_v31  ;;  %v4648_v53 = vpop.f32.mrf.mxu0  ;;  %v4081_v11 = vor.u32 %v4080_v54, %v4077_v30  ;;  %v4091_v60 = vor.u32 %v4090_v48, %v7376_v38 }
 0x27f   : > { %v348_v59 = vsel %vm6079_vm5, 0, %v347_v13  ;;  %v4167_v42 = vpack.c.b16 %v4149_v55, %v4148_v58  ;;  %v7401_v18 = vpack.c.b16 %v4547_v4, %v4546_v21  ;;  %v7404_v55 = vld [vmem:[#allocation2 + $0xd0] sm:$0xf] }
 0x280   : > { %v5832_v9 = vpop.eup %5831  ;;  %v4858_v27 = vmul.f32 1.442695, %v4819_v61  ;;  %v4716_v51 = vadd.f32 %v4648_v53, %v4318_v12  ;;  %349 = vst [vmem:[#allocation2 + $0xd4] sm:$0x1] %v348_v59  ;;  %v3376_v12 = vadd.f32 %v7331_v28, %v6776_v44  ;;  %v4082_v41 = vrot.slane %v4081_v11, 4  ;;  %v5777_v11 = vld [vmem:[#allocation2 + $0xc0] sm:$0xff] }
 0x281   : > { %5610 = vmatmul.msk.bf16.gmra.mxu2 %vm1309_vm12, %v5776_v17  ;;  %v5834_v1 = vpop.eup %5833  ;;  %v4914_v10 = vadd.f32 1.0, %v5832_v9  ;;  %5723 = vmatmul.msk.bf16.gmra.mxu0 %vm1309_vm12, %v4564_v56  ;;  %v4094_v56 = vshll.u32 %v7381_v63, 16  ;;  %v4092_v57 = vrot.slane %v4091_v60, 4  ;;  %v5991_v61 = vld [vmem:[#allocation2 + $0xc4] sm:$0xf]  ;;  %v5483_v44 = vrot.slane %v5466_v7, 9 }
 0x282   : > { %v4977_v3 = vmul.f32 %v5834_v1, %v7306_v50  ;;  %5835 = vpow2.f32 %v4858_v27  ;;  %v4752_v62 = vmul.f32 %v7133_v8, %v4716_v51  ;;  %v3173_v32 = vrot.slane %v5991_v61, 5  ;;  %v5992_v51 = vld [vmem:[#allocation2 + $0xc8] sm:$0x1] }
 0x283   : > { %5837 = vrcp.f32 %v4914_v10  ;;  %v4096_v48 = vrot.slane %v4094_v56, 5  ;;  %v3176_v58 = vrot.slane %v5992_v51, 5  ;;  %v4508_v10 = vrot.slane %v7346_v19, 5 }
 0x284   : > { %v3601_v37 = vpop.f32.mrf.mxu2  ;;  %v7386_v5 = vpop.f32.mrf.mxu1  ;;  %5010 = vst.msk [vmem:[%s7226_s25 + $0x28] sm:$0xff] %vm5004_vm0, %v4977_v3  ;;  %v7394_v50 = vadd.f32 %v7142_v22, %v4752_v62  ;;  %v3175_v28 = vrot.slane %v3173_v32, 4  ;;  %v4087_v4 = vsel %vm6152_vm13, %v4082_v41, %v7376_v38  ;;  %v5692_v3 = vld [vmem:[#allocation2 + $0xc0] sm:$0xe]  ;;  %v4108_v38 = vshll.u32 %v7404_v55, 16 }
 0x285   : > { %v4252_v49 = vpop.f32.mrf.mxu3  ;;  %v3666_v54 = vadd.f32 %v3601_v37, %v3376_v12  ;;  %v4097_v60 = vsel %vm6152_vm13, %v4092_v57, %v4096_v48  ;;  %v4112_v59 = vshrl.u32 %v7404_v55, 16  ;;  %v3377_v56 = vadd.f32 %v7352_v52, %v6789_v2 }
 0x286   : > { %v4319_v17 = vadd.f32 %v4252_v49, %v3665_v26  ;;  %v4820_v24 = vsub.f32 0.0, %v7394_v50  ;;  %v4650_v6 = vpop.f32.mrf.mxu0  ;;  %v5658_v26 = vld [vmem:[#allocation2 + $0xcc] sm:$0xf]  ;;  %v5709_v12 = vrot.slane %v5692_v3, 9  ;;  %v4511_v57 = vrot.slane %v7381_v63, 5 }
 0x287   : > { %5498 = vmatmul.msk.bf16.gmra.mxu1 %vm1309_vm12, %v3224_v15  ;;  %v3174_v15 = vsel %vm6443_vm1, %v5483_v44, %v3173_v32  ;;  %v4150_v32 = vunpack.c.l.b16 %v4087_v4  ;;  %v4114_v2 = vrot.slane %v4112_v59, 4  ;;  %v3378_v59 = vadd.f32 %v7386_v5, %v6802_v34 }
 0x288   : > { %v5836_v29 = vpop.eup %5835  ;;  %v4860_v30 = vmul.f32 1.442695, %v4820_v24  ;;  %v4717_v53 = vadd.f32 %v4650_v6, %v4319_v17  ;;  %v4099_v17 = vshrl.u32 %v5658_v26, 16  ;;  %v3208_v6 = vunpack.c.l.b16 %v3174_v15 }
 0x289   : > { %v5838_v9 = vpop.eup %5837  ;;  %v4915_v27 = vadd.f32 1.0, %v5836_v29  ;;  %v4151_v29 = vunpack.c.l.b16 %v4097_v60  ;;  %v4509_v3 = vsel %vm6443_vm1, %v5709_v12, %v4508_v10 }
 0x28a   : > { %5675 = vmatmul.msk.bf16.gmra.mxu3 %vm1309_vm12, %v4167_v42  ;;  %v4978_v13 = vmul.f32 %v5838_v9, %v7337_v20  ;;  %5839 = vpow2.f32 %v4860_v30  ;;  %v4753_v1 = vmul.f32 %v7133_v8, %v4717_v53  ;;  %v3177_v20 = vsel %vm6443_vm1, %v3175_v28, %v3176_v58 }
 0x28b   : > { %5841 = vrcp.f32 %v4915_v27  ;;  %v4102_v42 = vshll.u32 %v5658_v26, 16  ;;  %v3209_v41 = vunpack.c.l.b16 %v3177_v20  ;;  %v4510_v30 = vrot.slane %v4508_v10, 4  ;;  %v7440_v26 = vld [vmem:[#allocation2 + $0xd4] sm:$0x1] }
 0x28c   : > { %v3603_v21 = vpop.f32.mrf.mxu2  ;;  %v7412_v62 = vpop.f32.mrf.mxu1  ;;  %5011 = vst.msk [vmem:[%s7226_s25 + $0x30] sm:$0xff] %vm5004_vm0, %v4978_v13  ;;  %v7421_v19 = vadd.f32 %v7142_v22, %v4753_v1  ;;  %v4101_v44 = vrot.slane %v4099_v17, 4  ;;  %v4118_v60 = vshll.u32 %v7440_v26, 16  ;;  %v4548_v17 = vunpack.c.l.b16 %v4509_v3 }
 0x28d   : > { %v4255_v37 = vpop.f32.mrf.mxu3  ;;  %v3667_v27 = vadd.f32 %v3603_v21, %v3377_v56  ;;  %v4104_v28 = vrot.slane %v4102_v42, 5  ;;  %v3225_v58 = vpack.c.b16 %v3209_v41, %v3208_v6  ;;  %v4512_v15 = vsel %vm6443_vm1, %v4510_v30, %v4511_v57 }
 0x28e   : > { %v4320_v49 = vadd.f32 %v4255_v37, %v3666_v54  ;;  %v4821_v24 = vsub.f32 0.0, %v7421_v19  ;;  %v4653_v61 = vpop.f32.mrf.mxu0  ;;  %v7432_v54 = vrot.slane %v4108_v38, 5  ;;  %v4549_v42 = vunpack.c.l.b16 %v4512_v15 }
 0x28f   : > { %v4105_v20 = vor.u32 %v4104_v28, %v4101_v44  ;;  %v4120_v30 = vrot.slane %v4118_v60, 5  ;;  %v3379_v44 = vadd.f32 %v7412_v62, %v6814_v16  ;;  %v5693_v28 = vld [vmem:[#allocation2 + $0xcc] sm:$0xe]  ;;  %v4518_v15 = vrot.slane %v7440_v26, 5 }
 0x290   : > { %v5840_v53 = vpop.eup %5839  ;;  %v4862_v48 = vmul.f32 1.442695, %v4821_v24  ;;  %v4718_v7 = vadd.f32 %v4653_v61, %v4320_v49  ;;  %v4115_v37 = vor.u32 %v4114_v2, %v7432_v54  ;;  %v5710_v62 = vrot.slane %v5693_v28, 9 }
 0x291   : > { %5611 = vmatmul.msk.bf16.gmra.mxu2 %vm1309_vm12, %v5777_v11  ;;  %v5842_v52 = vpop.eup %5841  ;;  %v4916_v9 = vadd.f32 1.0, %v5840_v53  ;;  %5724 = vmatmul.msk.bf16.gmra.mxu0 %vm1309_vm12, %v7401_v18  ;;  %v4106_v41 = vrot.slane %v4105_v20, 4 }
 0x292   : > { %v4979_v51 = vmul.f32 %v5842_v52, %v7362_v31  ;;  %5843 = vpow2.f32 %v4862_v48  ;;  %v4754_v63 = vmul.f32 %v7133_v8, %v4718_v7  ;;  %v4168_v31 = vpack.c.b16 %v4151_v29, %v4150_v32  ;;  %v5778_v48 = vld [vmem:[#allocation2 + $0xcc] sm:$0xff] }
 0x293   : > { %5845 = vrcp.f32 %v4916_v9  ;;  %v4116_v61 = vrot.slane %v4115_v37, 4  ;;  %v4566_v52 = vpack.c.b16 %v4549_v42, %v4548_v17 }
 0x294   : > { %v3606_v13 = vpop.f32.mrf.mxu2  ;;  %v7438_v1 = vpop.f32.mrf.mxu1  ;;  %5012 = vst.msk [vmem:[%s7226_s25 + $0x38] sm:$0xff] %vm5004_vm0, %v4979_v51  ;;  %v7445_v21 = vadd.f32 %v7142_v22, %v4754_v63  ;;  %v4515_v51 = vrot.slane %v7404_v55, 5 }
 0x295   : > { %v4257_v4 = vpop.f32.mrf.mxu3  ;;  %v3668_v6 = vadd.f32 %v3606_v13, %v3378_v59  ;;  %v4121_v9 = vsel %vm6152_vm13, %v4116_v61, %v4120_v30 }
 0x296   : > { %v4321_v18 = vadd.f32 %v4257_v4, %v3667_v27  ;;  %v4822_v11 = vsub.f32 0.0, %v7445_v21  ;;  %v4655_v38 = vpop.f32.mrf.mxu0  ;;  %v4517_v55 = vrot.slane %v4515_v51, 4 }
 0x297   : > { %5499 = vmatmul.msk.bf16.gmra.mxu1 %vm1309_vm12, %v3225_v58 }
 0x298   : > { %v5844_v49 = vpop.eup %5843  ;;  %v4864_v56 = vmul.f32 1.442695, %v4822_v11  ;;  %v4719_v10 = vadd.f32 %v4655_v38, %v4321_v18  ;;  %v4153_v18 = vunpack.c.l.b16 %v4121_v9  ;;  %v4519_v26 = vsel %vm6443_vm1, %v4517_v55, %v4518_v15 }
 0x299   : > { %v5846_v24 = vpop.eup %5845  ;;  %v4917_v12 = vadd.f32 1.0, %v5844_v49  ;;  %v4516_v49 = vsel %vm6443_vm1, %v5710_v62, %v4515_v51 }
 0x29a   : > { %5676 = vmatmul.msk.bf16.gmra.mxu3 %vm1309_vm12, %v4168_v31  ;;  %v4980_v32 = vmul.f32 %v5846_v24, %v7394_v50  ;;  %5847 = vpow2.f32 %v4864_v56  ;;  %v4755_v29 = vmul.f32 %v7133_v8, %v4719_v10  ;;  %v4111_v50 = vsel %vm6152_vm13, %v4106_v41, %v7432_v54 }
 0x29b   : > { %5849 = vrcp.f32 %v4917_v12  ;;  %v4152_v54 = vunpack.c.l.b16 %v4111_v50  ;;  %v4550_v12 = vunpack.c.l.b16 %v4516_v49 }
 0x29c   : > { %v3608_v34 = vpop.f32.mrf.mxu2  ;;  %v7460_v5 = vpop.f32.mrf.mxu1  ;;  %5013 = vst.msk [vmem:[%s7226_s25 + $0x40] sm:$0xff] %vm5004_vm0, %v4980_v32  ;;  %v7465_v57 = vadd.f32 %v7142_v22, %v4755_v29  ;;  %v7503_v29 = vld [vmem:[%s7616_s3] ss:$0 sm:$0xff] }
 0x29d   : > { %v4260_v53 = vpop.f32.mrf.mxu3  ;;  %v3669_v3 = vadd.f32 %v3608_v34, %v3379_v44  ;;  %v4169_v59 = vpack.c.b16 %v4153_v18, %v4152_v54 }
 0x29e   : > { %v4322_v7 = vadd.f32 %v4260_v53, %v3668_v6  ;;  %v4823_v2 = vsub.f32 0.0, %v7465_v57  ;;  %v4658_v27 = vpop.f32.mrf.mxu0 }
 0x2a0   : > { %v5848_v63 = vpop.eup %5847  ;;  %v4866_v58 = vmul.f32 1.442695, %v4823_v2  ;;  %v4720_v13 = vadd.f32 %v4658_v27, %v4322_v7  ;;  %v3381_v2 = vadd.f32 %v7460_v5, %v6845_v23 }
 0x2a1   : > { %5612 = vmatmul.msk.bf16.gmra.mxu2 %vm1309_vm12, %v5778_v48  ;;  %v5850_v4 = vpop.eup %5849  ;;  %v4918_v31 = vadd.f32 1.0, %v5848_v63  ;;  %5725 = vmatmul.msk.bf16.gmra.mxu0 %vm1309_vm12, %v4566_v52 }
 0x2a2   : > { %v4981_v35 = vmul.f32 %v5850_v4, %v7421_v19  ;;  %5851 = vpow2.f32 %v4866_v58  ;;  %v4756_v16 = vmul.f32 %v7133_v8, %v4720_v13  ;;  %v3380_v8 = vadd.f32 %v7438_v1, %v6832_v33  ;;  %v7495_v33 = vld [vmem:[%s7615_s2] ss:$0 sm:$0xff] }
 0x2a3   : > { %5853 = vrcp.f32 %v4918_v31  ;;  %v4551_v1 = vunpack.c.l.b16 %v4519_v26 }
 0x2a4   : > { %v3611_v20 = vpop.f32.mrf.mxu2  ;;  %v3326_v37 = vpop.f32.mrf.mxu1  ;;  %5014 = vst.msk [vmem:[%s7226_s25 + $0x48] sm:$0xff] %vm5004_vm0, %v4981_v35  ;;  %v4792_v11 = vadd.f32 %v7142_v22, %v4756_v16 }
 0x2a5   : > { %v4262_v60 = vpop.f32.mrf.mxu3  ;;  %v3670_v6 = vadd.f32 %v3611_v20, %v3380_v8  ;;  %v4567_v48 = vpack.c.b16 %v4551_v1, %v4550_v12  ;;  %v3382_v54 = vadd.f32 %v3326_v37, %v6863_v45 }
 0x2a6   : > { %v4323_v38 = vadd.f32 %v4262_v60, %v3669_v3  ;;  %v4824_v19 = vsub.f32 0.0, %v4792_v11  ;;  %v4660_v56 = vpop.f32.mrf.mxu0 }
 0x2a8   : > { %v5852_v10 = vpop.eup %5851  ;;  %v4868_v17 = vmul.f32 1.442695, %v4824_v19  ;;  %v4721_v42 = vadd.f32 %v4660_v56, %v4323_v38 }
 0x2a9   : > { %v5854_v24 = vpop.eup %5853  ;;  %v4919_v22 = vadd.f32 1.0, %v5852_v10 }
 0x2aa   : > { %5677 = vmatmul.msk.bf16.gmra.mxu3 %vm1309_vm12, %v4169_v59  ;;  %v4982_v41 = vmul.f32 %v5854_v24, %v7445_v21  ;;  %5855 = vpow2.f32 %v4868_v17  ;;  %v4757_v39 = vmul.f32 %v7495_v33, %v4721_v42 }
 0x2ab   : > { %5857 = vrcp.f32 %v4919_v22 }
 0x2ac   : > { %v3613_v61 = vpop.f32.mrf.mxu2  ;;  %v3328_v32 = vpop.f32.mrf.mxu1  ;;  %5015 = vst.msk [vmem:[%s7226_s25 + $0x50] sm:$0xff] %vm5004_vm0, %v4982_v41  ;;  %v4793_v21 = vadd.f32 %v7503_v29, %v4757_v39 }
 0x2ad   : > { %v4265_v30 = vpop.f32.mrf.mxu3  ;;  %v3671_v28 = vadd.f32 %v3613_v61, %v3381_v2  ;;  %v3383_v56 = vadd.f32 %v3328_v32, %v6876_v40 }
 0x2ae   : > { %v4324_v34 = vadd.f32 %v4265_v30, %v3670_v6  ;;  %v4825_v53 = vsub.f32 0.0, %v4793_v21  ;;  %v4663_v7 = vpop.f32.mrf.mxu0 }
 0x2b0   : > { %v5856_v52 = vpop.eup %5855  ;;  %v4870_v50 = vmul.f32 1.442695, %v4825_v53  ;;  %v4722_v9 = vadd.f32 %v4663_v7, %v4324_v34 }
 0x2b1   : > { %v5858_v27 = vpop.eup %5857  ;;  %v4920_v44 = vadd.f32 1.0, %v5856_v52  ;;  %5726 = vmatmul.msk.bf16.gmra.mxu0 %vm1309_vm12, %v4567_v48 }
 0x2b2   : > { %v4983_v51 = vmul.f32 %v5858_v27, %v7465_v57  ;;  %5859 = vpow2.f32 %v4870_v50  ;;  %v4758_v63 = vmul.f32 %v7495_v33, %v4722_v9 }
 0x2b3   : > { %5861 = vrcp.f32 %v4920_v44 }
 0x2b4   : > { %v3616_v58 = vpop.f32.mrf.mxu2  ;;  %v3331_v13 = vpop.f32.mrf.mxu1  ;;  %5016 = vst.msk [vmem:[%s7226_s25 + $0x58] sm:$0xff] %vm5004_vm0, %v4983_v51  ;;  %v4794_v23 = vadd.f32 %v7503_v29, %v4758_v63 }
 0x2b5   : > { %v4267_v5 = vpop.f32.mrf.mxu3  ;;  %v3672_v55 = vadd.f32 %v3616_v58, %v3382_v54  ;;  %v3384_v32 = vadd.f32 %v3331_v13, %v6894_v36 }
 0x2b6   : > { %v4325_v4 = vadd.f32 %v4267_v5, %v3671_v28  ;;  %v4826_v31 = vsub.f32 0.0, %v4794_v23  ;;  %v4665_v3 = vpop.f32.mrf.mxu0 }
 0x2b8   : > { %v5860_v57 = vpop.eup %5859  ;;  %v4872_v18 = vmul.f32 1.442695, %v4826_v31  ;;  %v4723_v35 = vadd.f32 %v4665_v3, %v4325_v4 }
 0x2b9   : > { %v5862_v16 = vpop.eup %5861  ;;  %v4921_v62 = vadd.f32 1.0, %v5860_v57 }
 0x2ba   : > { %v4984_v15 = vmul.f32 %v5862_v16, %v4792_v11  ;;  %5863 = vpow2.f32 %v4872_v18  ;;  %v4759_v20 = vmul.f32 %v7495_v33, %v4723_v35 }
 0x2bb   : > { %5865 = vrcp.f32 %v4921_v62 }
 0x2bc   : > { %v3618_v60 = vpop.f32.mrf.mxu2  ;;  %v3333_v38 = vpop.f32.mrf.mxu1  ;;  %5017 = vst.msk [vmem:[%s7226_s25 + $0x60] sm:$0xff] %vm5004_vm0, %v4984_v15  ;;  %v4795_v59 = vadd.f32 %v7503_v29, %v4759_v20 }
 0x2bd   : > { %v4270_v19 = vpop.f32.mrf.mxu3  ;;  %v3673_v42 = vadd.f32 %v3618_v60, %v3383_v56  ;;  %v3385_v63 = vadd.f32 %v3333_v38, %v6907_v0 }
 0x2be   : > { %v4326_v49 = vadd.f32 %v4270_v19, %v3672_v55  ;;  %v4827_v45 = vsub.f32 0.0, %v4795_v59  ;;  %v4668_v37 = vpop.f32.mrf.mxu0 }
 0x2c0   : > { %v5864_v8 = vpop.eup %5863  ;;  %v4874_v26 = vmul.f32 1.442695, %v4827_v45  ;;  %v4724_v11 = vadd.f32 %v4668_v37, %v4326_v49 }
 0x2c1   : > { %v5866_v10 = vpop.eup %5865  ;;  %v4922_v17 = vadd.f32 1.0, %v5864_v8 }
 0x2c2   : > { %v4985_v24 = vmul.f32 %v5866_v10, %v4793_v21  ;;  %5867 = vpow2.f32 %v4874_v26  ;;  %v4760_v22 = vmul.f32 %v7495_v33, %v4724_v11 }
 0x2c3   : > { %5869 = vrcp.f32 %v4922_v17 }
 0x2c4   : > { %v3621_v12 = vpop.f32.mrf.mxu2  ;;  %v3336_v6 = vpop.f32.mrf.mxu1  ;;  %5018 = vst.msk [vmem:[%s7226_s25 + $0x68] sm:$0xff] %vm5004_vm0, %v4985_v24  ;;  %v4796_v41 = vadd.f32 %v7503_v29, %v4760_v22 }
 0x2c5   : > { %v4272_v39 = vpop.f32.mrf.mxu3  ;;  %v3674_v7 = vadd.f32 %v3621_v12, %v3384_v32  ;;  %v3386_v15 = vadd.f32 %v3336_v6, %v6925_v47 }
 0x2c6   : > { %v4327_v1 = vadd.f32 %v4272_v39, %v3673_v42  ;;  %v4828_v40 = vsub.f32 0.0, %v4796_v41  ;;  %v4670_v61 = vpop.f32.mrf.mxu0 }
 0x2c8   : > { %v5868_v30 = vpop.eup %5867  ;;  %v4876_v34 = vmul.f32 1.442695, %v4828_v40  ;;  %v4725_v21 = vadd.f32 %v4670_v61, %v4327_v1 }
 0x2c9   : > { %v5870_v53 = vpop.eup %5869  ;;  %v4923_v48 = vadd.f32 1.0, %v5868_v30 }
 0x2ca   : > { %v4986_v2 = vmul.f32 %v5870_v53, %v4794_v23  ;;  %5871 = vpow2.f32 %v4876_v34  ;;  %v4761_v52 = vmul.f32 %v7495_v33, %v4725_v21 }
 0x2cb   : > { %5873 = vrcp.f32 %v4923_v48 }
 0x2cc   : > { %v3623_v50 = vpop.f32.mrf.mxu2  ;;  %v3338_v9 = vpop.f32.mrf.mxu1  ;;  %5019 = vst.msk [vmem:[%s7226_s25 + $0x70] sm:$0xff] %vm5004_vm0, %v4986_v2  ;;  %v4797_v27 = vadd.f32 %v7503_v29, %v4761_v52 }
 0x2cd   : > { %v4275_v44 = vpop.f32.mrf.mxu3  ;;  %v3675_v31 = vadd.f32 %v3623_v50, %v3385_v63  ;;  %v3387_v42 = vadd.f32 %v3338_v9, %v6938_v43 }
 0x2ce   : > { %v4328_v28 = vadd.f32 %v4275_v44, %v3674_v7  ;;  %v4829_v36 = vsub.f32 0.0, %v4797_v27  ;;  %v4673_v51 = vpop.f32.mrf.mxu0 }
 0x2d0   : > { %v5872_v58 = vpop.eup %5871  ;;  %v4878_v13 = vmul.f32 1.442695, %v4829_v36  ;;  %v4726_v23 = vadd.f32 %v4673_v51, %v4328_v28 }
 0x2d1   : > { %v5874_v5 = vpop.eup %5873  ;;  %v4924_v4 = vadd.f32 1.0, %v5872_v58 }
 0x2d2   : > { %v4987_v3 = vmul.f32 %v5874_v5, %v4795_v59  ;;  %5875 = vpow2.f32 %v4878_v13  ;;  %v4762_v54 = vmul.f32 %v7495_v33, %v4726_v23 }
 0x2d3   : > { %5877 = vrcp.f32 %v4924_v4 }
 0x2d4   : > { %v3626_v57 = vpop.f32.mrf.mxu2  ;;  %v3341_v18 = vpop.f32.mrf.mxu1  ;;  %5020 = vst.msk [vmem:[%s7226_s25 + $0x78] sm:$0xff] %vm5004_vm0, %v4987_v3  ;;  %v4798_v35 = vadd.f32 %v7503_v29, %v4762_v54 }
 0x2d5   : > { %v4277_v16 = vpop.f32.mrf.mxu3  ;;  %v3676_v49 = vadd.f32 %v3626_v57, %v3386_v15  ;;  %v3388_v48 = vadd.f32 %v3341_v18, %v6956_v25 }
 0x2d6   : > { %v4329_v0 = vadd.f32 %v4277_v16, %v3675_v31  ;;  %v4830_v62 = vsub.f32 0.0, %v4798_v35  ;;  %v4675_v55 = vpop.f32.mrf.mxu0 }
 0x2d8   : > { %v5876_v20 = vpop.eup %5875  ;;  %v4880_v60 = vmul.f32 1.442695, %v4830_v62  ;;  %v4727_v38 = vadd.f32 %v4675_v55, %v4329_v0 }
 0x2d9   : > { %v5878_v59 = vpop.eup %5877  ;;  %v4925_v19 = vadd.f32 1.0, %v5876_v20 }
 0x2da   : > { %v4988_v45 = vmul.f32 %v5878_v59, %v4796_v41  ;;  %5879 = vpow2.f32 %v4880_v60  ;;  %v4763_v37 = vmul.f32 %v7495_v33, %v4727_v38 }
 0x2db   : > { %5881 = vrcp.f32 %v4925_v19 }
 0x2dc   : > { %v3628_v56 = vpop.f32.mrf.mxu2  ;;  %5021 = vst.msk [vmem:[%s7226_s25 + $0x80] sm:$0xff] %vm5004_vm0, %v4988_v45  ;;  %v4799_v8 = vadd.f32 %v7503_v29, %v4763_v37  ;;  %v3343_v11 = vpop.f32.mrf.mxu1 }
 0x2dd   : > { %v4280_v26 = vpop.f32.mrf.mxu3  ;;  %v3677_v39 = vadd.f32 %v3628_v56, %v3387_v42  ;;  %v3389_v23 = vadd.f32 %v3343_v11, %v6969_v14 }
 0x2de   : > { %v4330_v47 = vadd.f32 %v4280_v26, %v3676_v49  ;;  %v4831_v10 = vsub.f32 0.0, %v4799_v8  ;;  %v4678_v17 = vpop.f32.mrf.mxu0 }
 0x2e0   : > { %v5880_v24 = vpop.eup %5879  ;;  %v4882_v22 = vmul.f32 1.442695, %v4831_v10  ;;  %v4728_v12 = vadd.f32 %v4678_v17, %v4330_v47 }
 0x2e1   : > { %v5882_v6 = vpop.eup %5881  ;;  %v4926_v41 = vadd.f32 1.0, %v5880_v24  ;;  %v7653_v24 = vld [vmem:[#allocation11_spill] sm:$0xff] }
 0x2e2   : > { %v4989_v1 = vmul.f32 %v5882_v6, %v4797_v27  ;;  %5883 = vpow2.f32 %v4882_v22  ;;  %v4764_v40 = vmul.f32 %v7495_v33, %v4728_v12 }
 0x2e3   : > { %5885 = vrcp.f32 %v4926_v41 }
 0x2e4   : > { %v3631_v61 = vpop.f32.mrf.mxu2  ;;  %5022 = vst.msk [vmem:[%s7226_s25 + $0x88] sm:$0xff] %vm5004_vm0, %v4989_v1  ;;  %v4800_v32 = vadd.f32 %v7503_v29, %v4764_v40  ;;  %v3346_v21 = vpop.f32.mrf.mxu1 }
 0x2e5   : > { %v4282_v30 = vpop.f32.mrf.mxu3  ;;  %v3678_v27 = vadd.f32 %v3631_v61, %v3388_v48  ;;  %v3390_v60 = vadd.f32 %v3346_v21, %v6987_v46 }
 0x2e6   : > { %v4331_v34 = vadd.f32 %v4282_v30, %v3677_v39  ;;  %v4832_v43 = vsub.f32 0.0, %v4800_v32  ;;  %v4680_v53 = vpop.f32.mrf.mxu0 }
 0x2e8   : > { %v5884_v7 = vpop.eup %5883  ;;  %v4884_v2 = vmul.f32 1.442695, %v4832_v43  ;;  %v4729_v52 = vadd.f32 %v4680_v53, %v4331_v34 }
 0x2e9   : > { %v5886_v50 = vpop.eup %5885  ;;  %v4927_v9 = vadd.f32 1.0, %v5884_v7 }
 0x2ea   : > { %v4990_v44 = vmul.f32 %v5886_v50, %v4798_v35  ;;  %5887 = vpow2.f32 %v4884_v2  ;;  %v4765_v28 = vmul.f32 %v7495_v33, %v4729_v52  ;;  %v7654_v2 = vld [vmem:[#allocation12_spill] sm:$0xff] }
 0x2eb   : > { %5889 = vrcp.f32 %v4927_v9 }
 0x2ec   : > { %v3633_v36 = vpop.f32.mrf.mxu2  ;;  %5023 = vst.msk [vmem:[%s7226_s25 + $0x90] sm:$0xff] %vm5004_vm0, %v4990_v44  ;;  %v4801_v51 = vadd.f32 %v7503_v29, %v4765_v28  ;;  %v3348_v3 = vpop.f32.mrf.mxu1 }
 0x2ed   : > { %v4285_v63 = vpop.f32.mrf.mxu3  ;;  %v3679_v18 = vadd.f32 %v3633_v36, %v3389_v23  ;;  %v3391_v22 = vadd.f32 %v3348_v3, %v7653_v24  ;;  %v7655_v3 = vld [vmem:[#allocation3_spill] sm:$0xff] }
 0x2ee   : > { %v4332_v58 = vadd.f32 %v4285_v63, %v3678_v27  ;;  %v4833_v25 = vsub.f32 0.0, %v4801_v51  ;;  %v4683_v13 = vpop.f32.mrf.mxu0 }
 0x2f0   : > { %v5888_v5 = vpop.eup %5887  ;;  %v4886_v4 = vmul.f32 1.442695, %v4833_v25  ;;  %v4730_v31 = vadd.f32 %v4683_v13, %v4332_v58 }
 0x2f1   : > { %v5890_v54 = vpop.eup %5889  ;;  %v4928_v57 = vadd.f32 1.0, %v5888_v5 }
 0x2f2   : > { %v4991_v35 = vmul.f32 %v5890_v54, %v4799_v8  ;;  %5891 = vpow2.f32 %v4886_v4  ;;  %v4766_v16 = vmul.f32 %v7495_v33, %v4730_v31 }
 0x2f3   : > { %5893 = vrcp.f32 %v4928_v57 }
 0x2f4   : > { %v3636_v0 = vpop.f32.mrf.mxu2  ;;  %5024 = vst.msk [vmem:[%s7226_s25 + $0x98] sm:$0xff] %vm5004_vm0, %v4991_v35  ;;  %v4802_v62 = vadd.f32 %v7503_v29, %v4766_v16  ;;  %v3351_v26 = vpop.f32.mrf.mxu1 }
 0x2f5   : > { %v4287_v55 = vpop.f32.mrf.mxu3  ;;  %v3680_v37 = vadd.f32 %v3636_v0, %v3390_v60  ;;  %v3392_v52 = vadd.f32 %v3351_v26, %v7654_v2 }
 0x2f6   : > { %v4333_v15 = vadd.f32 %v4287_v55, %v3679_v18  ;;  %v4834_v14 = vsub.f32 0.0, %v4802_v62  ;;  %v4685_v20 = vpop.f32.mrf.mxu0 }
 0x2f8   : > { %v5892_v38 = vpop.eup %5891  ;;  %v4888_v59 = vmul.f32 1.442695, %v4834_v14  ;;  %v4731_v19 = vadd.f32 %v4685_v20, %v4333_v15 }
 0x2f9   : > { %v5894_v49 = vpop.eup %5893  ;;  %v4929_v45 = vadd.f32 1.0, %v5892_v38 }
 0x2fa   : > { %v4992_v56 = vmul.f32 %v5894_v49, %v4800_v32  ;;  %5895 = vpow2.f32 %v4888_v59  ;;  %v4767_v8 = vmul.f32 %v7495_v33, %v4731_v19  ;;  %v7656_v49 = vld [vmem:[#allocation4_spill] sm:$0xff] }
 0x2fb   : > { %5897 = vrcp.f32 %v4929_v45 }
 0x2fc   : > { %v3638_v11 = vpop.f32.mrf.mxu2  ;;  %5025 = vst.msk [vmem:[%s7226_s25 + $0xa0] sm:$0xff] %vm5004_vm0, %v4992_v56  ;;  %v4803_v47 = vadd.f32 %v7503_v29, %v4767_v8  ;;  %v3353_v21 = vpop.f32.mrf.mxu1 }
 0x2fd   : > { %v4290_v10 = vpop.f32.mrf.mxu3  ;;  %v3681_v40 = vadd.f32 %v3638_v11, %v3391_v22  ;;  %v3393_v54 = vadd.f32 %v3353_v21, %v7655_v3 }
 0x2fe   : > { %v4334_v46 = vadd.f32 %v4290_v10, %v3680_v37  ;;  %v4835_v17 = vsub.f32 0.0, %v4803_v47  ;;  %v4688_v42 = vpop.f32.mrf.mxu0 }
 0x300   : > { %v5896_v12 = vpop.eup %5895  ;;  %v4890_v6 = vmul.f32 1.442695, %v4835_v17  ;;  %v4732_v41 = vadd.f32 %v4688_v42, %v4334_v46 }
 0x301   : > { %v5898_v39 = vpop.eup %5897  ;;  %v4930_v1 = vadd.f32 1.0, %v5896_v12 }
 0x302   : > { %v4993_v61 = vmul.f32 %v5898_v39, %v4801_v51  ;;  %5899 = vpow2.f32 %v4890_v6  ;;  %v4768_v32 = vmul.f32 %v7495_v33, %v4732_v41  ;;  %v7657_v39 = vld [vmem:[#allocation5_spill] sm:$0xff] }
 0x303   : > { %5901 = vrcp.f32 %v4930_v1 }
 0x304   : > { %v3641_v30 = vpop.f32.mrf.mxu2  ;;  %5026 = vst.msk [vmem:[%s7226_s25 + $0xa8] sm:$0xff] %vm5004_vm0, %v4993_v61  ;;  %v4804_v34 = vadd.f32 %v7503_v29, %v4768_v32  ;;  %v3356_v4 = vpop.f32.mrf.mxu1 }
 0x305   : > { %v4292_v43 = vpop.f32.mrf.mxu3  ;;  %v3682_v36 = vadd.f32 %v3641_v30, %v3392_v52  ;;  %v3394_v45 = vadd.f32 %v3356_v4, %v7656_v49 }
 0x306   : > { %v4335_v53 = vadd.f32 %v4292_v43, %v3681_v40  ;;  %v4836_v48 = vsub.f32 0.0, %v4804_v34  ;;  %v4690_v7 = vpop.f32.mrf.mxu0 }
 0x308   : > { %v5900_v50 = vpop.eup %5899  ;;  %v4892_v9 = vmul.f32 1.442695, %v4836_v48  ;;  %v4733_v27 = vadd.f32 %v4690_v7, %v4335_v53 }
 0x309   : > { %v5902_v44 = vpop.eup %5901  ;;  %v4931_v28 = vadd.f32 1.0, %v5900_v50 }
 0x30a   : > { %v4994_v51 = vmul.f32 %v5902_v44, %v4802_v62  ;;  %5903 = vpow2.f32 %v4892_v9  ;;  %v4769_v63 = vmul.f32 %v7495_v33, %v4733_v27  ;;  %v7658_v44 = vld [vmem:[#allocation6_spill] sm:$0xff] }
 0x30b   : > { %5905 = vrcp.f32 %v4931_v28 }
 0x30c   : > { %v3643_v58 = vpop.f32.mrf.mxu2  ;;  %5027 = vst.msk [vmem:[%s7226_s25 + $0xb0] sm:$0xff] %vm5004_vm0, %v4994_v51  ;;  %v4805_v25 = vadd.f32 %v7503_v29, %v4769_v63  ;;  %v3358_v26 = vpop.f32.mrf.mxu1 }
 0x30d   : > { %v4295_v13 = vpop.f32.mrf.mxu3  ;;  %v3683_v62 = vadd.f32 %v3643_v58, %v3393_v54  ;;  %v3395_v1 = vadd.f32 %v3358_v26, %v7657_v39 }
 0x30e   : > { %v4336_v23 = vadd.f32 %v4295_v13, %v3682_v36  ;;  %v4837_v5 = vsub.f32 0.0, %v4805_v25  ;;  %v4693_v31 = vpop.f32.mrf.mxu0 }
 0x310   : > { %v5904_v57 = vpop.eup %5903  ;;  %v4894_v18 = vmul.f32 1.442695, %v4837_v5  ;;  %v4734_v35 = vadd.f32 %v4693_v31, %v4336_v23 }
 0x311   : > { %v5906_v16 = vpop.eup %5905  ;;  %v4932_v0 = vadd.f32 1.0, %v5904_v57 }
 0x312   : > { %v4995_v55 = vmul.f32 %v5906_v16, %v4803_v47  ;;  %5907 = vpow2.f32 %v4894_v18  ;;  %v4770_v15 = vmul.f32 %v7495_v33, %v4734_v35  ;;  %v7659_v16 = vld [vmem:[#allocation13_spill] sm:$0xff] }
 0x313   : > { %5909 = vrcp.f32 %v4932_v0 }
 0x314   : > { %v3646_v14 = vpop.f32.mrf.mxu2  ;;  %5028 = vst.msk [vmem:[%s7226_s25 + $0xb8] sm:$0xff] %vm5004_vm0, %v4995_v55  ;;  %v4806_v20 = vadd.f32 %v7503_v29, %v4770_v15  ;;  %v3361_v48 = vpop.f32.mrf.mxu1 }
 0x315   : > { %v4297_v60 = vpop.f32.mrf.mxu3  ;;  %v3684_v10 = vadd.f32 %v3646_v14, %v3394_v45  ;;  %v3396_v28 = vadd.f32 %v3361_v48, %v7658_v44 }
 0x316   : > { %v4337_v38 = vadd.f32 %v4297_v60, %v3683_v62  ;;  %v4838_v59 = vsub.f32 0.0, %v4806_v20  ;;  %v4695_v19 = vpop.f32.mrf.mxu0 }
 0x318   : > { %v5908_v37 = vpop.eup %5907  ;;  %v4896_v56 = vmul.f32 1.442695, %v4838_v59  ;;  %v4735_v8 = vadd.f32 %v4695_v19, %v4337_v38 }
 0x319   : > { %v5910_v11 = vpop.eup %5909  ;;  %v4933_v47 = vadd.f32 1.0, %v5908_v37 }
 0x31a   : > { %v4996_v46 = vmul.f32 %v5910_v11, %v4804_v34  ;;  %5911 = vpow2.f32 %v4896_v56  ;;  %v4771_v17 = vmul.f32 %v7495_v33, %v4735_v8 }
 0x31b   : > { %5913 = vrcp.f32 %v4933_v47 }
 0x31c   : > { %v3648_v42 = vpop.f32.mrf.mxu2  ;;  %5029 = vst.msk [vmem:[%s7226_s25 + $0xc0] sm:$0xff] %vm5004_vm0, %v4996_v46  ;;  %v4807_v24 = vadd.f32 %v7503_v29, %v4771_v17  ;;  %v3363_v3 = vpop.f32.mrf.mxu1 }
 0x31d   : > { %v4300_v22 = vpop.f32.mrf.mxu3  ;;  %v3685_v43 = vadd.f32 %v3648_v42, %v3395_v1  ;;  %v3397_v0 = vadd.f32 %v3363_v3, %v7659_v16 }
 0x31e   : > { %v4338_v12 = vadd.f32 %v4300_v22, %v3684_v10  ;;  %v4839_v6 = vsub.f32 0.0, %v4807_v24  ;;  %v4698_v41 = vpop.f32.mrf.mxu0 }
 0x320   : > { %v5912_v40 = vpop.eup %5911  ;;  %v4898_v61 = vmul.f32 1.442695, %v4839_v6  ;;  %v4736_v32 = vadd.f32 %v4698_v41, %v4338_v12 }
 0x321   : > { %v5914_v30 = vpop.eup %5913  ;;  %v4934_v34 = vadd.f32 1.0, %v5912_v40 }
 0x322   : > { %v4997_v21 = vmul.f32 %v5914_v30, %v4805_v25  ;;  %5915 = vpow2.f32 %v4898_v61  ;;  %v4772_v53 = vmul.f32 %v7495_v33, %v4736_v32 }
 0x323   : > { %5917 = vrcp.f32 %v4934_v34 }
 0x324   : > { %5030 = vst.msk [vmem:[%s7226_s25 + $0xc8] sm:$0xff] %vm5004_vm0, %v4997_v21  ;;  %v4808_v7 = vadd.f32 %v7503_v29, %v4772_v53  ;;  %v3651_v52 = vpop.f32.mrf.mxu2 }
 0x325   : > { %v4302_v2 = vpop.f32.mrf.mxu3  ;;  %v3686_v13 = vadd.f32 %v3651_v52, %v3396_v28 }
 0x326   : > { %v4339_v50 = vadd.f32 %v4302_v2, %v3685_v43  ;;  %v4840_v9 = vsub.f32 0.0, %v4808_v7  ;;  %v4700_v27 = vpop.f32.mrf.mxu0 }
 0x328   : > { %v5916_v36 = vpop.eup %5915  ;;  %v4900_v51 = vmul.f32 1.442695, %v4840_v9  ;;  %v4737_v63 = vadd.f32 %v4700_v27, %v4339_v50 }
 0x329   : > { %v5918_v58 = vpop.eup %5917  ;;  %v4935_v25 = vadd.f32 1.0, %v5916_v36 }
 0x32a   : > { %v4998_v23 = vmul.f32 %v5918_v58, %v4806_v20  ;;  %5919 = vpow2.f32 %v4900_v51  ;;  %v4773_v5 = vmul.f32 %v7495_v33, %v4737_v63 }
 0x32b   : > { %5921 = vrcp.f32 %v4935_v25 }
 0x32c   : > { %5031 = vst.msk [vmem:[%s7226_s25 + $0xd0] sm:$0xff] %vm5004_vm0, %v4998_v23  ;;  %v4809_v4 = vadd.f32 %v7503_v29, %v4773_v5  ;;  %v3653_v18 = vpop.f32.mrf.mxu2 }
 0x32d   : > { %v4305_v31 = vpop.f32.mrf.mxu3  ;;  %v3687_v60 = vadd.f32 %v3653_v18, %v3397_v0 }
 0x32e   : > { %v4340_v54 = vadd.f32 %v4305_v31, %v3686_v13  ;;  %v4841_v57 = vsub.f32 0.0, %v4809_v4  ;;  %v4703_v35 = vpop.f32.mrf.mxu0 }
 0x330   : > { %v5920_v62 = vpop.eup %5919  ;;  %v4902_v55 = vmul.f32 1.442695, %v4841_v57  ;;  %v4738_v15 = vadd.f32 %v4703_v35, %v4340_v54 }
 0x331   : > { %v5922_v14 = vpop.eup %5921  ;;  %v4936_v20 = vadd.f32 1.0, %v5920_v62 }
 0x332   : > { %v4999_v38 = vmul.f32 %v5922_v14, %v4807_v24  ;;  %5923 = vpow2.f32 %v4902_v55  ;;  %v4774_v59 = vmul.f32 %v7495_v33, %v4738_v15 }
 0x333   : > { %5925 = vrcp.f32 %v4936_v20 }
 0x334   : > { %5032 = vst.msk [vmem:[%s7226_s25 + $0xd8] sm:$0xff] %vm5004_vm0, %v4999_v38  ;;  %v4810_v19 = vadd.f32 %v7503_v29, %v4774_v59 }
 0x335   : > { %v4307_v49 = vpop.f32.mrf.mxu3 }
 0x336   : > { %v4341_v45 = vadd.f32 %v4307_v49, %v3687_v60  ;;  %v4842_v37 = vsub.f32 0.0, %v4810_v19  ;;  %v4705_v56 = vpop.f32.mrf.mxu0 }
 0x338   : > { %v5924_v8 = vpop.eup %5923  ;;  %v4904_v26 = vmul.f32 1.442695, %v4842_v37  ;;  %v4739_v11 = vadd.f32 %v4705_v56, %v4341_v45 }
 0x339   : > { %v5926_v47 = vpop.eup %5925  ;;  %v4937_v10 = vadd.f32 1.0, %v5924_v8 }
 0x33a   : > { %v5000_v46 = vmul.f32 %v5926_v47, %v4808_v7  ;;  %5927 = vpow2.f32 %v4904_v26  ;;  %v4775_v17 = vmul.f32 %v7495_v33, %v4739_v11 }
 0x33b   : > { %5929 = vrcp.f32 %v4937_v10 }
 0x33c   : > { %5033 = vst.msk [vmem:[%s7226_s25 + $0xe0] sm:$0xff] %vm5004_vm0, %v5000_v46  ;;  %v4811_v42 = vadd.f32 %v7503_v29, %v4775_v17 }
 0x33e   : > { %v4843_v24 = vsub.f32 0.0, %v4811_v42 }
 0x340   : > { %v5928_v22 = vpop.eup %5927  ;;  %v4906_v12 = vmul.f32 1.442695, %v4843_v24 }
 0x341   : > { %v5930_v6 = vpop.eup %5929  ;;  %v4938_v41 = vadd.f32 1.0, %v5928_v22 }
 0x342   : > { %v5001_v39 = vmul.f32 %v5930_v6, %v4809_v4  ;;  %5931 = vpow2.f32 %v4906_v12 }
 0x343   : > { %5933 = vrcp.f32 %v4938_v41 }
 0x344   : > { %5034 = vst.msk [vmem:[%s7226_s25 + $0xe8] sm:$0xff] %vm5004_vm0, %v5001_v39 }
 0x348   : > { %v5932_v1 = vpop.eup %5931 }
 0x349   : > { %v5934_v40 = vpop.eup %5933  ;;  %v4939_v33 = vadd.f32 1.0, %v5932_v1 }
 0x34a   : > { %v5002_v61 = vmul.f32 %v5934_v40, %v4810_v19 }
 0x34b   : > { %5935 = vrcp.f32 %v4939_v33 }
 0x34c   : > { %5035 = vst.msk [vmem:[%s7226_s25 + $0xf0] sm:$0xff] %vm5004_vm0, %v5002_v61 }
 0x351   : > { %v5936_v32 = vpop.eup %5935 }
 0x352   : > { %v5003_v29 = vmul.f32 %v5936_v32, %v4811_v42 }
 0x354   : > { %5036 = vst.msk [vmem:[%s7226_s25 + $0xf8] sm:$0xff] %vm5004_vm0, %v5003_v29 }
 0x355 PF: > { %s14_s17 = sadd.s32 1, %s6017_s17   ;;  %s7660_s15 = smov %s6013_s16 }
 0x356   : > { %p11_p5 = scmp.ge.s32.totalorder %s14_s17, 4   ;;  %s7661_s16 = smov %s7663_s18 }
 0x358   :  { %13 = sbr.rel (!%p11_p5) target bundleno = 2 (0x2), region = 83 }

</bundles_post_ra>
